<compile_context>
chip_gen: v7x
topology: tpu7x:2x2x1
jax: 0.10.0
libtpu: 0.0.40
codegen_flags: <defaults>
</compile_context>

<pallas_src>
import functools
import itertools

import numpy as np
import jax
import jax.numpy as jnp
from jax.experimental import pallas as pl
from jax.experimental.pallas import tpu as pltpu

# ----------------------------- configuration --------------------------------
DIM = 64                     # channel dim C
NUM_HEADS = 2
KEY_DIM = DIM // NUM_HEADS   # head_dim; attn_ratio=1 => d == key_dim, dh == DIM
WINDOW = 4                   # window_size
MLP_RATIO = 4.0
MLP_HIDDEN = int(DIM * MLP_RATIO)
LN_EPS = 1e-5                # nn.LayerNorm default
BN_EPS = 1e-5                # nn.BatchNorm2d default
ATTN_SCALE = KEY_DIM ** (-0.5)
MASK_VALUE = -1e30           # off-window bias: exp() underflows to exactly 0.0
USE_BF16_MXU = False         # v6e/v7x option: feed MXU with bf16 operands
                             # (f32 accumulation). Off by default for exact
                             # f32 parity with the PyTorch module.


# ----------------------------- math helpers ---------------------------------
def _erf(x):
    # Abramowitz & Stegun 7.1.26 (|err| < 1.5e-7): exact-GELU semantics using
    # only exp/mul/add inside the kernel.
    p = 0.3275911
    a1, a2, a3, a4, a5 = (0.254829592, -0.284496736, 1.421413741,
                          -1.453152027, 1.061405429)
    s = jnp.where(x >= 0.0, 1.0, -1.0)
    ax = jnp.abs(x)
    t = 1.0 / (1.0 + p * ax)
    poly = ((((a5 * t + a4) * t + a3) * t + a2) * t + a1) * t
    return s * (1.0 - poly * jnp.exp(-ax * ax))


def _gelu_exact(x):
    return 0.5 * x * (1.0 + _erf(x * (2.0 ** -0.5)))


def _layernorm(x, gamma, beta):
    mu = jnp.mean(x, axis=-1, keepdims=True)
    var = jnp.mean(jnp.square(x - mu), axis=-1, keepdims=True)
    return (x - mu) * jax.lax.rsqrt(var + LN_EPS) * gamma + beta


def _mxu(a):
    # Optionally cast MXU operands to bf16 (accumulation stays f32 via
    # preferred_element_type); all VPU/EUP math remains f32.
    return a.astype(jnp.bfloat16) if USE_BF16_MXU else a


# ----------------------------- fused Pallas kernel ---------------------------
def _tinyvit_block_kernel(
        x_ref,                                   # (1, L, C)
        ln_attn_ref,                             # attention LayerNorm (2, C)
        wqkv_ref,                                # per-head qkv weights (3, nh, C, kd)
        bqkv_ref,                                # per-head qkv biases  (3, nh, 1, kd)
        ab_ref,                                  # block-diag attn bias (nh, L, L)
        wp_ref, bp_ref,                          # proj (nh, kd, C) / (1, C)
        cw_ref, bnb_ref,                         # BN-fused conv (3,3,1,C) + shift (1,C)
        ln_mlp_ref,                              # MLP LayerNorm (2, C)
        w1_ref, b1_ref, w2_ref, b2_ref,          # fc1/fc2
        o_ref,                                   # (1, L, C)
        pad_ref,                                 # VMEM scratch (H+2, W+2, C)
        *, H, W, num_heads):
    L = H * W
    x = x_ref[0].astype(jnp.float32)             # (L, C)
    C = x.shape[-1]

    # ---- attention: all windows at once via block-diagonal masked bias ------
    xn = _layernorm(x, ln_attn_ref[0], ln_attn_ref[1])
    xn_m = _mxu(xn)
    y = None
    for h in range(num_heads):                   # static loop, nh == 2
        # Wq/bq already carry the key_dim**-0.5 scale (folded at init).
        qh = jnp.dot(xn_m, _mxu(wqkv_ref[0, h]),
                     preferred_element_type=jnp.float32) + bqkv_ref[0, h]
        kh = jnp.dot(xn_m, _mxu(wqkv_ref[1, h]),
                     preferred_element_type=jnp.float32) + bqkv_ref[1, h]
        vh = jnp.dot(xn_m, _mxu(wqkv_ref[2, h]),
                     preferred_element_type=jnp.float32) + bqkv_ref[2, h]
        logits = jax.lax.dot_general(            # q @ k^T, contract over kd
            _mxu(qh), _mxu(kh),
            dimension_numbers=(((1,), (1,)), ((), ())),
            preferred_element_type=jnp.float32) + ab_ref[h]
        logits = logits - jnp.max(logits, axis=-1, keepdims=True)
        p = jnp.exp(logits)                      # off-window entries -> exact 0
        p = p * pl.reciprocal(jnp.sum(p, axis=-1, keepdims=True), approx=True)
        oh = jnp.dot(_mxu(p), _mxu(vh), preferred_element_type=jnp.float32)
        contrib = jnp.dot(_mxu(oh), _mxu(wp_ref[h]),
                          preferred_element_type=jnp.float32)
        y = contrib if y is None else y + contrib
    y = y + bp_ref[0]

    # ---- first residual ------------------------------------------------------
    z = x + y                                    # (L, C)

    # ---- depthwise 3x3 local_conv, BN already fused into weights (NHWC) ------
    pad_ref[...] = jnp.zeros_like(pad_ref)       # cheap: (H+2, W+2, C) scratch
    pad_ref[1:H + 1, 1:W + 1, :] = z.reshape(H, W, C)
    # hoist the 3 sublane-offset (column) shifts; row shifts index the cheap
    # leading (tile) dimension inside the tap loop.
    cols = [pad_ref[:, dw:dw + W, :] for dw in range(3)]   # each (H+2, W, C)
    acc = None
    for dh in range(3):
        for dw in range(3):
            term = cols[dw][dh:dh + H] * cw_ref[dh, dw]
            acc = term if acc is None else acc + term
    z2 = (acc + bnb_ref[0]).reshape(L, C)

    # ---- MLP + second residual (fused) ---------------------------------------
    zn = _layernorm(z2, ln_mlp_ref[0], ln_mlp_ref[1])
    hdn = jnp.dot(_mxu(zn), _mxu(w1_ref[...]),
                  preferred_element_type=jnp.float32) + b1_ref[0]
    hdn = _gelu_exact(hdn)
    y2 = jnp.dot(_mxu(hdn), _mxu(w2_ref[...]),
                 preferred_element_type=jnp.float32) + b2_ref[0]
    o_ref[0] = (z2 + y2).astype(o_ref.dtype)


# ----------------------------- pallas_call wrapper ----------------------------
def _bcast_spec(*shape):
    # full-array block, same block every grid step (fetched once, reused)
    n = len(shape)
    return pl.BlockSpec(shape, lambda b, _n=n: (0,) * _n)


def tiny_vit_block_forward(x, params, *, H, W, window_size):
    B, L, C = x.shape
    assert L == H * W, "input feature has wrong size"
    # TODO(synk): the window zero-padding path (H or W not divisible by
    # window_size) is not fused here; the configured resolution (8,8)/ws=4
    # never needs it.
    assert H % window_size == 0 and W % window_size == 0

    kernel = functools.partial(_tinyvit_block_kernel, H=H, W=W,
                               num_heads=NUM_HEADS)
    return pl.pallas_call(
        kernel,
        out_shape=jax.ShapeDtypeStruct((B, L, C), x.dtype),
        grid=(B,),
        in_specs=[
            pl.BlockSpec((1, L, C), lambda b: (b, 0, 0)),            # x
            _bcast_spec(2, C),                                       # attn LN g/b
            _bcast_spec(3, NUM_HEADS, C, KEY_DIM),                   # wqkv
            _bcast_spec(3, NUM_HEADS, 1, KEY_DIM),                   # bqkv
            _bcast_spec(NUM_HEADS, L, L),                            # masked bias
            _bcast_spec(NUM_HEADS, KEY_DIM, C),                      # proj w
            _bcast_spec(1, C),                                       # proj b
            _bcast_spec(3, 3, 1, C),                                 # conv w (BN-fused)
            _bcast_spec(1, C),                                       # BN shift
            _bcast_spec(2, C),                                       # MLP LN g/b
            _bcast_spec(C, MLP_HIDDEN), _bcast_spec(1, MLP_HIDDEN),  # fc1
            _bcast_spec(MLP_HIDDEN, C), _bcast_spec(1, C),           # fc2
        ],
        out_specs=pl.BlockSpec((1, L, C), lambda b: (b, 0, 0)),
        scratch_shapes=[pltpu.VMEM((H + 2, W + 2, C), jnp.float32)],
        compiler_params=pltpu.CompilerParams(
            dimension_semantics=("parallel",)),
    )(x,
      params["ln_attn"],
      params["wqkv"], params["bqkv"],
      params["ab"],
      params["proj_w"], params["proj_b"],
      params["conv_w"], params["bn_shift"],
      params["ln_mlp"],
      params["fc1_w"], params["fc1_b"], params["fc2_w"], params["fc2_b"])


# ----------------------------- parameter init --------------------------------
def _build_masked_attention_bias(attention_biases, H, W, ws):
    """(nh, L, L) bias in spatial row order: eval-mode `ab` inside each window,
    MASK_VALUE across windows (=> exact per-window softmax)."""
    points = list(itertools.product(range(ws), range(ws)))
    offmap = {}
    for p1 in points:
        for p2 in points:
            off = (abs(p1[0] - p2[0]), abs(p1[1] - p2[1]))
            if off not in offmap:
                offmap[off] = len(offmap)
    ab = np.asarray(attention_biases)            # (nh, num_offsets)
    L = H * W
    bias = np.full((ab.shape[0], L, L), MASK_VALUE, np.float32)
    for h1 in range(H):
        for w1 in range(W):
            r1 = h1 * W + w1
            for h2 in range(H):
                for w2 in range(W):
                    if h1 // ws == h2 // ws and w1 // ws == w2 // ws:
                        r2 = h2 * W + w2
                        bias[:, r1, r2] = ab[:, offmap[(abs(h1 - h2),
                                                        abs(w1 - w2))]]
    return jnp.asarray(bias)


def init_params(key, *, H, W):
    ks = jax.random.split(key, 16)

    def rn(k, shape, scale=0.05):
        return jax.random.normal(k, shape, jnp.float32) * scale

    C = DIM

    # attention relative-position bias table (as in Attention.__init__)
    points = list(itertools.product(range(WINDOW), range(WINDOW)))
    attention_offsets = {}
    for p1 in points:
        for p2 in points:
            off = (abs(p1[0] - p2[0]), abs(p1[1] - p2[1]))
            if off not in attention_offsets:
                attention_offsets[off] = len(attention_offsets)
    attention_biases = rn(ks[0], (NUM_HEADS, len(attention_offsets)), 0.1)

    # qkv weight in the PyTorch output-column order (out = h*3*kd + t*kd + j),
    # re-laid-out ONCE into per-head Wq/Wk/Wv so the kernel never slices at
    # lane offsets. The attention scale is folded into Wq/bq here (exact).
    qkv_w = rn(ks[3], (C, 3 * C))                       # (in, out) layout
    qkv_b = rn(ks[4], (3 * C,), 0.02)
    qkv_w4 = qkv_w.reshape(C, NUM_HEADS, 3, KEY_DIM)
    qkv_b3 = qkv_b.reshape(NUM_HEADS, 3, KEY_DIM)
    wq = jnp.transpose(qkv_w4[:, :, 0, :], (1, 0, 2)) * ATTN_SCALE  # (nh, C, kd)
    wk = jnp.transpose(qkv_w4[:, :, 1, :], (1, 0, 2))
    wv = jnp.transpose(qkv_w4[:, :, 2, :], (1, 0, 2))
    bq = qkv_b3[:, 0, :][:, None, :] * ATTN_SCALE       # (nh, 1, kd)
    bk = qkv_b3[:, 1, :][:, None, :]
    bv = qkv_b3[:, 2, :][:, None, :]
    wqkv = jnp.stack([wq, wk, wv], axis=0)              # (3, nh, C, kd)
    bqkv = jnp.stack([bq, bk, bv], axis=0)              # (3, nh, 1, kd)

    # proj weight (dh, C) split per head: concat(heads) @ W == sum_h o_h @ W_h
    proj_w_full = rn(ks[5], (C, C))                     # (dh=C, C), (in, out)
    proj_w = proj_w_full.reshape(NUM_HEADS, KEY_DIM, C)

    params = dict(
        ln_attn=jnp.concatenate(
            [jnp.ones((1, C), jnp.float32) + rn(ks[1], (1, C), 0.02),
             rn(ks[2], (1, C), 0.02)], axis=0),          # (2, C): gamma, beta
        wqkv=wqkv, bqkv=bqkv,
        proj_w=proj_w,
        proj_b=rn(ks[6], (1, C), 0.02),
        ab=_build_masked_attention_bias(attention_biases, H, W, WINDOW),
        ln_mlp=jnp.concatenate(
            [jnp.ones((1, C), jnp.float32) + rn(ks[7], (1, C), 0.02),
             rn(ks[8], (1, C), 0.02)], axis=0),          # (2, C): gamma, beta
        fc1_w=rn(ks[9], (C, MLP_HIDDEN)),
        fc1_b=rn(ks[10], (1, MLP_HIDDEN), 0.02),
        fc2_w=rn(ks[11], (MLP_HIDDEN, C)),
        fc2_b=rn(ks[12], (1, C), 0.02),
    )

    # depthwise local_conv weight: PyTorch (C, 1, 3, 3) stored here as (3,3,1,C)
    conv_w = rn(ks[13], (3, 3, 1, C), 0.1)
    # Conv2d_BN init: bn.weight=1, bn.bias=0; default running stats (eval mode).
    # Fuse the BN scale into the conv weights (exact, == Conv2d_BN.fuse()).
    bn_gamma = jnp.ones((C,), jnp.float32)
    bn_beta = jnp.zeros((C,), jnp.float32)
    run_mean = jnp.zeros((C,), jnp.float32)
    run_var = jnp.ones((C,), jnp.float32)
    bn_scale = bn_gamma / jnp.sqrt(run_var + BN_EPS)
    bn_shift = bn_beta - run_mean * bn_scale
    params["conv_w"] = conv_w * bn_scale.reshape(1, 1, 1, C)
    params["bn_shift"] = bn_shift.reshape(1, C)
    return params


# ----------------------------- main ------------------------------------------
if __name__ == "__main__":
    key = jax.random.PRNGKey(0)
    kx, kp = jax.random.split(key)

    B, H, W = 2, 8, 8                 # input_resolution=(8, 8), window_size=4
    x = jax.random.normal(kx, (B, H * W, DIM), jnp.float32)
    params = init_params(kp, H=H, W=W)

    fwd = jax.jit(functools.partial(tiny_vit_block_forward,
                                    H=H, W=W, window_size=WINDOW))
    out = fwd(x, params)
    jax.block_until_ready(out)
    assert out.shape == (B, H * W, DIM)
    assert bool(jnp.all(jnp.isfinite(out)))
    print("KERNEL_OK")
</pallas_src>

<mosaic_0001>
module attributes {stable_mosaic.version = 11 : i64} {
  func.func @_tinyvit_block_kernel(%arg0: i32, %arg1: memref<1x64x64xf32, #tpu.memory_space<vmem>>, %arg2: memref<2x64xf32, #tpu.memory_space<vmem>>, %arg3: memref<3x2x64x32xf32, #tpu.memory_space<vmem>>, %arg4: memref<3x2x1x32xf32, #tpu.memory_space<vmem>>, %arg5: memref<2x64x64xf32, #tpu.memory_space<vmem>>, %arg6: memref<2x32x64xf32, #tpu.memory_space<vmem>>, %arg7: memref<1x64xf32, #tpu.memory_space<vmem>>, %arg8: memref<3x3x1x64xf32, #tpu.memory_space<vmem>>, %arg9: memref<1x64xf32, #tpu.memory_space<vmem>>, %arg10: memref<2x64xf32, #tpu.memory_space<vmem>>, %arg11: memref<64x256xf32, #tpu.memory_space<vmem>>, %arg12: memref<1x256xf32, #tpu.memory_space<vmem>>, %arg13: memref<256x64xf32, #tpu.memory_space<vmem>>, %arg14: memref<1x64xf32, #tpu.memory_space<vmem>>, %arg15: memref<1x64x64xf32, #tpu.memory_space<vmem>>, %arg16: memref<10x10x64xf32, #tpu.memory_space<vmem>>) attributes {dimension_semantics = [#tpu.dimension_semantics<parallel>], iteration_bounds = array<i64: 2>, scalar_prefetch = 0 : i64, scratch_operands = 1 : i64, tpu.core_type = #tpu.core_type<tc>, window_params = [{transform_indices = @transform_0, window_bounds = array<i64: 1, 64, 64>}, {pipeline_mode = #tpu.pipeline_mode<synchronous>, transform_indices = @transform_1, window_bounds = array<i64: 2, 64>}, {pipeline_mode = #tpu.pipeline_mode<synchronous>, transform_indices = @transform_2, window_bounds = array<i64: 3, 2, 64, 32>}, {pipeline_mode = #tpu.pipeline_mode<synchronous>, transform_indices = @transform_3, window_bounds = array<i64: 3, 2, 1, 32>}, {pipeline_mode = #tpu.pipeline_mode<synchronous>, transform_indices = @transform_4, window_bounds = array<i64: 2, 64, 64>}, {pipeline_mode = #tpu.pipeline_mode<synchronous>, transform_indices = @transform_5, window_bounds = array<i64: 2, 32, 64>}, {pipeline_mode = #tpu.pipeline_mode<synchronous>, transform_indices = @transform_6, window_bounds = array<i64: 1, 64>}, {pipeline_mode = #tpu.pipeline_mode<synchronous>, transform_indices = @transform_7, window_bounds = array<i64: 3, 3, 1, 64>}, {pipeline_mode = #tpu.pipeline_mode<synchronous>, transform_indices = @transform_8, window_bounds = array<i64: 1, 64>}, {pipeline_mode = #tpu.pipeline_mode<synchronous>, transform_indices = @transform_9, window_bounds = array<i64: 2, 64>}, {pipeline_mode = #tpu.pipeline_mode<synchronous>, transform_indices = @transform_10, window_bounds = array<i64: 64, 256>}, {pipeline_mode = #tpu.pipeline_mode<synchronous>, transform_indices = @transform_11, window_bounds = array<i64: 1, 256>}, {pipeline_mode = #tpu.pipeline_mode<synchronous>, transform_indices = @transform_12, window_bounds = array<i64: 256, 64>}, {pipeline_mode = #tpu.pipeline_mode<synchronous>, transform_indices = @transform_13, window_bounds = array<i64: 1, 64>}, {transform_indices = @transform_14, window_bounds = array<i64: 1, 64, 64>}]} {
    %c0 = arith.constant 0 : index
    %c0_0 = arith.constant 0 : index
    %c0_1 = arith.constant 0 : index
    %0 = vector.load %arg1[%c0, %c0_0, %c0_1] : memref<1x64x64xf32, #tpu.memory_space<vmem>>, vector<1x64x64xf32>
    %1 = vector.shape_cast %0 : vector<1x64x64xf32> to vector<64x64xf32>
    %c0_2 = arith.constant 0 : index
    %c0_3 = arith.constant 0 : index
    %2 = vector.load %arg2[%c0_2, %c0_3] : memref<2x64xf32, #tpu.memory_space<vmem>>, vector<1x64xf32>
    %3 = vector.shape_cast %2 : vector<1x64xf32> to vector<64xf32>
    %c1 = arith.constant 1 : index
    %c0_4 = arith.constant 0 : index
    %4 = vector.load %arg2[%c1, %c0_4] : memref<2x64xf32, #tpu.memory_space<vmem>>, vector<1x64xf32>
    %5 = vector.shape_cast %4 : vector<1x64xf32> to vector<64xf32>
    %cst = arith.constant dense<0.000000e+00> : vector<64xf32>
    %6 = vector.multi_reduction <add>, %1, %cst [1] : vector<64x64xf32> to vector<64xf32>
    %7 = vector.shape_cast %6 : vector<64xf32> to vector<64x1xf32>
    %cst_5 = arith.constant 6.400000e+01 : f32
    %8 = vector.broadcast %cst_5 : f32 to vector<64x1xf32>
    %9 = arith.divf %7, %8 : vector<64x1xf32>
    %10 = vector.broadcast %9 : vector<64x1xf32> to vector<64x64xf32>
    %11 = arith.subf %1, %10 : vector<64x64xf32>
    %12 = arith.mulf %11, %11 : vector<64x64xf32>
    %cst_6 = arith.constant dense<0.000000e+00> : vector<64xf32>
    %13 = vector.multi_reduction <add>, %12, %cst_6 [1] : vector<64x64xf32> to vector<64xf32>
    %14 = vector.shape_cast %13 : vector<64xf32> to vector<64x1xf32>
    %cst_7 = arith.constant 6.400000e+01 : f32
    %15 = vector.broadcast %cst_7 : f32 to vector<64x1xf32>
    %16 = arith.divf %14, %15 : vector<64x1xf32>
    %17 = vector.broadcast %9 : vector<64x1xf32> to vector<64x64xf32>
    %18 = arith.subf %1, %17 : vector<64x64xf32>
    %cst_8 = arith.constant 9.99999974E-6 : f32
    %19 = vector.broadcast %cst_8 : f32 to vector<64x1xf32>
    %20 = arith.addf %16, %19 : vector<64x1xf32>
    %21 = math.rsqrt %20 : vector<64x1xf32>
    %22 = vector.broadcast %21 : vector<64x1xf32> to vector<64x64xf32>
    %23 = arith.mulf %18, %22 : vector<64x64xf32>
    %24 = vector.shape_cast %3 : vector<64xf32> to vector<1x64xf32>
    %25 = vector.broadcast %24 : vector<1x64xf32> to vector<64x64xf32>
    %26 = arith.mulf %23, %25 : vector<64x64xf32>
    %27 = vector.shape_cast %5 : vector<64xf32> to vector<1x64xf32>
    %28 = vector.broadcast %27 : vector<1x64xf32> to vector<64x64xf32>
    %29 = arith.addf %26, %28 : vector<64x64xf32>
    %c0_9 = arith.constant 0 : index
    %c0_10 = arith.constant 0 : index
    %c0_11 = arith.constant 0 : index
    %c0_12 = arith.constant 0 : index
    %30 = vector.load %arg3[%c0_9, %c0_10, %c0_11, %c0_12] : memref<3x2x64x32xf32, #tpu.memory_space<vmem>>, vector<1x1x64x32xf32>
    %31 = vector.shape_cast %30 : vector<1x1x64x32xf32> to vector<64x32xf32>
    %cst_13 = arith.constant dense<0.000000e+00> : vector<64x32xf32>
    %32 = tpu.matmul %29, %31, %cst_13 {dimension_numbers = #tpu.dot_dimension_numbers<[1], [0], [0], [1], [0, 0, 1, 1], [], []>} : vector<64x64xf32>, vector<64x32xf32>, vector<64x32xf32> -> vector<64x32xf32>
    %c0_14 = arith.constant 0 : index
    %c0_15 = arith.constant 0 : index
    %c0_16 = arith.constant 0 : index
    %c0_17 = arith.constant 0 : index
    %33 = vector.load %arg4[%c0_14, %c0_15, %c0_16, %c0_17] : memref<3x2x1x32xf32, #tpu.memory_space<vmem>>, vector<1x1x1x32xf32>
    %34 = vector.shape_cast %33 : vector<1x1x1x32xf32> to vector<1x32xf32>
    %35 = vector.broadcast %34 : vector<1x32xf32> to vector<64x32xf32>
    %36 = arith.addf %32, %35 : vector<64x32xf32>
    %c1_18 = arith.constant 1 : index
    %c0_19 = arith.constant 0 : index
    %c0_20 = arith.constant 0 : index
    %c0_21 = arith.constant 0 : index
    %37 = vector.load %arg3[%c1_18, %c0_19, %c0_20, %c0_21] : memref<3x2x64x32xf32, #tpu.memory_space<vmem>>, vector<1x1x64x32xf32>
    %38 = vector.shape_cast %37 : vector<1x1x64x32xf32> to vector<64x32xf32>
    %cst_22 = arith.constant dense<0.000000e+00> : vector<64x32xf32>
    %39 = tpu.matmul %29, %38, %cst_22 {dimension_numbers = #tpu.dot_dimension_numbers<[1], [0], [0], [1], [0, 0, 1, 1], [], []>} : vector<64x64xf32>, vector<64x32xf32>, vector<64x32xf32> -> vector<64x32xf32>
    %c1_23 = arith.constant 1 : index
    %c0_24 = arith.constant 0 : index
    %c0_25 = arith.constant 0 : index
    %c0_26 = arith.constant 0 : index
    %40 = vector.load %arg4[%c1_23, %c0_24, %c0_25, %c0_26] : memref<3x2x1x32xf32, #tpu.memory_space<vmem>>, vector<1x1x1x32xf32>
    %41 = vector.shape_cast %40 : vector<1x1x1x32xf32> to vector<1x32xf32>
    %42 = vector.broadcast %41 : vector<1x32xf32> to vector<64x32xf32>
    %43 = arith.addf %39, %42 : vector<64x32xf32>
    %c2 = arith.constant 2 : index
    %c0_27 = arith.constant 0 : index
    %c0_28 = arith.constant 0 : index
    %c0_29 = arith.constant 0 : index
    %44 = vector.load %arg3[%c2, %c0_27, %c0_28, %c0_29] : memref<3x2x64x32xf32, #tpu.memory_space<vmem>>, vector<1x1x64x32xf32>
    %45 = vector.shape_cast %44 : vector<1x1x64x32xf32> to vector<64x32xf32>
    %cst_30 = arith.constant dense<0.000000e+00> : vector<64x32xf32>
    %46 = tpu.matmul %29, %45, %cst_30 {dimension_numbers = #tpu.dot_dimension_numbers<[1], [0], [0], [1], [0, 0, 1, 1], [], []>} : vector<64x64xf32>, vector<64x32xf32>, vector<64x32xf32> -> vector<64x32xf32>
    %c2_31 = arith.constant 2 : index
    %c0_32 = arith.constant 0 : index
    %c0_33 = arith.constant 0 : index
    %c0_34 = arith.constant 0 : index
    %47 = vector.load %arg4[%c2_31, %c0_32, %c0_33, %c0_34] : memref<3x2x1x32xf32, #tpu.memory_space<vmem>>, vector<1x1x1x32xf32>
    %48 = vector.shape_cast %47 : vector<1x1x1x32xf32> to vector<1x32xf32>
    %49 = vector.broadcast %48 : vector<1x32xf32> to vector<64x32xf32>
    %50 = arith.addf %46, %49 : vector<64x32xf32>
    %cst_35 = arith.constant dense<0.000000e+00> : vector<64x64xf32>
    %51 = tpu.matmul %36, %43, %cst_35 {dimension_numbers = #tpu.dot_dimension_numbers<[1], [1], [0], [0], [0, 0, 1, 0], [], []>} : vector<64x32xf32>, vector<64x32xf32>, vector<64x64xf32> -> vector<64x64xf32>
    %c0_36 = arith.constant 0 : index
    %c0_37 = arith.constant 0 : index
    %c0_38 = arith.constant 0 : index
    %52 = vector.load %arg5[%c0_36, %c0_37, %c0_38] : memref<2x64x64xf32, #tpu.memory_space<vmem>>, vector<1x64x64xf32>
    %53 = vector.shape_cast %52 : vector<1x64x64xf32> to vector<64x64xf32>
    %54 = arith.addf %51, %53 : vector<64x64xf32>
    %cst_39 = arith.constant dense<0xFF800000> : vector<64xf32>
    %55 = vector.multi_reduction <maximumf>, %54, %cst_39 [1] : vector<64x64xf32> to vector<64xf32>
    %56 = vector.shape_cast %55 : vector<64xf32> to vector<64x1xf32>
    %57 = vector.broadcast %56 : vector<64x1xf32> to vector<64x64xf32>
    %58 = arith.subf %54, %57 : vector<64x64xf32>
    %59 = math.exp %58 : vector<64x64xf32>
    %cst_40 = arith.constant dense<0.000000e+00> : vector<64xf32>
    %60 = vector.multi_reduction <add>, %59, %cst_40 [1] : vector<64x64xf32> to vector<64xf32>
    %61 = vector.shape_cast %60 : vector<64xf32> to vector<64x1xf32>
    %62 = tpu.reciprocal %61 {approx = true} : vector<64x1xf32> -> vector<64x1xf32>
    %63 = vector.broadcast %62 : vector<64x1xf32> to vector<64x64xf32>
    %64 = arith.mulf %59, %63 : vector<64x64xf32>
    %cst_41 = arith.constant dense<0.000000e+00> : vector<64x32xf32>
    %65 = tpu.matmul %64, %50, %cst_41 {dimension_numbers = #tpu.dot_dimension_numbers<[1], [0], [0], [1], [0, 0, 1, 1], [], []>} : vector<64x64xf32>, vector<64x32xf32>, vector<64x32xf32> -> vector<64x32xf32>
    %c0_42 = arith.constant 0 : index
    %c0_43 = arith.constant 0 : index
    %c0_44 = arith.constant 0 : index
    %66 = vector.load %arg6[%c0_42, %c0_43, %c0_44] : memref<2x32x64xf32, #tpu.memory_space<vmem>>, vector<1x32x64xf32>
    %67 = vector.shape_cast %66 : vector<1x32x64xf32> to vector<32x64xf32>
    %cst_45 = arith.constant dense<0.000000e+00> : vector<64x64xf32>
    %68 = tpu.matmul %65, %67, %cst_45 {dimension_numbers = #tpu.dot_dimension_numbers<[1], [0], [0], [1], [0, 0, 1, 1], [], []>} : vector<64x32xf32>, vector<32x64xf32>, vector<64x64xf32> -> vector<64x64xf32>
    %c0_46 = arith.constant 0 : index
    %c1_47 = arith.constant 1 : index
    %c0_48 = arith.constant 0 : index
    %c0_49 = arith.constant 0 : index
    %69 = vector.load %arg3[%c0_46, %c1_47, %c0_48, %c0_49] : memref<3x2x64x32xf32, #tpu.memory_space<vmem>>, vector<1x1x64x32xf32>
    %70 = vector.shape_cast %69 : vector<1x1x64x32xf32> to vector<64x32xf32>
    %cst_50 = arith.constant dense<0.000000e+00> : vector<64x32xf32>
    %71 = tpu.matmul %29, %70, %cst_50 {dimension_numbers = #tpu.dot_dimension_numbers<[1], [0], [0], [1], [0, 0, 1, 1], [], []>} : vector<64x64xf32>, vector<64x32xf32>, vector<64x32xf32> -> vector<64x32xf32>
    %c0_51 = arith.constant 0 : index
    %c1_52 = arith.constant 1 : index
    %c0_53 = arith.constant 0 : index
    %c0_54 = arith.constant 0 : index
    %72 = vector.load %arg4[%c0_51, %c1_52, %c0_53, %c0_54] : memref<3x2x1x32xf32, #tpu.memory_space<vmem>>, vector<1x1x1x32xf32>
    %73 = vector.shape_cast %72 : vector<1x1x1x32xf32> to vector<1x32xf32>
    %74 = vector.broadcast %73 : vector<1x32xf32> to vector<64x32xf32>
    %75 = arith.addf %71, %74 : vector<64x32xf32>
    %c1_55 = arith.constant 1 : index
    %c1_56 = arith.constant 1 : index
    %c0_57 = arith.constant 0 : index
    %c0_58 = arith.constant 0 : index
    %76 = vector.load %arg3[%c1_55, %c1_56, %c0_57, %c0_58] : memref<3x2x64x32xf32, #tpu.memory_space<vmem>>, vector<1x1x64x32xf32>
    %77 = vector.shape_cast %76 : vector<1x1x64x32xf32> to vector<64x32xf32>
    %cst_59 = arith.constant dense<0.000000e+00> : vector<64x32xf32>
    %78 = tpu.matmul %29, %77, %cst_59 {dimension_numbers = #tpu.dot_dimension_numbers<[1], [0], [0], [1], [0, 0, 1, 1], [], []>} : vector<64x64xf32>, vector<64x32xf32>, vector<64x32xf32> -> vector<64x32xf32>
    %c1_60 = arith.constant 1 : index
    %c1_61 = arith.constant 1 : index
    %c0_62 = arith.constant 0 : index
    %c0_63 = arith.constant 0 : index
    %79 = vector.load %arg4[%c1_60, %c1_61, %c0_62, %c0_63] : memref<3x2x1x32xf32, #tpu.memory_space<vmem>>, vector<1x1x1x32xf32>
    %80 = vector.shape_cast %79 : vector<1x1x1x32xf32> to vector<1x32xf32>
    %81 = vector.broadcast %80 : vector<1x32xf32> to vector<64x32xf32>
    %82 = arith.addf %78, %81 : vector<64x32xf32>
    %c2_64 = arith.constant 2 : index
    %c1_65 = arith.constant 1 : index
    %c0_66 = arith.constant 0 : index
    %c0_67 = arith.constant 0 : index
    %83 = vector.load %arg3[%c2_64, %c1_65, %c0_66, %c0_67] : memref<3x2x64x32xf32, #tpu.memory_space<vmem>>, vector<1x1x64x32xf32>
    %84 = vector.shape_cast %83 : vector<1x1x64x32xf32> to vector<64x32xf32>
    %cst_68 = arith.constant dense<0.000000e+00> : vector<64x32xf32>
    %85 = tpu.matmul %29, %84, %cst_68 {dimension_numbers = #tpu.dot_dimension_numbers<[1], [0], [0], [1], [0, 0, 1, 1], [], []>} : vector<64x64xf32>, vector<64x32xf32>, vector<64x32xf32> -> vector<64x32xf32>
    %c2_69 = arith.constant 2 : index
    %c1_70 = arith.constant 1 : index
    %c0_71 = arith.constant 0 : index
    %c0_72 = arith.constant 0 : index
    %86 = vector.load %arg4[%c2_69, %c1_70, %c0_71, %c0_72] : memref<3x2x1x32xf32, #tpu.memory_space<vmem>>, vector<1x1x1x32xf32>
    %87 = vector.shape_cast %86 : vector<1x1x1x32xf32> to vector<1x32xf32>
    %88 = vector.broadcast %87 : vector<1x32xf32> to vector<64x32xf32>
    %89 = arith.addf %85, %88 : vector<64x32xf32>
    %cst_73 = arith.constant dense<0.000000e+00> : vector<64x64xf32>
    %90 = tpu.matmul %75, %82, %cst_73 {dimension_numbers = #tpu.dot_dimension_numbers<[1], [1], [0], [0], [0, 0, 1, 0], [], []>} : vector<64x32xf32>, vector<64x32xf32>, vector<64x64xf32> -> vector<64x64xf32>
    %c1_74 = arith.constant 1 : index
    %c0_75 = arith.constant 0 : index
    %c0_76 = arith.constant 0 : index
    %91 = vector.load %arg5[%c1_74, %c0_75, %c0_76] : memref<2x64x64xf32, #tpu.memory_space<vmem>>, vector<1x64x64xf32>
    %92 = vector.shape_cast %91 : vector<1x64x64xf32> to vector<64x64xf32>
    %93 = arith.addf %90, %92 : vector<64x64xf32>
    %cst_77 = arith.constant dense<0xFF800000> : vector<64xf32>
    %94 = vector.multi_reduction <maximumf>, %93, %cst_77 [1] : vector<64x64xf32> to vector<64xf32>
    %95 = vector.shape_cast %94 : vector<64xf32> to vector<64x1xf32>
    %96 = vector.broadcast %95 : vector<64x1xf32> to vector<64x64xf32>
    %97 = arith.subf %93, %96 : vector<64x64xf32>
    %98 = math.exp %97 : vector<64x64xf32>
    %cst_78 = arith.constant dense<0.000000e+00> : vector<64xf32>
    %99 = vector.multi_reduction <add>, %98, %cst_78 [1] : vector<64x64xf32> to vector<64xf32>
    %100 = vector.shape_cast %99 : vector<64xf32> to vector<64x1xf32>
    %101 = tpu.reciprocal %100 {approx = true} : vector<64x1xf32> -> vector<64x1xf32>
    %102 = vector.broadcast %101 : vector<64x1xf32> to vector<64x64xf32>
    %103 = arith.mulf %98, %102 : vector<64x64xf32>
    %cst_79 = arith.constant dense<0.000000e+00> : vector<64x32xf32>
    %104 = tpu.matmul %103, %89, %cst_79 {dimension_numbers = #tpu.dot_dimension_numbers<[1], [0], [0], [1], [0, 0, 1, 1], [], []>} : vector<64x64xf32>, vector<64x32xf32>, vector<64x32xf32> -> vector<64x32xf32>
    %c1_80 = arith.constant 1 : index
    %c0_81 = arith.constant 0 : index
    %c0_82 = arith.constant 0 : index
    %105 = vector.load %arg6[%c1_80, %c0_81, %c0_82] : memref<2x32x64xf32, #tpu.memory_space<vmem>>, vector<1x32x64xf32>
    %106 = vector.shape_cast %105 : vector<1x32x64xf32> to vector<32x64xf32>
    %cst_83 = arith.constant dense<0.000000e+00> : vector<64x64xf32>
    %107 = tpu.matmul %104, %106, %cst_83 {dimension_numbers = #tpu.dot_dimension_numbers<[1], [0], [0], [1], [0, 0, 1, 1], [], []>} : vector<64x32xf32>, vector<32x64xf32>, vector<64x64xf32> -> vector<64x64xf32>
    %108 = arith.addf %68, %107 : vector<64x64xf32>
    %c0_84 = arith.constant 0 : index
    %c0_85 = arith.constant 0 : index
    %109 = vector.load %arg7[%c0_84, %c0_85] : memref<1x64xf32, #tpu.memory_space<vmem>>, vector<1x64xf32>
    %110 = vector.shape_cast %109 : vector<1x64xf32> to vector<64xf32>
    %111 = vector.shape_cast %110 : vector<64xf32> to vector<1x64xf32>
    %112 = vector.broadcast %111 : vector<1x64xf32> to vector<64x64xf32>
    %113 = arith.addf %108, %112 : vector<64x64xf32>
    %114 = arith.addf %1, %113 : vector<64x64xf32>
    %cst_86 = arith.constant 0.000000e+00 : f32
    %115 = vector.broadcast %cst_86 : f32 to vector<10x10x64xf32>
    %c0_87 = arith.constant 0 : index
    %c0_88 = arith.constant 0 : index
    %c0_89 = arith.constant 0 : index
    %116 = vector.load %arg16[%c0_87, %c0_88, %c0_89] : memref<10x10x64xf32, #tpu.memory_space<vmem>>, vector<10x10x64xf32>
    tpu.vector_store %arg16[%c0_87, %c0_88, %c0_89], %115 {strides = array<i32>} : memref<10x10x64xf32, #tpu.memory_space<vmem>>, vector<10x10x64xf32>,
    %117 = vector.shape_cast %114 : vector<64x64xf32> to vector<8x8x64xf32>
    %c1_90 = arith.constant 1 : index
    %c1_91 = arith.constant 1 : index
    %c0_92 = arith.constant 0 : index
    %118 = vector.load %arg16[%c1_90, %c1_91, %c0_92] : memref<10x10x64xf32, #tpu.memory_space<vmem>>, vector<8x8x64xf32>
    tpu.vector_store %arg16[%c1_90, %c1_91, %c0_92], %117 {strides = array<i32>} : memref<10x10x64xf32, #tpu.memory_space<vmem>>, vector<8x8x64xf32>,
    %c0_93 = arith.constant 0 : index
    %c0_94 = arith.constant 0 : index
    %c0_95 = arith.constant 0 : index
    %119 = vector.load %arg16[%c0_93, %c0_94, %c0_95] : memref<10x10x64xf32, #tpu.memory_space<vmem>>, vector<10x8x64xf32>
    %c0_96 = arith.constant 0 : index
    %c1_97 = arith.constant 1 : index
    %c0_98 = arith.constant 0 : index
    %120 = vector.load %arg16[%c0_96, %c1_97, %c0_98] : memref<10x10x64xf32, #tpu.memory_space<vmem>>, vector<10x8x64xf32>
    %c0_99 = arith.constant 0 : index
    %c2_100 = arith.constant 2 : index
    %c0_101 = arith.constant 0 : index
    %121 = vector.load %arg16[%c0_99, %c2_100, %c0_101] : memref<10x10x64xf32, #tpu.memory_space<vmem>>, vector<10x8x64xf32>
    %122 = vector.extract_strided_slice %119 {offsets = [0, 0, 0], sizes = [8, 8, 64], strides = [1, 1, 1]} : vector<10x8x64xf32> to vector<8x8x64xf32>
    %c0_102 = arith.constant 0 : index
    %c0_103 = arith.constant 0 : index
    %c0_104 = arith.constant 0 : index
    %c0_105 = arith.constant 0 : index
    %123 = vector.load %arg8[%c0_102, %c0_103, %c0_104, %c0_105] : memref<3x3x1x64xf32, #tpu.memory_space<vmem>>, vector<1x1x1x64xf32>
    %124 = vector.shape_cast %123 : vector<1x1x1x64xf32> to vector<1x64xf32>
    %125 = vector.shape_cast %124 : vector<1x64xf32> to vector<1x1x64xf32>
    %126 = vector.broadcast %125 : vector<1x1x64xf32> to vector<8x8x64xf32>
    %127 = arith.mulf %122, %126 : vector<8x8x64xf32>
    %128 = vector.extract_strided_slice %120 {offsets = [0, 0, 0], sizes = [8, 8, 64], strides = [1, 1, 1]} : vector<10x8x64xf32> to vector<8x8x64xf32>
    %c0_106 = arith.constant 0 : index
    %c1_107 = arith.constant 1 : index
    %c0_108 = arith.constant 0 : index
    %c0_109 = arith.constant 0 : index
    %129 = vector.load %arg8[%c0_106, %c1_107, %c0_108, %c0_109] : memref<3x3x1x64xf32, #tpu.memory_space<vmem>>, vector<1x1x1x64xf32>
    %130 = vector.shape_cast %129 : vector<1x1x1x64xf32> to vector<1x64xf32>
    %131 = vector.shape_cast %130 : vector<1x64xf32> to vector<1x1x64xf32>
    %132 = vector.broadcast %131 : vector<1x1x64xf32> to vector<8x8x64xf32>
    %133 = arith.mulf %128, %132 : vector<8x8x64xf32>
    %134 = arith.addf %127, %133 : vector<8x8x64xf32>
    %135 = vector.extract_strided_slice %121 {offsets = [0, 0, 0], sizes = [8, 8, 64], strides = [1, 1, 1]} : vector<10x8x64xf32> to vector<8x8x64xf32>
    %c0_110 = arith.constant 0 : index
    %c2_111 = arith.constant 2 : index
    %c0_112 = arith.constant 0 : index
    %c0_113 = arith.constant 0 : index
    %136 = vector.load %arg8[%c0_110, %c2_111, %c0_112, %c0_113] : memref<3x3x1x64xf32, #tpu.memory_space<vmem>>, vector<1x1x1x64xf32>
    %137 = vector.shape_cast %136 : vector<1x1x1x64xf32> to vector<1x64xf32>
    %138 = vector.shape_cast %137 : vector<1x64xf32> to vector<1x1x64xf32>
    %139 = vector.broadcast %138 : vector<1x1x64xf32> to vector<8x8x64xf32>
    %140 = arith.mulf %135, %139 : vector<8x8x64xf32>
    %141 = arith.addf %134, %140 : vector<8x8x64xf32>
    %142 = vector.extract_strided_slice %119 {offsets = [1, 0, 0], sizes = [8, 8, 64], strides = [1, 1, 1]} : vector<10x8x64xf32> to vector<8x8x64xf32>
    %c1_114 = arith.constant 1 : index
    %c0_115 = arith.constant 0 : index
    %c0_116 = arith.constant 0 : index
    %c0_117 = arith.constant 0 : index
    %143 = vector.load %arg8[%c1_114, %c0_115, %c0_116, %c0_117] : memref<3x3x1x64xf32, #tpu.memory_space<vmem>>, vector<1x1x1x64xf32>
    %144 = vector.shape_cast %143 : vector<1x1x1x64xf32> to vector<1x64xf32>
    %145 = vector.shape_cast %144 : vector<1x64xf32> to vector<1x1x64xf32>
    %146 = vector.broadcast %145 : vector<1x1x64xf32> to vector<8x8x64xf32>
    %147 = arith.mulf %142, %146 : vector<8x8x64xf32>
    %148 = arith.addf %141, %147 : vector<8x8x64xf32>
    %149 = vector.extract_strided_slice %120 {offsets = [1, 0, 0], sizes = [8, 8, 64], strides = [1, 1, 1]} : vector<10x8x64xf32> to vector<8x8x64xf32>
    %c1_118 = arith.constant 1 : index
    %c1_119 = arith.constant 1 : index
    %c0_120 = arith.constant 0 : index
    %c0_121 = arith.constant 0 : index
    %150 = vector.load %arg8[%c1_118, %c1_119, %c0_120, %c0_121] : memref<3x3x1x64xf32, #tpu.memory_space<vmem>>, vector<1x1x1x64xf32>
    %151 = vector.shape_cast %150 : vector<1x1x1x64xf32> to vector<1x64xf32>
    %152 = vector.shape_cast %151 : vector<1x64xf32> to vector<1x1x64xf32>
    %153 = vector.broadcast %152 : vector<1x1x64xf32> to vector<8x8x64xf32>
    %154 = arith.mulf %149, %153 : vector<8x8x64xf32>
    %155 = arith.addf %148, %154 : vector<8x8x64xf32>
    %156 = vector.extract_strided_slice %121 {offsets = [1, 0, 0], sizes = [8, 8, 64], strides = [1, 1, 1]} : vector<10x8x64xf32> to vector<8x8x64xf32>
    %c1_122 = arith.constant 1 : index
    %c2_123 = arith.constant 2 : index
    %c0_124 = arith.constant 0 : index
    %c0_125 = arith.constant 0 : index
    %157 = vector.load %arg8[%c1_122, %c2_123, %c0_124, %c0_125] : memref<3x3x1x64xf32, #tpu.memory_space<vmem>>, vector<1x1x1x64xf32>
    %158 = vector.shape_cast %157 : vector<1x1x1x64xf32> to vector<1x64xf32>
    %159 = vector.shape_cast %158 : vector<1x64xf32> to vector<1x1x64xf32>
    %160 = vector.broadcast %159 : vector<1x1x64xf32> to vector<8x8x64xf32>
    %161 = arith.mulf %156, %160 : vector<8x8x64xf32>
    %162 = arith.addf %155, %161 : vector<8x8x64xf32>
    %163 = vector.extract_strided_slice %119 {offsets = [2, 0, 0], sizes = [8, 8, 64], strides = [1, 1, 1]} : vector<10x8x64xf32> to vector<8x8x64xf32>
    %c2_126 = arith.constant 2 : index
    %c0_127 = arith.constant 0 : index
    %c0_128 = arith.constant 0 : index
    %c0_129 = arith.constant 0 : index
    %164 = vector.load %arg8[%c2_126, %c0_127, %c0_128, %c0_129] : memref<3x3x1x64xf32, #tpu.memory_space<vmem>>, vector<1x1x1x64xf32>
    %165 = vector.shape_cast %164 : vector<1x1x1x64xf32> to vector<1x64xf32>
    %166 = vector.shape_cast %165 : vector<1x64xf32> to vector<1x1x64xf32>
    %167 = vector.broadcast %166 : vector<1x1x64xf32> to vector<8x8x64xf32>
    %168 = arith.mulf %163, %167 : vector<8x8x64xf32>
    %169 = arith.addf %162, %168 : vector<8x8x64xf32>
    %170 = vector.extract_strided_slice %120 {offsets = [2, 0, 0], sizes = [8, 8, 64], strides = [1, 1, 1]} : vector<10x8x64xf32> to vector<8x8x64xf32>
    %c2_130 = arith.constant 2 : index
    %c1_131 = arith.constant 1 : index
    %c0_132 = arith.constant 0 : index
    %c0_133 = arith.constant 0 : index
    %171 = vector.load %arg8[%c2_130, %c1_131, %c0_132, %c0_133] : memref<3x3x1x64xf32, #tpu.memory_space<vmem>>, vector<1x1x1x64xf32>
    %172 = vector.shape_cast %171 : vector<1x1x1x64xf32> to vector<1x64xf32>
    %173 = vector.shape_cast %172 : vector<1x64xf32> to vector<1x1x64xf32>
    %174 = vector.broadcast %173 : vector<1x1x64xf32> to vector<8x8x64xf32>
    %175 = arith.mulf %170, %174 : vector<8x8x64xf32>
    %176 = arith.addf %169, %175 : vector<8x8x64xf32>
    %177 = vector.extract_strided_slice %121 {offsets = [2, 0, 0], sizes = [8, 8, 64], strides = [1, 1, 1]} : vector<10x8x64xf32> to vector<8x8x64xf32>
    %c2_134 = arith.constant 2 : index
    %c2_135 = arith.constant 2 : index
    %c0_136 = arith.constant 0 : index
    %c0_137 = arith.constant 0 : index
    %178 = vector.load %arg8[%c2_134, %c2_135, %c0_136, %c0_137] : memref<3x3x1x64xf32, #tpu.memory_space<vmem>>, vector<1x1x1x64xf32>
    %179 = vector.shape_cast %178 : vector<1x1x1x64xf32> to vector<1x64xf32>
    %180 = vector.shape_cast %179 : vector<1x64xf32> to vector<1x1x64xf32>
    %181 = vector.broadcast %180 : vector<1x1x64xf32> to vector<8x8x64xf32>
    %182 = arith.mulf %177, %181 : vector<8x8x64xf32>
    %183 = arith.addf %176, %182 : vector<8x8x64xf32>
    %c0_138 = arith.constant 0 : index
    %c0_139 = arith.constant 0 : index
    %184 = vector.load %arg9[%c0_138, %c0_139] : memref<1x64xf32, #tpu.memory_space<vmem>>, vector<1x64xf32>
    %185 = vector.shape_cast %184 : vector<1x64xf32> to vector<64xf32>
    %186 = vector.shape_cast %185 : vector<64xf32> to vector<1x1x64xf32>
    %187 = vector.broadcast %186 : vector<1x1x64xf32> to vector<8x8x64xf32>
    %188 = arith.addf %183, %187 : vector<8x8x64xf32>
    %189 = vector.shape_cast %188 : vector<8x8x64xf32> to vector<64x64xf32>
    %c0_140 = arith.constant 0 : index
    %c0_141 = arith.constant 0 : index
    %190 = vector.load %arg10[%c0_140, %c0_141] : memref<2x64xf32, #tpu.memory_space<vmem>>, vector<1x64xf32>
    %191 = vector.shape_cast %190 : vector<1x64xf32> to vector<64xf32>
    %c1_142 = arith.constant 1 : index
    %c0_143 = arith.constant 0 : index
    %192 = vector.load %arg10[%c1_142, %c0_143] : memref<2x64xf32, #tpu.memory_space<vmem>>, vector<1x64xf32>
    %193 = vector.shape_cast %192 : vector<1x64xf32> to vector<64xf32>
    %cst_144 = arith.constant dense<0.000000e+00> : vector<64xf32>
    %194 = vector.multi_reduction <add>, %189, %cst_144 [1] : vector<64x64xf32> to vector<64xf32>
    %195 = vector.shape_cast %194 : vector<64xf32> to vector<64x1xf32>
    %cst_145 = arith.constant 6.400000e+01 : f32
    %196 = vector.broadcast %cst_145 : f32 to vector<64x1xf32>
    %197 = arith.divf %195, %196 : vector<64x1xf32>
    %198 = vector.broadcast %197 : vector<64x1xf32> to vector<64x64xf32>
    %199 = arith.subf %189, %198 : vector<64x64xf32>
    %200 = arith.mulf %199, %199 : vector<64x64xf32>
    %cst_146 = arith.constant dense<0.000000e+00> : vector<64xf32>
    %201 = vector.multi_reduction <add>, %200, %cst_146 [1] : vector<64x64xf32> to vector<64xf32>
    %202 = vector.shape_cast %201 : vector<64xf32> to vector<64x1xf32>
    %cst_147 = arith.constant 6.400000e+01 : f32
    %203 = vector.broadcast %cst_147 : f32 to vector<64x1xf32>
    %204 = arith.divf %202, %203 : vector<64x1xf32>
    %205 = vector.broadcast %197 : vector<64x1xf32> to vector<64x64xf32>
    %206 = arith.subf %189, %205 : vector<64x64xf32>
    %cst_148 = arith.constant 9.99999974E-6 : f32
    %207 = vector.broadcast %cst_148 : f32 to vector<64x1xf32>
    %208 = arith.addf %204, %207 : vector<64x1xf32>
    %209 = math.rsqrt %208 : vector<64x1xf32>
    %210 = vector.broadcast %209 : vector<64x1xf32> to vector<64x64xf32>
    %211 = arith.mulf %206, %210 : vector<64x64xf32>
    %212 = vector.shape_cast %191 : vector<64xf32> to vector<1x64xf32>
    %213 = vector.broadcast %212 : vector<1x64xf32> to vector<64x64xf32>
    %214 = arith.mulf %211, %213 : vector<64x64xf32>
    %215 = vector.shape_cast %193 : vector<64xf32> to vector<1x64xf32>
    %216 = vector.broadcast %215 : vector<1x64xf32> to vector<64x64xf32>
    %217 = arith.addf %214, %216 : vector<64x64xf32>
    %c0_149 = arith.constant 0 : index
    %c0_150 = arith.constant 0 : index
    %218 = vector.load %arg11[%c0_149, %c0_150] : memref<64x256xf32, #tpu.memory_space<vmem>>, vector<64x256xf32>
    %cst_151 = arith.constant dense<0.000000e+00> : vector<64x256xf32>
    %219 = tpu.matmul %217, %218, %cst_151 {dimension_numbers = #tpu.dot_dimension_numbers<[1], [0], [0], [1], [0, 0, 1, 1], [], []>} : vector<64x64xf32>, vector<64x256xf32>, vector<64x256xf32> -> vector<64x256xf32>
    %c0_152 = arith.constant 0 : index
    %c0_153 = arith.constant 0 : index
    %220 = vector.load %arg12[%c0_152, %c0_153] : memref<1x256xf32, #tpu.memory_space<vmem>>, vector<1x256xf32>
    %221 = vector.shape_cast %220 : vector<1x256xf32> to vector<256xf32>
    %222 = vector.shape_cast %221 : vector<256xf32> to vector<1x256xf32>
    %223 = vector.broadcast %222 : vector<1x256xf32> to vector<64x256xf32>
    %224 = arith.addf %219, %223 : vector<64x256xf32>
    %cst_154 = arith.constant 5.000000e-01 : f32
    %225 = vector.broadcast %cst_154 : f32 to vector<64x256xf32>
    %226 = arith.mulf %225, %224 : vector<64x256xf32>
    %cst_155 = arith.constant 0.707106769 : f32
    %227 = vector.broadcast %cst_155 : f32 to vector<64x256xf32>
    %228 = arith.mulf %224, %227 : vector<64x256xf32>
    %cst_156 = arith.constant 0.000000e+00 : f32
    %229 = vector.broadcast %cst_156 : f32 to vector<64x256xf32>
    %230 = arith.cmpf oge, %228, %229 : vector<64x256xf32>
    %cst_157 = arith.constant 1.000000e+00 : f32
    %cst_158 = arith.constant -1.000000e+00 : f32
    %231 = vector.broadcast %cst_157 : f32 to vector<64x256xf32>
    %232 = vector.broadcast %cst_158 : f32 to vector<64x256xf32>
    %233 = arith.select %230, %231, %232 : vector<64x256xi1>, vector<64x256xf32>
    %234 = math.absf %228 : vector<64x256xf32>
    %cst_159 = arith.constant 0.327591091 : f32
    %235 = vector.broadcast %cst_159 : f32 to vector<64x256xf32>
    %236 = arith.mulf %235, %234 : vector<64x256xf32>
    %cst_160 = arith.constant 1.000000e+00 : f32
    %237 = vector.broadcast %cst_160 : f32 to vector<64x256xf32>
    %238 = arith.addf %237, %236 : vector<64x256xf32>
    %cst_161 = arith.constant 1.000000e+00 : f32
    %239 = vector.broadcast %cst_161 : f32 to vector<64x256xf32>
    %240 = arith.divf %239, %238 : vector<64x256xf32>
    %cst_162 = arith.constant 1.06140542 : f32
    %241 = vector.broadcast %cst_162 : f32 to vector<64x256xf32>
    %242 = arith.mulf %241, %240 : vector<64x256xf32>
    %cst_163 = arith.constant -1.45315206 : f32
    %243 = vector.broadcast %cst_163 : f32 to vector<64x256xf32>
    %244 = arith.addf %242, %243 : vector<64x256xf32>
    %245 = arith.mulf %244, %240 : vector<64x256xf32>
    %cst_164 = arith.constant 1.42141378 : f32
    %246 = vector.broadcast %cst_164 : f32 to vector<64x256xf32>
    %247 = arith.addf %245, %246 : vector<64x256xf32>
    %248 = arith.mulf %247, %240 : vector<64x256xf32>
    %cst_165 = arith.constant -0.284496725 : f32
    %249 = vector.broadcast %cst_165 : f32 to vector<64x256xf32>
    %250 = arith.addf %248, %249 : vector<64x256xf32>
    %251 = arith.mulf %250, %240 : vector<64x256xf32>
    %cst_166 = arith.constant 0.254829586 : f32
    %252 = vector.broadcast %cst_166 : f32 to vector<64x256xf32>
    %253 = arith.addf %251, %252 : vector<64x256xf32>
    %254 = arith.mulf %253, %240 : vector<64x256xf32>
    %cst_167 = arith.constant 0.000000e+00 : f32
    %255 = vector.broadcast %cst_167 : f32 to vector<64x256xf32>
    %256 = arith.subf %255, %234 : vector<64x256xf32>
    %257 = arith.mulf %256, %234 : vector<64x256xf32>
    %258 = math.exp %257 : vector<64x256xf32>
    %259 = arith.mulf %254, %258 : vector<64x256xf32>
    %cst_168 = arith.constant 1.000000e+00 : f32
    %260 = vector.broadcast %cst_168 : f32 to vector<64x256xf32>
    %261 = arith.subf %260, %259 : vector<64x256xf32>
    %262 = arith.mulf %233, %261 : vector<64x256xf32>
    %cst_169 = arith.constant 1.000000e+00 : f32
    %263 = vector.broadcast %cst_169 : f32 to vector<64x256xf32>
    %264 = arith.addf %263, %262 : vector<64x256xf32>
    %265 = arith.mulf %226, %264 : vector<64x256xf32>
    %c0_170 = arith.constant 0 : index
    %c0_171 = arith.constant 0 : index
    %266 = vector.load %arg13[%c0_170, %c0_171] : memref<256x64xf32, #tpu.memory_space<vmem>>, vector<256x64xf32>
    %cst_172 = arith.constant dense<0.000000e+00> : vector<64x64xf32>
    %267 = tpu.matmul %265, %266, %cst_172 {dimension_numbers = #tpu.dot_dimension_numbers<[1], [0], [0], [1], [0, 0, 1, 1], [], []>} : vector<64x256xf32>, vector<256x64xf32>, vector<64x64xf32> -> vector<64x64xf32>
    %c0_173 = arith.constant 0 : index
    %c0_174 = arith.constant 0 : index
    %268 = vector.load %arg14[%c0_173, %c0_174] : memref<1x64xf32, #tpu.memory_space<vmem>>, vector<1x64xf32>
    %269 = vector.shape_cast %268 : vector<1x64xf32> to vector<64xf32>
    %270 = vector.shape_cast %269 : vector<64xf32> to vector<1x64xf32>
    %271 = vector.broadcast %270 : vector<1x64xf32> to vector<64x64xf32>
    %272 = arith.addf %267, %271 : vector<64x64xf32>
    %273 = arith.addf %189, %272 : vector<64x64xf32>
    %c0_175 = arith.constant 0 : index
    %c0_176 = arith.constant 0 : index
    %c0_177 = arith.constant 0 : index
    %274 = vector.load %arg15[%c0_175, %c0_176, %c0_177] : memref<1x64x64xf32, #tpu.memory_space<vmem>>, vector<1x64x64xf32>
    %275 = vector.shape_cast %274 : vector<1x64x64xf32> to vector<64x64xf32>
    %276 = vector.shape_cast %273 : vector<64x64xf32> to vector<1x64x64xf32>
    tpu.vector_store %arg15[%c0_175, %c0_176, %c0_177], %276 {strides = array<i32>} : memref<1x64x64xf32, #tpu.memory_space<vmem>>, vector<1x64x64xf32>,
    return
  }
  func.func @transform_0(%arg0: i32) -> (i32, i32, i32) {
    %c0_i32 = arith.constant 0 : i32
    %c0_i32_0 = arith.constant 0 : i32
    %c0_i32_1 = arith.constant 0 : i32
    return %arg0, %c0_i32, %c0_i32_0 : i32, i32, i32
  }
  func.func @transform_1(%arg0: i32) -> (i32, i32) {
    %c0_i32 = arith.constant 0 : i32
    %c0_i32_0 = arith.constant 0 : i32
    %c0_i32_1 = arith.constant 0 : i32
    return %c0_i32, %c0_i32_0 : i32, i32
  }
  func.func @transform_2(%arg0: i32) -> (i32, i32, i32, i32) {
    %c0_i32 = arith.constant 0 : i32
    %c0_i32_0 = arith.constant 0 : i32
    %c0_i32_1 = arith.constant 0 : i32
    %c0_i32_2 = arith.constant 0 : i32
    %c0_i32_3 = arith.constant 0 : i32
    return %c0_i32, %c0_i32_0, %c0_i32_1, %c0_i32_2 : i32, i32, i32, i32
  }
  func.func @transform_3(%arg0: i32) -> (i32, i32, i32, i32) {
    %c0_i32 = arith.constant 0 : i32
    %c0_i32_0 = arith.constant 0 : i32
    %c0_i32_1 = arith.constant 0 : i32
    %c0_i32_2 = arith.constant 0 : i32
    %c0_i32_3 = arith.constant 0 : i32
    return %c0_i32, %c0_i32_0, %c0_i32_1, %c0_i32_2 : i32, i32, i32, i32
  }
  func.func @transform_4(%arg0: i32) -> (i32, i32, i32) {
    %c0_i32 = arith.constant 0 : i32
    %c0_i32_0 = arith.constant 0 : i32
    %c0_i32_1 = arith.constant 0 : i32
    %c0_i32_2 = arith.constant 0 : i32
    return %c0_i32, %c0_i32_0, %c0_i32_1 : i32, i32, i32
  }
  func.func @transform_5(%arg0: i32) -> (i32, i32, i32) {
    %c0_i32 = arith.constant 0 : i32
    %c0_i32_0 = arith.constant 0 : i32
    %c0_i32_1 = arith.constant 0 : i32
    %c0_i32_2 = arith.constant 0 : i32
    return %c0_i32, %c0_i32_0, %c0_i32_1 : i32, i32, i32
  }
  func.func @transform_6(%arg0: i32) -> (i32, i32) {
    %c0_i32 = arith.constant 0 : i32
    %c0_i32_0 = arith.constant 0 : i32
    %c0_i32_1 = arith.constant 0 : i32
    return %c0_i32, %c0_i32_0 : i32, i32
  }
  func.func @transform_7(%arg0: i32) -> (i32, i32, i32, i32) {
    %c0_i32 = arith.constant 0 : i32
    %c0_i32_0 = arith.constant 0 : i32
    %c0_i32_1 = arith.constant 0 : i32
    %c0_i32_2 = arith.constant 0 : i32
    %c0_i32_3 = arith.constant 0 : i32
    return %c0_i32, %c0_i32_0, %c0_i32_1, %c0_i32_2 : i32, i32, i32, i32
  }
  func.func @transform_8(%arg0: i32) -> (i32, i32) {
    %c0_i32 = arith.constant 0 : i32
    %c0_i32_0 = arith.constant 0 : i32
    %c0_i32_1 = arith.constant 0 : i32
    return %c0_i32, %c0_i32_0 : i32, i32
  }
  func.func @transform_9(%arg0: i32) -> (i32, i32) {
    %c0_i32 = arith.constant 0 : i32
    %c0_i32_0 = arith.constant 0 : i32
    %c0_i32_1 = arith.constant 0 : i32
    return %c0_i32, %c0_i32_0 : i32, i32
  }
  func.func @transform_10(%arg0: i32) -> (i32, i32) {
    %c0_i32 = arith.constant 0 : i32
    %c0_i32_0 = arith.constant 0 : i32
    %c0_i32_1 = arith.constant 0 : i32
    return %c0_i32, %c0_i32_0 : i32, i32
  }
  func.func @transform_11(%arg0: i32) -> (i32, i32) {
    %c0_i32 = arith.constant 0 : i32
    %c0_i32_0 = arith.constant 0 : i32
    %c0_i32_1 = arith.constant 0 : i32
    return %c0_i32, %c0_i32_0 : i32, i32
  }
  func.func @transform_12(%arg0: i32) -> (i32, i32) {
    %c0_i32 = arith.constant 0 : i32
    %c0_i32_0 = arith.constant 0 : i32
    %c0_i32_1 = arith.constant 0 : i32
    return %c0_i32, %c0_i32_0 : i32, i32
  }
  func.func @transform_13(%arg0: i32) -> (i32, i32) {
    %c0_i32 = arith.constant 0 : i32
    %c0_i32_0 = arith.constant 0 : i32
    %c0_i32_1 = arith.constant 0 : i32
    return %c0_i32, %c0_i32_0 : i32, i32
  }
  func.func @transform_14(%arg0: i32) -> (i32, i32, i32) {
    %c0_i32 = arith.constant 0 : i32
    %c0_i32_0 = arith.constant 0 : i32
    %c0_i32_1 = arith.constant 0 : i32
    return %arg0, %c0_i32, %c0_i32_0 : i32, i32, i32
  }
}

</mosaic_0001>

<bundles_post_ra>
// kernel: tiny_vit_block_forward.1
= control target key start
LH: loop header
LB: loop body
LE: loop exit
PB: predicated region body
PF: predicated region fallthrough
CT: control target
= control target key end

     0   :  { %s6587_s0 = inlined_call_operand.vmem [shape: f32[2,64,64], index: 0, kind: input, shape index: {}]   ;;  %s6588_s1 = inlined_call_operand.vmem [shape: f32[2,64], index: 1, kind: input, shape index: {}]   ;;  %s6589_s2 = inlined_call_operand.vmem [shape: f32[3,2,64,32], index: 2, kind: input, shape index: {}]   ;;  %s6590_s3 = inlined_call_operand.vmem [shape: f32[3,2,1,32], index: 3, kind: input, shape index: {}]   ;;  %s6591_s4 = inlined_call_operand.vmem [shape: f32[2,64,64], index: 4, kind: input, shape index: {}]   ;;  %s6592_s5 = inlined_call_operand.vmem [shape: f32[2,32,64], index: 5, kind: input, shape index: {}]   ;;  %s6593_s6 = inlined_call_operand.vmem [shape: f32[1,64], index: 6, kind: input, shape index: {}]   ;;  %s6594_s7 = inlined_call_operand.vmem [shape: f32[3,3,1,64], index: 7, kind: input, shape index: {}]   ;;  %s6595_s8 = inlined_call_operand.vmem [shape: f32[1,64], index: 8, kind: input, shape index: {}]   ;;  %s6596_s9 = inlined_call_operand.vmem [shape: f32[2,64], index: 9, kind: input, shape index: {}]   ;;  %s6597_s10 = inlined_call_operand.vmem [shape: f32[64,256], index: 10, kind: input, shape index: {}]   ;;  %s6598_s11 = inlined_call_operand.vmem [shape: f32[1,256], index: 11, kind: input, shape index: {}]   ;;  %s6599_s12 = inlined_call_operand.vmem [shape: f32[256,64], index: 12, kind: input, shape index: {}]   ;;  %s6600_s13 = inlined_call_operand.vmem [shape: f32[1,64], index: 13, kind: input, shape index: {}]   ;;  %s6601_s14 = inlined_call_operand.hbm [shape: f32[2,64,64], index: 14, kind: output, shape index: {}]  }
   0x1   :  { %6620 = sst [smem:[#allocation32_spill]] %s6587_s0 }
   0x2   :  { %6621 = sst [smem:[#allocation33_spill]] %s6588_s1 }
   0x3   :  { %6622 = sst [smem:[#allocation34_spill]] %s6589_s2 }
   0x4   :  { %19 = vsyncpa [#allocation4], 0 }
   0x5   :  { %21 = vsyncpa [#allocation4 + $0x1], 0  ;;  %s5037_s29 = smov 0   ;;  %s5039_s30 = smov 0  }
   0x6   :  { %s5041_s15 = smov 0   ;;  %s5043_s16 = smov 0  }
   0x7 LB: > { %s5058_s17 = sadd.s32 4294967295, %s4955_s16   ;;  %s3653_s18 = sadd.s32 4294967294, %s4955_s16   ;;  %s4955_s16 = sphi %s5043_s16, %s6687_s16   ;;  %s4951_s15 = sphi %s5041_s15, %s6686_s15   ;;  %s4947_s30 = sphi %s5039_s30, %s6685_s30   ;;  %s4943_s29 = sphi %s5037_s29, %s6684_s29  }
   0x8   : > { %s5062_s19 = sadd.s32 1, %s4955_s16   ;;  %s333_s20 = sadd.s32 1, %s4951_s15 }
   0x9   : > { %s330_s21 = ssub.s32 %s4955_s16, %s5062_s19  ;;  %p343_p0 = scmp.ne.s32.totalorder %s4951_s15, %s4947_s30 }
   0xa   : > { %p331_p1 = scmp.eq.s32.totalorder %s330_s21, 0  ;;  %p344_p2 = scmp.eq.s32.totalorder %s5058_s17, 1 }
   0xb   : > { %p349_p3 = scmp.ne.s32.totalorder %s4947_s30, %s4943_s29  ;;  %p350_p4 = scmp.eq.s32.totalorder %s3653_s18, 1 }
   0xc   : > { %s5073_s22 = scalar_select %p331_p1, %s4951_s15, %s333_s20  }
   0xd   : > { %p5075_p5 = por %p344_p2, %p343_p0  ;;  %p5079_p6 = por %p350_p4, %p349_p3 }
   0xe   : > { %6623 = sst [smem:[#allocation6_spill]] %s5073_s22  ;;  %p3656_p7 = scmp.ge.s32.totalorder %s4955_s16, 1 }
   0xf   : > { %p415_p8 = scmp.lt.s32.totalorder %s4955_s16, 3 }
  0x11   : > { %p416_p9 = pnand %p3656_p7, %p415_p8 }
  0x13   : > { %419 = sbr.rel (%p416_p9) target bundleno = 3259 (0xcbb), region = 76 }
  0x1a   : > { %p461_p10 = scmp.lt.s32.totalorder %s5058_s17, 1  ;;  %vm476_vm0 = vcmask 523264   ;;  %s6626_s0 = sld [smem:[#allocation32_spill]]  ;;  %vm1002_vm1 = vcmask 261120   ;;  %vm2409_vm3 = vcmask 517120  }
  0x1b   : > { %s6627_s2 = sld [smem:[#allocation34_spill]]  ;;  %s6628_s1 = sld [smem:[#allocation33_spill]]  ;;  %vm5324_vm2 = vmpackc.low %vm1002_vm1, %vm1002_vm1 }
  0x1c   : > { %s462_s25 = scalar_select %p461_p10, %s5058_s17, 1 }
  0x1e   : > { %s3872_s26 = sshll.u32 %s462_s25, 6 }
  0x20   : > { %s5090_s18 = scalar_lea.vmem %s6626_s0, %s3872_s26  ;;  %s4959_s0 = smov [#allocation3]  }
  0x21   : > { %v466_v0 = vld [vmem:[%s5090_s18] sm:$0xff]  ;;  %v468_v1 = vld [vmem:[%s5090_s18 + $0x10] sm:$0xff]  ;;  %v467_v2 = vld [vmem:[%s5090_s18 + $0x8] sm:$0xff]  ;;  %s4897_s22 = sshll.u32 %s4959_s0, 4  ;;  %s4898_s22 = int_to_ptr.vmem [resolvable:$false] %s4897_s22 }
  0x22   : > { %v477_v3 = vsel %vm476_vm0, %v466_v0, 0.0  ;;  %v483_v4 = vsel %vm476_vm0, %v468_v1, 0.0  ;;  %v469_v5 = vld [vmem:[%s5090_s18 + $0x18] sm:$0xff]  ;;  %v480_v6 = vsel %vm476_vm0, %v467_v2, 0.0  ;;  %v470_v8 = vld [vmem:[%s5090_s18 + $0x20] sm:$0xff]  ;;  %v471_v9 = vld [vmem:[%s5090_s18 + $0x28] sm:$0xff] }
  0x23   : > { %478 = vadd.xlane.f32.xlu0 %v477_v3  ;;  %484 = vadd.xlane.f32.xlu1 %v483_v4  ;;  %v486_v7 = vsel %vm476_vm0, %v469_v5, 0.0  ;;  %v489_v10 = vsel %vm476_vm0, %v470_v8, 0.0  ;;  %v492_v11 = vsel %vm476_vm0, %v471_v9, 0.0  ;;  %v472_v12 = vld [vmem:[%s5090_s18 + $0x30] sm:$0xff]  ;;  %v473_v13 = vld [vmem:[%s5090_s18 + $0x38] sm:$0xff]  ;;  %v606_v56 = vld [vmem:[%s6627_s2] sm:$0xff] }
  0x24   : > { %v495_v14 = vsel %vm476_vm0, %v472_v12, 0.0  ;;  %v498_v15 = vsel %vm476_vm0, %v473_v13, 0.0  ;;  %v607_v57 = vld [vmem:[%s6627_s2 + $0x8] sm:$0xff]  ;;  %v608_v59 = vld [vmem:[%s6627_s2 + $0x10] sm:$0xff]  ;;  %v609_v60 = vld [vmem:[%s6627_s2 + $0x18] sm:$0xff] }
  0x25   : > { %v4434_v58 = vpack.c.bf16 %v607_v57, %v606_v56  ;;  %v4438_v61 = vpack.c.bf16 %v609_v60, %v608_v59  ;;  %v610_v62 = vld [vmem:[%s6627_s2 + $0x20] sm:$0xff]  ;;  %v611_v63 = vld [vmem:[%s6627_s2 + $0x28] sm:$0xff] }
  0x26   : > { %v3671_v4 = vld [vmem:[%s6627_s2 + $0x80] sm:$0xff] }
  0x27   : > { %481 = vadd.xlane.f32.xlu0 %v480_v6  ;;  %487 = vadd.xlane.f32.xlu1 %v486_v7  ;;  %v3675_v57 = vld [vmem:[%s6627_s2 + $0xa0] sm:$0xff] }
  0x28   : > { %4435 = vmatprep.subr.bf16.mxu0 %v4434_v58 }
  0x29   : > { %4437 = vmatpush3.bf16.msra.mxu0 %v4434_v58  ;;  %v3676_v58 = vld [vmem:[%s6627_s2 + $0xa8] sm:$0xff] }
  0x2a   : > { %4439 = vmatprep.subr.bf16.mxu0 %v4438_v61 }
  0x2b   : > { %490 = vadd.xlane.f32.xlu0 %v489_v10  ;;  %493 = vadd.xlane.f32.xlu1 %v492_v11 }
  0x2d   : > { %4441 = vmatpush3.bf16.msra.mxu0 %v4438_v61 }
  0x2f   : > { %496 = vadd.xlane.f32.xlu0 %v495_v14  ;;  %499 = vadd.xlane.f32.xlu1 %v498_v15 }
  0xb0   : > { %v479_v16 = vpop.xlane.xlu0 %478  ;;  %v485_v17 = vpop.xlane.xlu1 %484 }
  0xb1   : > { %v502_v18 = vmul.f32 0.015625, %v479_v16  ;;  %v504_v19 = vmul.f32 0.015625, %v485_v17 }
  0xb3   : > { %v5108_v20 = vsub.f32 %v466_v0, %v502_v18  ;;  %v5110_v21 = vsub.f32 %v468_v1, %v504_v19  ;;  %v4442_v0 = vpack.c.bf16 %v611_v63, %v610_v62  ;;  %v612_v1 = vld [vmem:[%s6627_s2 + $0x30] sm:$0xff]  ;;  %v4458_v63 = vpack.c.bf16 %v3676_v58, %v3675_v57 }
  0xb4   : > { %v482_v22 = vpop.xlane.xlu0 %481  ;;  %v488_v23 = vpop.xlane.xlu1 %487 }
  0xb5   : > { %v503_v24 = vmul.f32 0.015625, %v482_v22  ;;  %v505_v25 = vmul.f32 0.015625, %v488_v23  ;;  %v518_v26 = vmul.f32 %v5108_v20, %v5108_v20  ;;  %v520_v27 = vmul.f32 %v5110_v21, %v5110_v21  ;;  %4443 = vmatprep.subr.bf16.mxu0 %v4442_v0 }
  0xb6   : > { %4445 = vmatpush3.bf16.msra.mxu0 %v4442_v0 }
  0xb7   : > { %v5116_v28 = vsub.f32 %v467_v2, %v503_v24  ;;  %v5118_v29 = vsub.f32 %v469_v5, %v505_v25  ;;  %v526_v30 = vsel %vm476_vm0, %v518_v26, 0.0  ;;  %v532_v33 = vsel %vm476_vm0, %v520_v27, 0.0  ;;  %v613_v2 = vld [vmem:[%s6627_s2 + $0x38] sm:$0xff]  ;;  %v3672_v5 = vld [vmem:[%s6627_s2 + $0x88] sm:$0xff] }
  0xb8   : > { %527 = vadd.xlane.f32.xlu0 %v526_v30  ;;  %v491_v31 = vpop.xlane.xlu0 %490  ;;  %v494_v32 = vpop.xlane.xlu1 %493  ;;  %v4446_v3 = vpack.c.bf16 %v613_v2, %v612_v1  ;;  %v4450_v6 = vpack.c.bf16 %v3672_v5, %v3671_v4  ;;  %v3677_v2 = vld [vmem:[%s6627_s2 + $0xb0] sm:$0xff] }
  0xb9   : > { %v506_v34 = vmul.f32 0.015625, %v491_v31  ;;  %v507_v35 = vmul.f32 0.015625, %v494_v32  ;;  %v519_v36 = vmul.f32 %v5116_v28, %v5116_v28  ;;  %v521_v37 = vmul.f32 %v5118_v29, %v5118_v29  ;;  %v3660_v31 = vld [vmem:[%s6628_s1] ss:$0 sm:$0xff] }
  0xba   : > { %4447 = vmatprep.subr.bf16.mxu0 %v4446_v3 }
  0xbb   : > { %v5126_v38 = vsub.f32 %v470_v8, %v506_v34  ;;  %v5128_v39 = vsub.f32 %v471_v9, %v507_v35  ;;  %v529_v40 = vsel %vm476_vm0, %v519_v36, 0.0  ;;  %v535_v43 = vsel %vm476_vm0, %v521_v37, 0.0  ;;  %4449 = vmatpush3.bf16.msra.mxu0 %v4446_v3  ;;  %v3661_v36 = vld [vmem:[%s6628_s1 + $0x1] ss:$0 sm:$0xff]  ;;  %v3678_v3 = vld [vmem:[%s6627_s2 + $0xb8] sm:$0xff] }
  0xbc   : > { %533 = vadd.xlane.f32.xlu0 %v532_v33  ;;  %530 = vadd.xlane.f32.xlu1 %v529_v40  ;;  %v497_v41 = vpop.xlane.xlu0 %496  ;;  %v500_v42 = vpop.xlane.xlu1 %499 }
  0xbd   : > { %v508_v44 = vmul.f32 0.015625, %v497_v41  ;;  %v509_v45 = vmul.f32 0.015625, %v500_v42  ;;  %v522_v46 = vmul.f32 %v5126_v38, %v5126_v38  ;;  %v523_v47 = vmul.f32 %v5128_v39, %v5128_v39  ;;  %4451 = vmatprep.subr.bf16.mxu0 %v4450_v6 }
  0xbf   : > { %v5136_v48 = vsub.f32 %v472_v12, %v508_v44  ;;  %v5138_v49 = vsub.f32 %v473_v13, %v509_v45  ;;  %v538_v50 = vsel %vm476_vm0, %v522_v46, 0.0  ;;  %v541_v51 = vsel %vm476_vm0, %v523_v47, 0.0  ;;  %v3674_v47 = vld [vmem:[%s6627_s2 + $0x98] sm:$0xff] }
  0xc0   : > { %536 = vadd.xlane.f32.xlu1 %v535_v43  ;;  %539 = vadd.xlane.f32.xlu0 %v538_v50 }
  0xc1   : > { %v524_v52 = vmul.f32 %v5136_v48, %v5136_v48  ;;  %v525_v53 = vmul.f32 %v5138_v49, %v5138_v49 }
  0xc3   : > { %v544_v54 = vsel %vm476_vm0, %v524_v52, 0.0  ;;  %v547_v55 = vsel %vm476_vm0, %v525_v53, 0.0 }
  0xc4   : > { %542 = vadd.xlane.f32.xlu1 %v541_v51  ;;  %545 = vadd.xlane.f32.xlu0 %v544_v54 }
  0xc8   : > { %548 = vadd.xlane.f32.xlu1 %v547_v55 }
 0x145   : > { %v528_v7 = vpop.xlane.xlu0 %527 }
 0x146   : > { %v550_v8 = vmul.f32 0.015625, %v528_v7  ;;  %v4462_v7 = vpack.c.bf16 %v3678_v3, %v3677_v2 }
 0x148   : > { %v558_v9 = vadd.f32 1e-05, %v550_v8 }
 0x149   : > { %v531_v10 = vpop.xlane.xlu1 %530  ;;  %v534_v11 = vpop.xlane.xlu0 %533 }
 0x14a   : > { %4725 = vrsqrt.f32 %v558_v9  ;;  %v551_v12 = vmul.f32 0.015625, %v531_v10  ;;  %v552_v13 = vmul.f32 0.015625, %v534_v11  ;;  %v3689_v9 = vld [vmem:[%s6627_s2 + $0x100] sm:$0xff]  ;;  %v3690_v10 = vld [vmem:[%s6627_s2 + $0x108] sm:$0xff] }
 0x14c   : > { %v559_v14 = vadd.f32 1e-05, %v551_v12  ;;  %v560_v15 = vadd.f32 1e-05, %v552_v13  ;;  %v4466_v12 = vpack.c.bf16 %v3690_v10, %v3689_v9  ;;  %v3691_v13 = vld [vmem:[%s6627_s2 + $0x110] sm:$0xff] }
 0x14d   : > { %v537_v16 = vpop.xlane.xlu1 %536  ;;  %v540_v17 = vpop.xlane.xlu0 %539 }
 0x14e   : > { %4727 = vrsqrt.f32 %v559_v14  ;;  %v553_v18 = vmul.f32 0.015625, %v537_v16  ;;  %v554_v19 = vmul.f32 0.015625, %v540_v17  ;;  %v3692_v14 = vld [vmem:[%s6627_s2 + $0x118] sm:$0xff]  ;;  %v3693_v16 = vld [vmem:[%s6627_s2 + $0x120] sm:$0xff]  ;;  %v3694_v17 = vld [vmem:[%s6627_s2 + $0x128] sm:$0xff] }
 0x14f   : > { %4729 = vrsqrt.f32 %v560_v15  ;;  %v4470_v15 = vpack.c.bf16 %v3692_v14, %v3691_v13  ;;  %v3750_v13 = vld [vmem:[%s6627_s2 + $0xc8] sm:$0xff] }
 0x150   : > { %v561_v22 = vadd.f32 1e-05, %v553_v18  ;;  %v562_v23 = vadd.f32 1e-05, %v554_v19  ;;  %v4474_v18 = vpack.c.bf16 %v3694_v17, %v3693_v16  ;;  %v3695_v19 = vld [vmem:[%s6627_s2 + $0x130] sm:$0xff] }
 0x151   : > { %v543_v24 = vpop.xlane.xlu1 %542  ;;  %v546_v25 = vpop.xlane.xlu0 %545 }
 0x152   : > { %4731 = vrsqrt.f32 %v561_v22  ;;  %v555_v26 = vmul.f32 0.015625, %v543_v24  ;;  %v556_v27 = vmul.f32 0.015625, %v546_v25  ;;  %v3696_v22 = vld [vmem:[%s6627_s2 + $0x138] sm:$0xff]  ;;  %v5301_v24 = vld [vmem:[%s6590_s3] ss:$0 sm:$0xff] }
 0x153   : > { %4733 = vrsqrt.f32 %v562_v23  ;;  %v4478_v23 = vpack.c.bf16 %v3696_v22, %v3695_v19 }
 0x154   : > { %v4726_v30 = vpop.eup %4725  ;;  %v563_v32 = vadd.f32 1e-05, %v555_v26  ;;  %v564_v33 = vadd.f32 1e-05, %v556_v27 }
 0x155   : > { %v574_v34 = vmul.f32 %v4726_v30, %v5108_v20  ;;  %v549_v35 = vpop.xlane.xlu1 %548  ;;  %v3673_v20 = vld [vmem:[%s6627_s2 + $0x90] sm:$0xff] }
 0x156   : > { %4735 = vrsqrt.f32 %v563_v32  ;;  %v557_v37 = vmul.f32 0.015625, %v549_v35 }
 0x157   : > { %v586_v40 = vmul.f32 %v3660_v31, %v574_v34  ;;  %4737 = vrsqrt.f32 %v564_v33 }
 0x158   : > { %v4728_v41 = vpop.eup %4727  ;;  %v565_v42 = vadd.f32 1e-05, %v557_v37 }
 0x159   : > { %v4730_v43 = vpop.eup %4729  ;;  %v5185_v44 = vadd.f32 %v3661_v36, %v586_v40  ;;  %v575_v45 = vmul.f32 %v4728_v41, %v5116_v28  ;;  %v4454_v28 = vpack.c.bf16 %v3674_v47, %v3673_v20 }
 0x15a   : > { %v576_v46 = vmul.f32 %v4730_v43, %v5110_v21  ;;  %4739 = vrsqrt.f32 %v565_v42 }
 0x15b   : > { %v587_v50 = vmul.f32 %v3660_v31, %v575_v45  ;;  %4130 = vmatprep.mubr.msk.f32.mxu0 %vm476_vm0, %v5185_v44 }
 0x15c   : > { %v4732_v51 = vpop.eup %4731  ;;  %v588_v52 = vmul.f32 %v3660_v31, %v576_v46 }
 0x15d   : > { %v4734_v53 = vpop.eup %4733  ;;  %v5197_v54 = vadd.f32 %v3661_v36, %v587_v50  ;;  %v577_v21 = vmul.f32 %v4732_v51, %v5118_v29 }
 0x15e   : > { %v5200_v55 = vadd.f32 %v3661_v36, %v588_v52  ;;  %v578_v56 = vmul.f32 %v4734_v53, %v5126_v38 }
 0x15f   : > { %v589_v59 = vmul.f32 %v3660_v31, %v577_v21  ;;  %4131 = vmatmul.mubr.msk.f32.vlgmr.msra.gmra.mrb[0].mxu0 %vm476_vm0, %v5197_v54 }
 0x160   : > { %v4736_v60 = vpop.eup %4735  ;;  %v590_v61 = vmul.f32 %v3660_v31, %v578_v56  ;;  %4453 = vmatpush3.bf16.msra.mxu0 %v4450_v6  ;;  %4133 = vmatprep.mubr.msk.f32.mxu0 %vm476_vm0, %v5200_v55 }
 0x161   : > { %v4738_v29 = vpop.eup %4737  ;;  %v5213_v38 = vadd.f32 %v3661_v36, %v589_v59  ;;  %v579_v62 = vmul.f32 %v4736_v60, %v5128_v39  ;;  %4455 = vmatprep.subr.bf16.mxu0 %v4454_v28 }
 0x162   : > { %v5216_v0 = vadd.f32 %v3661_v36, %v590_v61  ;;  %v580_v1 = vmul.f32 %v4738_v29, %v5136_v48  ;;  %v3698_v61 = vld [vmem:[%s6590_s3 + $0x4] ss:$0 sm:$0xff] }
 0x163   : > { %v591_v4 = vmul.f32 %v3660_v31, %v579_v62  ;;  %4134 = vmatmul.mubr.msk.f32.gmra.mrb[2].mxu0 %vm476_vm0, %v5213_v38 }
 0x164   : > { %v4740_v5 = vpop.eup %4739  ;;  %v592_v39 = vmul.f32 %v3660_v31, %v580_v1  ;;  %4457 = vmatpush3.bf16.msra.mxu0 %v4454_v28  ;;  %4136 = vmatprep.mubr.msk.f32.mxu0 %vm476_vm0, %v5216_v0 }
 0x165   : > { %v5229_v6 = vadd.f32 %v3661_v36, %v591_v4  ;;  %v581_v48 = vmul.f32 %v4740_v5, %v5138_v49  ;;  %4459 = vmatprep.subr.bf16.mxu0 %v4458_v63 }
 0x166   : > { %v5232_v8 = vadd.f32 %v3661_v36, %v592_v39 }
 0x167   : > { %v593_v11 = vmul.f32 %v3660_v31, %v581_v48  ;;  %4137 = vmatmul.mubr.msk.f32.gmra.mrb[4].mxu0 %vm476_vm0, %v5229_v6 }
 0x168   : > { %4461 = vmatpush3.bf16.msra.mxu0 %v4458_v63  ;;  %4139 = vmatprep.mubr.msk.f32.mxu0 %vm476_vm0, %v5232_v8 }
 0x169   : > { %v5244_v49 = vadd.f32 %v3661_v36, %v593_v11  ;;  %4463 = vmatprep.subr.bf16.mxu0 %v4462_v7  ;;  %v3680_v36 = vld [vmem:[%s6590_s3 + $0x2] ss:$0 sm:$0xff] }
 0x16b   : > { %4140 = vmatmul.mubr.msk.f32.gmra.mrb[6].mxu0 %vm476_vm0, %v5244_v49 }
 0x16c   : > { %4465 = vmatpush3.bf16.msra.mxu0 %v4462_v7  ;;  %4158 = vmatprep.mubr.msk.f32.mxu0 %vm476_vm0, %v5185_v44 }
 0x16d   : > { %4467 = vmatprep.subr.bf16.mxu0 %v4466_v12 }
 0x16f   : > { %4159 = vmatmul.mubr.msk.f32.vlgmr.msra.gmra.mrb[8].mxu0 %vm476_vm0, %v5197_v54 }
 0x170   : > { %4161 = vmatprep.mubr.msk.f32.mxu0 %vm476_vm0, %v5200_v55  ;;  %4469 = vmatpush3.bf16.msra.mxu0 %v4466_v12  ;;  %v3749_v12 = vld [vmem:[%s6627_s2 + $0xc0] sm:$0xff] }
 0x171   : > { %4471 = vmatprep.subr.bf16.mxu0 %v4470_v15  ;;  %v4538_v17 = vpack.c.bf16 %v3750_v13, %v3749_v12  ;;  %v3758_v13 = vld [vmem:[%s6590_s3 + $0x3] ss:$0 sm:$0xff] }
 0x173   : > { %4162 = vmatmul.mubr.msk.f32.gmra.mrb[10].mxu0 %vm476_vm0, %v5213_v38 }
 0x174   : > { %4164 = vmatprep.mubr.msk.f32.mxu0 %vm476_vm0, %v5216_v0  ;;  %4473 = vmatpush3.bf16.msra.mxu0 %v4470_v15 }
 0x175   : > { %4475 = vmatprep.subr.bf16.mxu0 %v4474_v18 }
 0x177   : > { %4165 = vmatmul.mubr.msk.f32.gmra.mrb[12].mxu0 %vm476_vm0, %v5229_v6 }
 0x178   : > { %4167 = vmatprep.mubr.msk.f32.mxu0 %vm476_vm0, %v5232_v8  ;;  %4477 = vmatpush3.bf16.msra.mxu0 %v4474_v18 }
 0x179   : > { %4479 = vmatprep.subr.bf16.mxu0 %v4478_v23 }
 0x17b   : > { %4168 = vmatmul.mubr.msk.f32.gmra.mrb[14].mxu0 %vm476_vm0, %v5244_v49 }
 0x17c   : > { %4481 = vmatpush3.bf16.msra.mxu0 %v4478_v23  ;;  %4186 = vmatprep.mubr.msk.f32.mxu0 %vm476_vm0, %v5185_v44 }
 0x17f   : > { %4187 = vmatmul.mubr.msk.f32.vlgmr.msra.gmra.mrb[16].mxu0 %vm476_vm0, %v5197_v54 }
 0x180   : > { %4189 = vmatprep.mubr.msk.f32.mxu0 %vm476_vm0, %v5200_v55 }
 0x183   : > { %4190 = vmatmul.mubr.msk.f32.gmra.mrb[18].mxu0 %vm476_vm0, %v5213_v38 }
 0x184   : > { %4192 = vmatprep.mubr.msk.f32.mxu0 %vm476_vm0, %v5216_v0 }
 0x187   : > { %4193 = vmatmul.mubr.msk.f32.gmra.mrb[20].mxu0 %vm476_vm0, %v5229_v6 }
 0x188   : > { %4195 = vmatprep.mubr.msk.f32.mxu0 %vm476_vm0, %v5232_v8 }
 0x18b   : > { %4196 = vmatmul.mubr.msk.f32.gmra.mrb[22].mxu0 %vm476_vm0, %v5244_v49 }
 0x232   : > { %v5303_v25 = vpop.f32.mrb[0].mxu0 }
 0x233   : > { %v711_v26 = vpop.f32.mrb[1].mxu0 }
 0x234   : > { %v712_v27 = vadd.f32 %v5301_v24, %v711_v26  ;;  %v3751_v26 = vld [vmem:[%s6627_s2 + $0xd0] sm:$0xff] }
 0x236   : > { %v5306_v30 = vpop.f32.mrb[2].mxu0  ;;  %4214 = vmatprep.mubr.msk.f32.mxu1 %vm1002_vm1, %v712_v27  ;;  %v3752_v27 = vld [vmem:[%s6627_s2 + $0xd8] sm:$0xff] }
 0x237   : > { %v5309_v31 = vpop.f32.mrb[3].mxu0 }
 0x23a   : > { %v5311_v32 = vpop.f32.mrb[4].mxu0 }
 0x23b   : > { %v5313_v33 = vpop.f32.mrb[5].mxu0 }
 0x23e   : > { %v5315_v34 = vpop.f32.mrb[6].mxu0 }
 0x23f   : > { %v5317_v35 = vpop.f32.mrb[7].mxu0 }
 0x242   : > { %v4160_v37 = vpop.f32.mrb[8].mxu0 }
 0x243   : > { %v839_v40 = vadd.f32 %v4160_v37, %v3680_v36  ;;  %v833_v41 = vpop.f32.mrb[9].mxu0  ;;  %v4542_v37 = vpack.c.bf16 %v3752_v27, %v3751_v26 }
 0x244   : > { %v834_v42 = vadd.f32 %v3680_v36, %v833_v41  ;;  %v3753_v41 = vld [vmem:[%s6627_s2 + $0xe0] sm:$0xff] }
 0x246   : > { %v4163_v45 = vpop.f32.mrb[10].mxu0  ;;  %v4482_v46 = vpack.c.bf16 %v839_v40, %v834_v42  ;;  %v722_v40 = vadd.f32 %v5301_v24, %v5309_v31  ;;  %v3754_v42 = vld [vmem:[%s6627_s2 + $0xe8] sm:$0xff]  ;;  %v732_v31 = vadd.f32 %v5301_v24, %v5313_v33  ;;  %v742_v33 = vadd.f32 %v5301_v24, %v5317_v35 }
 0x247   : > { %v849_v20 = vadd.f32 %v4163_v45, %v3680_v36  ;;  %v843_v47 = vpop.f32.mrb[11].mxu0  ;;  %v4546_v45 = vpack.c.bf16 %v3754_v42, %v3753_v41 }
 0x248   : > { %v844_v50 = vadd.f32 %v3680_v36, %v843_v47  ;;  %4484 = vmatprep.subr.msk.bf16.mxu1 %vm5324_vm2, %v4482_v46 }
 0x249   : > { %4487 = vmatpush3.bf16.xpose.msk.msra.mxu1 %vm5324_vm2, %v4482_v46  ;;  %v3755_v46 = vld [vmem:[%s6627_s2 + $0xf0] sm:$0xff] }
 0x24a   : > { %v4488_v51 = vpack.c.bf16 %v849_v20, %v844_v50  ;;  %v4166_v52 = vpop.f32.mrb[12].mxu0  ;;  %v3756_v20 = vld [vmem:[%s6627_s2 + $0xf8] sm:$0xff]  ;;  %v747_v50 = vadd.f32 %v5315_v34, %v5301_v24 }
 0x24b   : > { %v859_v53 = vadd.f32 %v4166_v52, %v3680_v36  ;;  %v853_v21 = vpop.f32.mrb[13].mxu0  ;;  %v4550_v47 = vpack.c.bf16 %v3756_v20, %v3755_v46 }
 0x24c   : > { %v854_v28 = vadd.f32 %v3680_v36, %v853_v21  ;;  %4490 = vmatprep.subr.msk.bf16.mxu1 %vm5324_vm2, %v4488_v51 }
 0x24e   : > { %v4494_v56 = vpack.c.bf16 %v859_v53, %v854_v28  ;;  %v4169_v57 = vpop.f32.mrb[14].mxu0  ;;  %v997_v53 = vld [vmem:[%s6591_s4 + $0x18] sm:$0xff]  ;;  %v996_v28 = vld [vmem:[%s6591_s4 + $0x10] sm:$0xff] }
 0x24f   : > { %v869_v58 = vadd.f32 %v4169_v57, %v3680_v36  ;;  %v863_v59 = vpop.f32.mrb[15].mxu0 }
 0x250   : > { %v864_v60 = vadd.f32 %v3680_v36, %v863_v59  ;;  %v717_v36 = vadd.f32 %v5303_v25, %v5301_v24  ;;  %v727_v25 = vadd.f32 %v5306_v30, %v5301_v24  ;;  %v737_v30 = vadd.f32 %v5311_v32, %v5301_v24  ;;  %v995_v24 = vld [vmem:[%s6591_s4 + $0x8] sm:$0xff]  ;;  %v994_v32 = vld [vmem:[%s6591_s4] sm:$0xff] }
 0x251   : > { %4493 = vmatpush3.bf16.xpose.msk.msra.mxu1 %vm5324_vm2, %v4488_v51 }
 0x252   : > { %v4500_v29 = vpack.c.bf16 %v869_v58, %v864_v60  ;;  %v4188_v62 = vpop.f32.mrb[16].mxu0  ;;  %4496 = vmatprep.subr.msk.bf16.mxu1 %vm5324_vm2, %v4494_v56 }
 0x253   : > { %v961_v63 = vadd.f32 %v4188_v62, %v3698_v61  ;;  %v955_v1 = vpop.f32.mrb[17].mxu0  ;;  %v998_v62 = vld [vmem:[%s6591_s4 + $0x20] sm:$0xff] }
 0x254   : > { %v956_v2 = vadd.f32 %v3698_v61, %v955_v1 }
 0x256   : > { %v4506_v3 = vpack.c.bf16 %v961_v63, %v956_v2  ;;  %v4191_v4 = vpop.f32.mrb[18].mxu0 }
 0x257   : > { %v971_v5 = vadd.f32 %v4191_v4, %v3698_v61  ;;  %v965_v39 = vpop.f32.mrb[19].mxu0 }
 0x258   : > { %v966_v48 = vadd.f32 %v3698_v61, %v965_v39  ;;  %4507 = vmatprep.subr.bf16.mxu0 %v4506_v3 }
 0x259   : > { %4499 = vmatpush3.bf16.xpose.msk.msra.mxu1 %vm5324_vm2, %v4494_v56  ;;  %4509 = vmatpush3.bf16.msra.mxu0 %v4506_v3 }
 0x25a   : > { %v4510_v7 = vpack.c.bf16 %v971_v5, %v966_v48  ;;  %v4194_v9 = vpop.f32.mrb[20].mxu0  ;;  %4502 = vmatprep.subr.msk.bf16.mxu1 %vm5324_vm2, %v4500_v29  ;;  %v1001_v5 = vld [vmem:[%s6591_s4 + $0x38] sm:$0xff]  ;;  %v1000_v48 = vld [vmem:[%s6591_s4 + $0x30] sm:$0xff] }
 0x25b   : > { %v981_v10 = vadd.f32 %v4194_v9, %v3698_v61  ;;  %v975_v11 = vpop.f32.mrb[21].mxu0 }
 0x25c   : > { %v976_v14 = vadd.f32 %v3698_v61, %v975_v11  ;;  %4511 = vmatprep.subr.bf16.mxu0 %v4510_v7 }
 0x25d   : > { %4513 = vmatpush3.bf16.msra.mxu0 %v4510_v7 }
 0x25e   : > { %v4514_v15 = vpack.c.bf16 %v981_v10, %v976_v14  ;;  %v4197_v16 = vpop.f32.mrb[22].mxu0 }
 0x25f   : > { %v991_v18 = vadd.f32 %v4197_v16, %v3698_v61  ;;  %v985_v19 = vpop.f32.mrb[23].mxu0 }
 0x260   : > { %v986_v22 = vadd.f32 %v3698_v61, %v985_v19  ;;  %4515 = vmatprep.subr.bf16.mxu0 %v4514_v15  ;;  %v999_v61 = vld [vmem:[%s6591_s4 + $0x28] sm:$0xff] }
 0x261   : > { %4505 = vmatpush3.bf16.xpose.msk.msra.mxu1 %vm5324_vm2, %v4500_v29  ;;  %4517 = vmatpush3.bf16.msra.mxu0 %v4514_v15 }
 0x262   : > { %v4518_v23 = vpack.c.bf16 %v991_v18, %v986_v22  ;;  %4539 = vmatprep.subr.bf16.mxu1 %v4538_v17 }
 0x264   : > { %4519 = vmatprep.subr.bf16.mxu0 %v4518_v23 }
 0x265   : > { %4521 = vmatpush3.bf16.msra.mxu0 %v4518_v23 }
 0x268   : > { %4215 = vmatmul.mubr.msk.f32.vlgmr.msra.gmra.mrb[0].mxu1 %vm1002_vm1, %v717_v36 }
 0x269   : > { %4217 = vmatprep.mubr.msk.f32.mxu1 %vm1002_vm1, %v722_v40  ;;  %4541 = vmatpush3.bf16.msra.mxu1 %v4538_v17 }
 0x26a   : > { %4543 = vmatprep.subr.bf16.mxu1 %v4542_v37 }
 0x26c   : > { %4218 = vmatmul.mubr.msk.f32.gmra.mrb[2].mxu1 %vm1002_vm1, %v727_v25 }
 0x26d   : > { %4220 = vmatprep.mubr.msk.f32.mxu1 %vm1002_vm1, %v732_v31  ;;  %4545 = vmatpush3.bf16.msra.mxu1 %v4542_v37 }
 0x26e   : > { %4547 = vmatprep.subr.bf16.mxu1 %v4546_v45 }
 0x270   : > { %4221 = vmatmul.mubr.msk.f32.gmra.mrb[4].mxu1 %vm1002_vm1, %v737_v30 }
 0x271   : > { %4223 = vmatprep.mubr.msk.f32.mxu1 %vm1002_vm1, %v742_v33  ;;  %4549 = vmatpush3.bf16.msra.mxu1 %v4546_v45 }
 0x272   : > { %4551 = vmatprep.subr.bf16.mxu1 %v4550_v47 }
 0x274   : > { %4224 = vmatmul.mubr.msk.f32.gmra.mrb[6].mxu1 %vm1002_vm1, %v747_v50 }
 0x275   : > { %4553 = vmatpush3.bf16.msra.mxu1 %v4550_v47  ;;  %4298 = vmatprep.mubr.msk.f32.mxu1 %vm476_vm0, %v5185_v44 }
 0x278   : > { %4299 = vmatmul.mubr.msk.f32.vlgmr.msra.gmra.mrb[8].mxu1 %vm476_vm0, %v5197_v54 }
 0x279   : > { %4301 = vmatprep.mubr.msk.f32.mxu1 %vm476_vm0, %v5200_v55 }
 0x27c   : > { %4302 = vmatmul.mubr.msk.f32.gmra.mrb[10].mxu1 %vm476_vm0, %v5213_v38 }
 0x27d   : > { %4304 = vmatprep.mubr.msk.f32.mxu1 %vm476_vm0, %v5216_v0 }
 0x280   : > { %4305 = vmatmul.mubr.msk.f32.gmra.mrb[12].mxu1 %vm476_vm0, %v5229_v6 }
 0x281   : > { %4307 = vmatprep.mubr.msk.f32.mxu1 %vm476_vm0, %v5232_v8 }
 0x284   : > { %4308 = vmatmul.mubr.msk.f32.gmra.mrb[14].mxu1 %vm476_vm0, %v5244_v49 }
 0x33b   : > { %v4216_v34 = vpop.f32.mrb[0].mxu1 }
 0x33c   : > { %v5414_v35 = vadd.f32 %v4216_v34, %v995_v24  ;;  %v1117_v51 = vpop.f32.mrb[1].mxu1 }
 0x33d   : > { %v5416_v52 = vadd.f32 %v1117_v51, %v994_v32 }
 0x33e   : > { %v1159_v21 = vsel %vm476_vm0, %v5414_v35, -inf }
 0x33f   : > { %1160 = vmax.xlane.f32.xlu1 %v1159_v21  ;;  %v4219_v56 = vpop.f32.mrb[2].mxu1  ;;  %v1156_v57 = vsel %vm476_vm0, %v5416_v52, -inf }
 0x340   : > { %v5428_v58 = vadd.f32 %v4219_v56, %v997_v53  ;;  %v1127_v59 = vpop.f32.mrb[3].mxu1  ;;  %1157 = vmax.xlane.f32.xlu0 %v1156_v57 }
 0x341   : > { %v5430_v60 = vadd.f32 %v1127_v59, %v996_v28 }
 0x342   : > { %v1165_v29 = vsel %vm476_vm0, %v5428_v58, -inf }
 0x343   : > { %1166 = vmax.xlane.f32.xlu1 %v1165_v29  ;;  %v4222_v63 = vpop.f32.mrb[4].mxu1  ;;  %v1162_v1 = vsel %vm476_vm0, %v5430_v60, -inf }
 0x344   : > { %v5442_v2 = vadd.f32 %v4222_v63, %v999_v61  ;;  %v1137_v3 = vpop.f32.mrb[5].mxu1  ;;  %1163 = vmax.xlane.f32.xlu0 %v1162_v1 }
 0x345   : > { %v5444_v4 = vadd.f32 %v1137_v3, %v998_v62 }
 0x346   : > { %v1171_v39 = vsel %vm476_vm0, %v5442_v2, -inf }
 0x347   : > { %1172 = vmax.xlane.f32.xlu1 %v1171_v39  ;;  %v4225_v7 = vpop.f32.mrb[6].mxu1  ;;  %v1168_v9 = vsel %vm476_vm0, %v5444_v4, -inf }
 0x348   : > { %v5456_v10 = vadd.f32 %v4225_v7, %v1001_v5  ;;  %1169 = vmax.xlane.f32.xlu0 %v1168_v9  ;;  %v1147_v11 = vpop.f32.mrb[7].mxu1 }
 0x349   : > { %v5458_v12 = vadd.f32 %v1147_v11, %v1000_v48 }
 0x34a   : > { %v1177_v14 = vsel %vm476_vm0, %v5456_v10, -inf }
 0x34b   : > { %1178 = vmax.xlane.f32.xlu1 %v1177_v14  ;;  %v4300_v15 = vpop.f32.mrb[8].mxu1  ;;  %v1174_v16 = vsel %vm476_vm0, %v5458_v12, -inf }
 0x34c   : > { %v1588_v17 = vadd.f32 %v4300_v15, %v3758_v13  ;;  %v1582_v18 = vpop.f32.mrb[9].mxu1  ;;  %1175 = vmax.xlane.f32.xlu0 %v1174_v16 }
 0x34d   : > { %v1583_v19 = vadd.f32 %v3758_v13, %v1582_v18 }
 0x34f   : > { %v4570_v22 = vpack.c.bf16 %v1588_v17, %v1583_v19  ;;  %v4303_v23 = vpop.f32.mrb[10].mxu1 }
 0x350   : > { %v1598_v26 = vadd.f32 %v4303_v23, %v3758_v13  ;;  %v1592_v27 = vpop.f32.mrb[11].mxu1  ;;  %v3732_v23 = vld [vmem:[%s6627_s2 + $0x48] sm:$0xff] }
 0x351   : > { %v1593_v36 = vadd.f32 %v3758_v13, %v1592_v27  ;;  %4572 = vmatprep.subr.msk.bf16.mxu1 %vm5324_vm2, %v4570_v22 }
 0x352   : > { %4575 = vmatpush3.bf16.xpose.msk.msra.mxu1 %vm5324_vm2, %v4570_v22  ;;  %v3731_v22 = vld [vmem:[%s6627_s2 + $0x40] sm:$0xff] }
 0x353   : > { %v4576_v37 = vpack.c.bf16 %v1598_v26, %v1593_v36  ;;  %v4306_v40 = vpop.f32.mrb[12].mxu1  ;;  %v4522_v26 = vpack.c.bf16 %v3732_v23, %v3731_v22 }
 0x354   : > { %v1608_v41 = vadd.f32 %v4306_v40, %v3758_v13  ;;  %v1602_v42 = vpop.f32.mrb[13].mxu1 }
 0x355   : > { %v1603_v25 = vadd.f32 %v3758_v13, %v1602_v42  ;;  %4578 = vmatprep.subr.msk.bf16.mxu1 %vm5324_vm2, %v4576_v37  ;;  %4523 = vmatprep.subr.bf16.mxu0 %v4522_v26 }
 0x357   : > { %v4582_v45 = vpack.c.bf16 %v1608_v41, %v1603_v25  ;;  %v4309_v31 = vpop.f32.mrb[14].mxu1 }
 0x358   : > { %v1618_v46 = vadd.f32 %v4309_v31, %v3758_v13  ;;  %v1612_v20 = vpop.f32.mrb[15].mxu1  ;;  %v3734_v31 = vld [vmem:[%s6627_s2 + $0x58] sm:$0xff] }
 0x359   : > { %v1613_v30 = vadd.f32 %v3758_v13, %v1612_v20 }
 0x35a   : > { %4581 = vmatpush3.bf16.xpose.msk.msra.mxu1 %vm5324_vm2, %v4576_v37 }
 0x35b   : > { %v4588_v47 = vpack.c.bf16 %v1618_v46, %v1613_v30  ;;  %4584 = vmatprep.subr.msk.bf16.mxu1 %vm5324_vm2, %v4582_v45 }
 0x362   : > { %4587 = vmatpush3.bf16.xpose.msk.msra.mxu1 %vm5324_vm2, %v4582_v45  ;;  %v3733_v45 = vld [vmem:[%s6627_s2 + $0x50] sm:$0xff] }
 0x363   : > { %4590 = vmatprep.subr.msk.bf16.mxu1 %vm5324_vm2, %v4588_v47 }
 0x36a   : > { %4593 = vmatpush3.bf16.xpose.msk.msra.mxu1 %vm5324_vm2, %v4588_v47 }
 0x3cc   : > { %v1161_v33 = vpop.xlane.xlu1 %1160 }
 0x3cd   : > { %v1181_v50 = vsub.f32 %v5414_v35, %v1161_v33  ;;  %v1158_v24 = vpop.xlane.xlu0 %1157 }
 0x3ce   : > { %v1180_v32 = vsub.f32 %v5416_v52, %v1158_v24 }
 0x3cf   : > { %v1190_v34 = vmul.f32 1.442695, %v1181_v50  ;;  %v4526_v50 = vpack.c.bf16 %v3734_v31, %v3733_v45 }
 0x3d0   : > { %v1188_v51 = vmul.f32 1.442695, %v1180_v32  ;;  %v1167_v53 = vpop.xlane.xlu1 %1166  ;;  %v3735_v32 = vld [vmem:[%s6627_s2 + $0x60] sm:$0xff] }
 0x3d1   : > { %4741 = vpow2.f32 %v1190_v34  ;;  %v1183_v21 = vsub.f32 %v5428_v58, %v1167_v53  ;;  %v1164_v28 = vpop.xlane.xlu0 %1163  ;;  %v3736_v34 = vld [vmem:[%s6627_s2 + $0x68] sm:$0xff] }
 0x3d2   : > { %4743 = vpow2.f32 %v1188_v51  ;;  %v1182_v56 = vsub.f32 %v5430_v60, %v1164_v28  ;;  %v4530_v28 = vpack.c.bf16 %v3736_v34, %v3735_v32 }
 0x3d3   : > { %v1194_v57 = vmul.f32 1.442695, %v1183_v21 }
 0x3d4   : > { %v1192_v59 = vmul.f32 1.442695, %v1182_v56  ;;  %v1173_v43 = vpop.xlane.xlu1 %1172 }
 0x3d5   : > { %4745 = vpow2.f32 %v1194_v57  ;;  %v1185_v61 = vsub.f32 %v5442_v2, %v1173_v43  ;;  %v1170_v35 = vpop.xlane.xlu0 %1169  ;;  %v3737_v57 = vld [vmem:[%s6627_s2 + $0x70] sm:$0xff] }
 0x3d6   : > { %4747 = vpow2.f32 %v1192_v59  ;;  %v1184_v52 = vsub.f32 %v5444_v4, %v1170_v35  ;;  %v3738_v59 = vld [vmem:[%s6627_s2 + $0x78] sm:$0xff] }
 0x3d7   : > { %v1198_v29 = vmul.f32 1.442695, %v1185_v61 }
 0x3d8   : > { %v1196_v62 = vmul.f32 1.442695, %v1184_v52  ;;  %v1179_v63 = vpop.xlane.xlu1 %1178  ;;  %v4534_v52 = vpack.c.bf16 %v3738_v59, %v3737_v57 }
 0x3d9   : > { %4749 = vpow2.f32 %v1198_v29  ;;  %v1187_v58 = vsub.f32 %v5456_v10, %v1179_v63  ;;  %v1176_v1 = vpop.xlane.xlu0 %1175  ;;  %v3768_v63 = vld [vmem:[%s6627_s2 + $0x148] sm:$0xff] }
 0x3da   : > { %4751 = vpow2.f32 %v1196_v62  ;;  %v1186_v60 = vsub.f32 %v5458_v12, %v1176_v1  ;;  %v3767_v62 = vld [vmem:[%s6627_s2 + $0x140] sm:$0xff] }
 0x3db   : > { %v4742_v3 = vpop.eup %4741  ;;  %v1202_v5 = vmul.f32 1.442695, %v1187_v58 }
 0x3dc   : > { %v4744_v39 = vpop.eup %4743  ;;  %v1200_v48 = vmul.f32 1.442695, %v1186_v60  ;;  %v1207_v2 = vsel %vm476_vm0, %v4742_v3, 0.0 }
 0x3dd   : > { %4753 = vpow2.f32 %v1202_v5  ;;  %1208 = vadd.xlane.f32.xlu1 %v1207_v2  ;;  %v1204_v4 = vsel %vm476_vm0, %v4744_v39, 0.0  ;;  %v3769_v5 = vld [vmem:[%s6627_s2 + $0x150] sm:$0xff]  ;;  %v3771_v2 = vld [vmem:[%s6627_s2 + $0x160] sm:$0xff] }
 0x3de   : > { %4755 = vpow2.f32 %v1200_v48  ;;  %1205 = vadd.xlane.f32.xlu0 %v1204_v4  ;;  %v3772_v4 = vld [vmem:[%s6627_s2 + $0x168] sm:$0xff] }
 0x3df   : > { %v4746_v7 = vpop.eup %4745 }
 0x3e0   : > { %v4748_v9 = vpop.eup %4747  ;;  %v1213_v10 = vsel %vm476_vm0, %v4746_v7, 0.0 }
 0x3e1   : > { %1214 = vadd.xlane.f32.xlu1 %v1213_v10  ;;  %v1210_v11 = vsel %vm476_vm0, %v4748_v9, 0.0  ;;  %v3774_v10 = vld [vmem:[%s6627_s2 + $0x178] sm:$0xff] }
 0x3e2   : > { %1211 = vadd.xlane.f32.xlu0 %v1210_v11 }
 0x3e3   : > { %v4750_v12 = vpop.eup %4749 }
 0x3e4   : > { %v4752_v13 = vpop.eup %4751  ;;  %v1219_v14 = vsel %vm476_vm0, %v4750_v12, 0.0 }
 0x3e5   : > { %1220 = vadd.xlane.f32.xlu1 %v1219_v14  ;;  %v1216_v15 = vsel %vm476_vm0, %v4752_v13, 0.0 }
 0x3e6   : > { %1217 = vadd.xlane.f32.xlu0 %v1216_v15 }
 0x3e7   : > { %v5497_v16 = vpop.eup %4753 }
 0x3e8   : > { %v4756_v17 = vpop.eup %4755  ;;  %v1225_v18 = vsel %vm476_vm0, %v5497_v16, 0.0 }
 0x3e9   : > { %1226 = vadd.xlane.f32.xlu1 %v1225_v18  ;;  %v1222_v19 = vsel %vm476_vm0, %v4756_v17, 0.0 }
 0x3ea   : > { %1223 = vadd.xlane.f32.xlu0 %v1222_v19 }
 0x46a   : > { %v1209_v27 = vpop.xlane.xlu1 %1208 }
 0x46b   : > { %4757 = vrcp.f32 %v1209_v27  ;;  %v1206_v36 = vpop.xlane.xlu0 %1205 }
 0x46c   : > { %4759 = vrcp.f32 %v1206_v36 }
 0x46e   : > { %v1215_v37 = vpop.xlane.xlu1 %1214 }
 0x46f   : > { %4761 = vrcp.f32 %v1215_v37  ;;  %v1212_v40 = vpop.xlane.xlu0 %1211 }
 0x470   : > { %4763 = vrcp.f32 %v1212_v40 }
 0x472   : > { %v1221_v41 = vpop.xlane.xlu1 %1220 }
 0x473   : > { %4765 = vrcp.f32 %v1221_v41  ;;  %v1218_v42 = vpop.xlane.xlu0 %1217 }
 0x474   : > { %4767 = vrcp.f32 %v1218_v42  ;;  %v3776_v42 = vld [vmem:[%s6590_s3 + $0x5] ss:$0 sm:$0xff] }
 0x475   : > { %v4758_v25 = vpop.eup %4757 }
 0x476   : > { %v4760_v46 = vpop.eup %4759  ;;  %v1227_v20 = vpop.xlane.xlu1 %1226  ;;  %v1237_v33 = vmul.f32 %v4758_v25, %v4742_v3  ;;  %v4554_v3 = vpack.c.bf16 %v3768_v63, %v3767_v62 }
 0x477   : > { %4769 = vrcp.f32 %v1227_v20  ;;  %v1224_v30 = vpop.xlane.xlu0 %1223  ;;  %v1236_v47 = vmul.f32 %v4760_v46, %v4744_v39  ;;  %v3770_v39 = vld [vmem:[%s6627_s2 + $0x158] sm:$0xff] }
 0x478   : > { %4771 = vrcp.f32 %v1224_v30  ;;  %v4558_v48 = vpack.c.bf16 %v3770_v39, %v3769_v5 }
 0x479   : > { %v4762_v24 = vpop.eup %4761  ;;  %4242 = vmatprep.mubr.msk.f32.mxu0 %vm476_vm0, %v1236_v47 }
 0x47a   : > { %v4764_v51 = vpop.eup %4763  ;;  %4243 = vmatmul.mubr.msk.f32.vlgmr.msra.gmra.mrb[24].mxu0 %vm476_vm0, %v1237_v33  ;;  %v1239_v21 = vmul.f32 %v4762_v24, %v4746_v7  ;;  %v4562_v7 = vpack.c.bf16 %v3772_v4, %v3771_v2 }
 0x47b   : > { %4525 = vmatpush3.bf16.msra.mxu0 %v4522_v26  ;;  %v1238_v53 = vmul.f32 %v4764_v51, %v4748_v9  ;;  %v3773_v9 = vld [vmem:[%s6627_s2 + $0x170] sm:$0xff]  ;;  %s458_s2 = sand.u32 1, %s4947_s30  }
 0x47c   : > { %4527 = vmatprep.subr.bf16.mxu0 %v4526_v50  ;;  %v4566_v11 = vpack.c.bf16 %v3774_v10, %v3773_v9  ;;  %v3789_v10 = vld [vmem:[%s6591_s4 + $0x60] sm:$0xff]  ;;  %s3657_s20 = sshll.u32 %s458_s2, 6 }
 0x47d   : > { %v4766_v56 = vpop.eup %4765  ;;  %4245 = vmatprep.mubr.msk.f32.mxu0 %vm476_vm0, %v1238_v53  ;;  %s6510_s21 = scalar_lea.vmem [#allocation3], %s3657_s20  ;;  %s4899_s20 = scalar_lea.vmem %s4898_s22, 2048 }
 0x47e   : > { %v4768_v43 = vpop.eup %4767  ;;  %4246 = vmatmul.mubr.msk.f32.gmra.mrb[26].mxu0 %vm476_vm0, %v1239_v21  ;;  %v1241_v35 = vmul.f32 %v4766_v56, %v4750_v12  ;;  %s3591_s1 = sshll.u32 %s6510_s21, 4  ;;  %s6539_s1 = int_to_ptr.vmem [resolvable:$true] %s3591_s1 }
 0x47f   : > { %4529 = vmatpush3.bf16.msra.mxu0 %v4526_v50  ;;  %v1240_v61 = vmul.f32 %v4768_v43, %v4752_v13  ;;  %s4893_s28 = scalar_lea.vmem %s6539_s1, 1024  ;;  %p4900_p0 = scmp.lt.s32.totalorder %s6539_s1, %s4898_s22 }
 0x480   : > { %4531 = vmatprep.subr.bf16.mxu0 %v4530_v28  ;;  %p4894_p11 = scmp.ne.s32.totalorder %s6539_s1, %s4893_s28  ;;  %p4901_p1 = scmp.lt.s32.totalorder %s4899_s20, %s4893_s28 }
 0x481   : > { %v4770_v29 = vpop.eup %4769  ;;  %4248 = vmatprep.mubr.msk.f32.mxu0 %vm476_vm0, %v1240_v61 }
 0x482   : > { %v4772_v58 = vpop.eup %4771  ;;  %4249 = vmatmul.mubr.msk.f32.gmra.mrb[28].mxu0 %vm476_vm0, %v1241_v35  ;;  %v1243_v60 = vmul.f32 %v4770_v29, %v5497_v16  ;;  %v3786_v35 = vld [vmem:[%s6591_s4 + $0x48] sm:$0xff]  ;;  %p4895_p12 = pnand %p4894_p11, %p5075_p5  ;;  %p4902_p2 = por %p4901_p1, %p4900_p0 }
 0x483   : > { %4533 = vmatpush3.bf16.msra.mxu0 %v4530_v28  ;;  %v1242_v1 = vmul.f32 %v4772_v58, %v4756_v17 }
 0x484   : > { %4535 = vmatprep.subr.bf16.mxu0 %v4534_v52  ;;  %p4896_p13 = pneg %p4895_p12 }
 0x485   : > { %4251 = vmatprep.mubr.msk.f32.mxu0 %vm476_vm0, %v1242_v1  ;;  %v3788_v1 = vld [vmem:[%s6591_s4 + $0x58] sm:$0xff] }
 0x486   : > { %4252 = vmatmul.mubr.msk.f32.gmra.mrb[30].mxu0 %vm476_vm0, %v1243_v60  ;;  %p4903_p3 = pnand %p4902_p2, %p4896_p13 }
 0x487   : > { %4537 = vmatpush3.bf16.msra.mxu0 %v4534_v52  ;;  %4270 = vmatprep.mubr.msk.f32.mxu0 %vm476_vm0, %v5185_v44  ;;  %v3785_v52 = vld [vmem:[%s6591_s4 + $0x40] sm:$0xff] }
 0x488   : > { %4555 = vmatprep.subr.bf16.mxu0 %v4554_v3 }
 0x48a   : > { %4271 = vmatmul.mubr.msk.f32.vlgmr.msra.gmra.mrb[32].mxu0 %vm476_vm0, %v5197_v54 }
 0x48b   : > { %4273 = vmatprep.mubr.msk.f32.mxu0 %vm476_vm0, %v5200_v55  ;;  %4557 = vmatpush3.bf16.msra.mxu0 %v4554_v3  ;;  %v3787_v3 = vld [vmem:[%s6591_s4 + $0x50] sm:$0xff] }
 0x48c   : > { %4559 = vmatprep.subr.bf16.mxu0 %v4558_v48 }
 0x48e   : > { %4274 = vmatmul.mubr.msk.f32.gmra.mrb[34].mxu0 %vm476_vm0, %v5213_v38 }
 0x48f   : > { %4276 = vmatprep.mubr.msk.f32.mxu0 %vm476_vm0, %v5216_v0  ;;  %4561 = vmatpush3.bf16.msra.mxu0 %v4558_v48 }
 0x490   : > { %4563 = vmatprep.subr.bf16.mxu0 %v4562_v7 }
 0x492   : > { %4277 = vmatmul.mubr.msk.f32.gmra.mrb[36].mxu0 %vm476_vm0, %v5229_v6 }
 0x493   : > { %4279 = vmatprep.mubr.msk.f32.mxu0 %vm476_vm0, %v5232_v8  ;;  %4565 = vmatpush3.bf16.msra.mxu0 %v4562_v7  ;;  %v3790_v7 = vld [vmem:[%s6591_s4 + $0x68] sm:$0xff] }
 0x494   : > { %4567 = vmatprep.subr.bf16.mxu0 %v4566_v11 }
 0x496   : > { %4280 = vmatmul.mubr.msk.f32.gmra.mrb[38].mxu0 %vm476_vm0, %v5244_v49 }
 0x497   : > { %4569 = vmatpush3.bf16.msra.mxu0 %v4566_v11  ;;  %4326 = vmatprep.mubr.msk.f32.mxu0 %vm476_vm0, %v5185_v44 }
 0x49a   : > { %4327 = vmatmul.mubr.msk.f32.vlgmr.msra.gmra.mrb[40].mxu0 %vm476_vm0, %v5197_v54 }
 0x49b   : > { %4329 = vmatprep.mubr.msk.f32.mxu0 %vm476_vm0, %v5200_v55 }
 0x49e   : > { %4330 = vmatmul.mubr.msk.f32.gmra.mrb[42].mxu0 %vm476_vm0, %v5213_v38 }
 0x49f   : > { %4332 = vmatprep.mubr.msk.f32.mxu0 %vm476_vm0, %v5216_v0 }
 0x4a2   : > { %4333 = vmatmul.mubr.msk.f32.gmra.mrb[44].mxu0 %vm476_vm0, %v5229_v6 }
 0x4a3   : > { %4335 = vmatprep.mubr.msk.f32.mxu0 %vm476_vm0, %v5232_v8  ;;  %v3740_v8 = vld [vmem:[%s6590_s3 + $0x1] ss:$0 sm:$0xff] }
 0x4a6   : > { %4336 = vmatmul.mubr.msk.f32.gmra.mrb[46].mxu0 %vm476_vm0, %v5244_v49 }
 0x54d   : > { %v5591_v44 = vpop.f32.mrb[24].mxu0 }
 0x54e   : > { %v5593_v54 = vpop.f32.mrb[25].mxu0 }
 0x551   : > { %v5595_v55 = vpop.f32.mrb[26].mxu0 }
 0x552   : > { %v5597_v12 = vpop.f32.mrb[27].mxu0 }
 0x555   : > { %v5599_v38 = vpop.f32.mrb[28].mxu0 }
 0x556   : > { %v5601_v0 = vpop.f32.mrb[29].mxu0 }
 0x559   : > { %v5603_v13 = vpop.f32.mrb[30].mxu0 }
 0x55a   : > { %v5605_v6 = vpop.f32.mrb[31].mxu0 }
 0x55d   : > { %v4272_v49 = vpop.f32.mrb[32].mxu0 }
 0x55e   : > { %v1460_v14 = vpop.f32.mrb[33].mxu0  ;;  %v1466_v16 = vadd.f32 %v4272_v49, %v3740_v8 }
 0x55f   : > { %v1461_v15 = vadd.f32 %v3740_v8, %v1460_v14 }
 0x561   : > { %v4275_v17 = vpop.f32.mrb[34].mxu0  ;;  %4354 = vmatprep.mubr.msk.f32.mxu1 %vm1002_vm1, %v1461_v15 }
 0x562   : > { %v1470_v18 = vpop.f32.mrb[35].mxu0  ;;  %4355 = vmatmul.mubr.msk.f32.vlgmr.msra.gmra.mrb[16].mxu1 %vm1002_vm1, %v1466_v16  ;;  %v1476_v22 = vadd.f32 %v4275_v17, %v3740_v8  ;;  %v3792_v16 = vld [vmem:[%s6591_s4 + $0x78] sm:$0xff] }
 0x563   : > { %v1471_v19 = vadd.f32 %v3740_v8, %v1470_v18  ;;  %v3791_v18 = vld [vmem:[%s6591_s4 + $0x70] sm:$0xff] }
 0x565   : > { %v4278_v23 = vpop.f32.mrb[36].mxu0  ;;  %4357 = vmatprep.mubr.msk.f32.mxu1 %vm1002_vm1, %v1471_v19 }
 0x566   : > { %v1480_v26 = vpop.f32.mrb[37].mxu0  ;;  %4358 = vmatmul.mubr.msk.f32.gmra.mrb[18].mxu1 %vm1002_vm1, %v1476_v22  ;;  %v1486_v36 = vadd.f32 %v4278_v23, %v3740_v8 }
 0x567   : > { %v1481_v27 = vadd.f32 %v3740_v8, %v1480_v26 }
 0x569   : > { %v4281_v37 = vpop.f32.mrb[38].mxu0  ;;  %4360 = vmatprep.mubr.msk.f32.mxu1 %vm1002_vm1, %v1481_v27 }
 0x56a   : > { %v1490_v40 = vpop.f32.mrb[39].mxu0  ;;  %4361 = vmatmul.mubr.msk.f32.gmra.mrb[20].mxu1 %vm1002_vm1, %v1486_v36  ;;  %v1496_v25 = vadd.f32 %v4281_v37, %v3740_v8 }
 0x56b   : > { %v1491_v41 = vadd.f32 %v3740_v8, %v1490_v40 }
 0x56d   : > { %v4328_v45 = vpop.f32.mrb[40].mxu0  ;;  %4363 = vmatprep.mubr.msk.f32.mxu1 %vm1002_vm1, %v1491_v41 }
 0x56e   : > { %v1710_v31 = vadd.f32 %v4328_v45, %v3776_v42  ;;  %v1704_v46 = vpop.f32.mrb[41].mxu0  ;;  %4364 = vmatmul.mubr.msk.f32.gmra.mrb[22].mxu1 %vm1002_vm1, %v1496_v25 }
 0x56f   : > { %v1705_v20 = vadd.f32 %v3776_v42, %v1704_v46 }
 0x571   : > { %v4594_v30 = vpack.c.bf16 %v1710_v31, %v1705_v20  ;;  %v4331_v47 = vpop.f32.mrb[42].mxu0 }
 0x572   : > { %v1720_v33 = vadd.f32 %v4331_v47, %v3776_v42  ;;  %v1714_v50 = vpop.f32.mrb[43].mxu0 }
 0x573   : > { %v1715_v24 = vadd.f32 %v3776_v42, %v1714_v50  ;;  %4595 = vmatprep.subr.bf16.mxu0 %v4594_v30 }
 0x574   : > { %4597 = vmatpush3.bf16.msra.mxu0 %v4594_v30 }
 0x575   : > { %v4598_v32 = vpack.c.bf16 %v1720_v33, %v1715_v24  ;;  %v4334_v34 = vpop.f32.mrb[44].mxu0 }
 0x576   : > { %v1730_v51 = vadd.f32 %v4334_v34, %v3776_v42  ;;  %v1724_v53 = vpop.f32.mrb[45].mxu0 }
 0x577   : > { %v1725_v21 = vadd.f32 %v3776_v42, %v1724_v53  ;;  %4599 = vmatprep.subr.bf16.mxu0 %v4598_v32 }
 0x578   : > { %4601 = vmatpush3.bf16.msra.mxu0 %v4598_v32 }
 0x579   : > { %v4602_v28 = vpack.c.bf16 %v1730_v51, %v1725_v21  ;;  %v4337_v56 = vpop.f32.mrb[46].mxu0 }
 0x57a   : > { %v1740_v57 = vadd.f32 %v4337_v56, %v3776_v42  ;;  %v1734_v59 = vpop.f32.mrb[47].mxu0 }
 0x57b   : > { %v1735_v43 = vadd.f32 %v3776_v42, %v1734_v59  ;;  %4603 = vmatprep.subr.bf16.mxu0 %v4602_v28 }
 0x57c   : > { %4605 = vmatpush3.bf16.msra.mxu0 %v4602_v28 }
 0x57d   : > { %v4606_v61 = vpack.c.bf16 %v1740_v57, %v1735_v43 }
 0x57f   : > { %4607 = vmatprep.subr.bf16.mxu0 %v4606_v61 }
 0x580   : > { %4609 = vmatpush3.bf16.msra.mxu0 %v4606_v61 }
 0x635   : > { %v4356_v29 = vpop.f32.mrb[16].mxu1 }
 0x636   : > { %v1872_v62 = vadd.f32 %v4356_v29, %v3786_v35  ;;  %v1866_v63 = vpop.f32.mrb[17].mxu1 }
 0x637   : > { %v1867_v58 = vadd.f32 %v3785_v52, %v1866_v63 }
 0x638   : > { %v1908_v60 = vsel %vm476_vm0, %v1872_v62, -inf }
 0x639   : > { %1909 = vmax.xlane.f32.xlu1 %v1908_v60  ;;  %v4359_v5 = vpop.f32.mrb[18].mxu1  ;;  %v1905_v39 = vsel %vm476_vm0, %v1867_v58, -inf }
 0x63a   : > { %v1882_v48 = vadd.f32 %v4359_v5, %v3788_v1  ;;  %v1876_v2 = vpop.f32.mrb[19].mxu1  ;;  %1906 = vmax.xlane.f32.xlu0 %v1905_v39 }
 0x63b   : > { %v1877_v4 = vadd.f32 %v3787_v3, %v1876_v2 }
 0x63c   : > { %v1914_v9 = vsel %vm476_vm0, %v1882_v48, -inf }
 0x63d   : > { %1915 = vmax.xlane.f32.xlu1 %v1914_v9  ;;  %v4362_v11 = vpop.f32.mrb[20].mxu1  ;;  %v1911_v8 = vsel %vm476_vm0, %v1877_v4, -inf }
 0x63e   : > { %v1892_v49 = vadd.f32 %v4362_v11, %v3790_v7  ;;  %v1886_v14 = vpop.f32.mrb[21].mxu1  ;;  %1912 = vmax.xlane.f32.xlu0 %v1911_v8  ;;  %v3818_v11 = vld [vmem:[%s6592_s5 + $0x28] sm:$0xff] }
 0x63f   : > { %v1887_v15 = vadd.f32 %v3789_v10, %v1886_v14  ;;  %v3817_v10 = vld [vmem:[%s6592_s5 + $0x20] sm:$0xff] }
 0x640   : > { %v1920_v17 = vsel %vm476_vm0, %v1892_v49, -inf  ;;  %v4610_v8 = vpack.c.bf16 %v3818_v11, %v3817_v10  ;;  %v5779_v10 = vld [vmem:[%s6594_s7 + $0x2] ss:$0 sm:$0xff] }
 0x641   : > { %1921 = vmax.xlane.f32.xlu1 %v1920_v17  ;;  %v4365_v19 = vpop.f32.mrb[22].mxu1  ;;  %v1917_v22 = vsel %vm476_vm0, %v1887_v15, -inf }
 0x642   : > { %v1902_v23 = vadd.f32 %v4365_v19, %v3792_v16  ;;  %v1896_v26 = vpop.f32.mrb[23].mxu1  ;;  %1918 = vmax.xlane.f32.xlu0 %v1917_v22  ;;  %4611 = vmatprep.subr.bf16.mxu0 %v4610_v8  ;;  %v3819_v22 = vld [vmem:[%s6592_s5 + $0x30] sm:$0xff] }
 0x643   : > { %v1897_v27 = vadd.f32 %v3791_v18, %v1896_v26 }
 0x644   : > { %v1926_v36 = vsel %vm476_vm0, %v1902_v23, -inf }
 0x645   : > { %1927 = vmax.xlane.f32.xlu1 %v1926_v36  ;;  %v1923_v37 = vsel %vm476_vm0, %v1897_v27, -inf }
 0x646   : > { %1924 = vmax.xlane.f32.xlu0 %v1923_v37 }
 0x6c6   : > { %v1910_v40 = vpop.xlane.xlu1 %1909 }
 0x6c7   : > { %v1930_v41 = vsub.f32 %v1872_v62, %v1910_v40  ;;  %v1907_v42 = vpop.xlane.xlu0 %1906 }
 0x6c8   : > { %v1929_v25 = vsub.f32 %v1867_v58, %v1907_v42 }
 0x6c9   : > { %v1939_v45 = vmul.f32 1.442695, %v1930_v41 }
 0x6ca   : > { %v1937_v31 = vmul.f32 1.442695, %v1929_v25  ;;  %v1916_v46 = vpop.xlane.xlu1 %1915 }
 0x6cb   : > { %4773 = vpow2.f32 %v1939_v45  ;;  %v1932_v20 = vsub.f32 %v1882_v48, %v1916_v46  ;;  %v1913_v30 = vpop.xlane.xlu0 %1912 }
 0x6cc   : > { %4775 = vpow2.f32 %v1937_v31  ;;  %v1931_v47 = vsub.f32 %v1877_v4, %v1913_v30 }
 0x6cd   : > { %v1943_v33 = vmul.f32 1.442695, %v1932_v20 }
 0x6ce   : > { %v1941_v50 = vmul.f32 1.442695, %v1931_v47  ;;  %v1922_v24 = vpop.xlane.xlu1 %1921 }
 0x6cf   : > { %4777 = vpow2.f32 %v1943_v33  ;;  %v1934_v32 = vsub.f32 %v1892_v49, %v1922_v24  ;;  %v1919_v34 = vpop.xlane.xlu0 %1918 }
 0x6d0   : > { %4779 = vpow2.f32 %v1941_v50  ;;  %v1933_v51 = vsub.f32 %v1887_v15, %v1919_v34  ;;  %v1373_v34 = vld [vmem:[%s6592_s5] sm:$0xff] }
 0x6d1   : > { %v1947_v53 = vmul.f32 1.442695, %v1934_v32 }
 0x6d2   : > { %v1945_v21 = vmul.f32 1.442695, %v1933_v51  ;;  %v1928_v28 = vpop.xlane.xlu1 %1927  ;;  %v1374_v51 = vld [vmem:[%s6592_s5 + $0x8] sm:$0xff] }
 0x6d3   : > { %4781 = vpow2.f32 %v1947_v53  ;;  %v1936_v56 = vsub.f32 %v1902_v23, %v1928_v28  ;;  %v1925_v57 = vpop.xlane.xlu0 %1924  ;;  %v3820_v23 = vld [vmem:[%s6592_s5 + $0x38] sm:$0xff]  ;;  %v4618_v53 = vpack.c.bf16 %v1374_v51, %v1373_v34 }
 0x6d4   : > { %4783 = vpow2.f32 %v1945_v21  ;;  %v1935_v59 = vsub.f32 %v1897_v27, %v1925_v57  ;;  %v4614_v41 = vpack.c.bf16 %v3820_v23, %v3819_v22  ;;  %v1375_v21 = vld [vmem:[%s6592_s5 + $0x10] sm:$0xff]  ;;  %v1376_v28 = vld [vmem:[%s6592_s5 + $0x18] sm:$0xff] }
 0x6d5   : > { %v4774_v43 = vpop.eup %4773  ;;  %v1951_v61 = vmul.f32 1.442695, %v1936_v56 }
 0x6d6   : > { %v4776_v35 = vpop.eup %4775  ;;  %v1949_v52 = vmul.f32 1.442695, %v1935_v59  ;;  %v1956_v29 = vsel %vm476_vm0, %v4774_v43, 0.0  ;;  %v4622_v59 = vpack.c.bf16 %v1376_v28, %v1375_v21 }
 0x6d7   : > { %4785 = vpow2.f32 %v1951_v61  ;;  %1957 = vadd.xlane.f32.xlu1 %v1956_v29  ;;  %v1953_v62 = vsel %vm476_vm0, %v4776_v35, 0.0 }
 0x6d8   : > { %4787 = vpow2.f32 %v1949_v52  ;;  %1954 = vadd.xlane.f32.xlu0 %v1953_v62 }
 0x6d9   : > { %v4778_v63 = vpop.eup %4777 }
 0x6da   : > { %v4780_v58 = vpop.eup %4779  ;;  %v1962_v1 = vsel %vm476_vm0, %v4778_v63, 0.0 }
 0x6db   : > { %1963 = vadd.xlane.f32.xlu1 %v1962_v1  ;;  %v1959_v60 = vsel %vm476_vm0, %v4780_v58, 0.0  ;;  %v4885_v1 = vld [vmem:[%s5090_s18 + $0x8] sm:$0xff] }
 0x6dc   : > { %1960 = vadd.xlane.f32.xlu0 %v1959_v60 }
 0x6dd   : > { %v4782_v3 = vpop.eup %4781 }
 0x6de   : > { %v4784_v5 = vpop.eup %4783  ;;  %v1968_v39 = vsel %vm476_vm0, %v4782_v3, 0.0 }
 0x6df   : > { %1969 = vadd.xlane.f32.xlu1 %v1968_v39  ;;  %v1965_v48 = vsel %vm476_vm0, %v4784_v5, 0.0 }
 0x6e0   : > { %1966 = vadd.xlane.f32.xlu0 %v1965_v48 }
 0x6e1   : > { %v4786_v2 = vpop.eup %4785 }
 0x6e2   : > { %v4788_v4 = vpop.eup %4787  ;;  %v1974_v7 = vsel %vm476_vm0, %v4786_v2, 0.0 }
 0x6e3   : > { %1975 = vadd.xlane.f32.xlu1 %v1974_v7  ;;  %v1971_v9 = vsel %vm476_vm0, %v4788_v4, 0.0 }
 0x6e4   : > { %1972 = vadd.xlane.f32.xlu0 %v1971_v9 }
 0x764   : > { %v1958_v49 = vpop.xlane.xlu1 %1957 }
 0x765   : > { %4789 = vrcp.f32 %v1958_v49  ;;  %v1955_v14 = vpop.xlane.xlu0 %1954 }
 0x766   : > { %4791 = vrcp.f32 %v1955_v14  ;;  %v4888_v14 = vld [vmem:[%s5090_s18 + $0x10] sm:$0xff] }
 0x768   : > { %v1964_v15 = vpop.xlane.xlu1 %1963 }
 0x769   : > { %4793 = vrcp.f32 %v1964_v15  ;;  %v1961_v16 = vpop.xlane.xlu0 %1960 }
 0x76a   : > { %4795 = vrcp.f32 %v1961_v16 }
 0x76c   : > { %v1970_v17 = vpop.xlane.xlu1 %1969 }
 0x76d   : > { %4797 = vrcp.f32 %v1970_v17  ;;  %v1967_v18 = vpop.xlane.xlu0 %1966 }
 0x76e   : > { %4799 = vrcp.f32 %v1967_v18 }
 0x76f   : > { %v4790_v19 = vpop.eup %4789 }
 0x770   : > { %v4792_v26 = vpop.eup %4791  ;;  %v1976_v27 = vpop.xlane.xlu1 %1975  ;;  %v1986_v40 = vmul.f32 %v4790_v19, %v4774_v43 }
 0x771   : > { %4801 = vrcp.f32 %v1976_v27  ;;  %v1973_v36 = vpop.xlane.xlu0 %1972  ;;  %v1985_v37 = vmul.f32 %v4792_v26, %v4776_v35  ;;  %v4889_v26 = vld [vmem:[%s5090_s18 + $0x28] sm:$0xff] }
 0x772   : > { %4803 = vrcp.f32 %v1973_v36  ;;  %v5791_v36 = vld [vmem:[%s6594_s7 + $0x3] ss:$0 sm:$0xff] }
 0x773   : > { %v4794_v42 = vpop.eup %4793  ;;  %4382 = vmatprep.mubr.msk.f32.mxu0 %vm476_vm0, %v1985_v37  ;;  %v4890_v37 = vld [vmem:[%s5090_s18 + $0x20] sm:$0xff] }
 0x774   : > { %v4796_v25 = vpop.eup %4795  ;;  %4383 = vmatmul.mubr.msk.f32.vlgmr.msra.gmra.mrb[48].mxu0 %vm476_vm0, %v1986_v40  ;;  %v1988_v31 = vmul.f32 %v4794_v42, %v4778_v63  ;;  %v5769_v63 = vld [vmem:[%s6594_s7 + $0x1] ss:$0 sm:$0xff] }
 0x775   : > { %v1987_v45 = vmul.f32 %v4796_v25, %v4780_v58  ;;  %4613 = vmatpush3.bf16.msra.mxu0 %v4610_v8  ;;  %v4887_v8 = vld [vmem:[%s5090_s18 + $0x18] sm:$0xff] }
 0x776   : > { %4615 = vmatprep.subr.bf16.mxu0 %v4614_v41 }
 0x777   : > { %v4798_v46 = vpop.eup %4797  ;;  %4385 = vmatprep.mubr.msk.f32.mxu0 %vm476_vm0, %v1987_v45 }
 0x778   : > { %v4800_v20 = vpop.eup %4799  ;;  %4386 = vmatmul.mubr.msk.f32.gmra.mrb[50].mxu0 %vm476_vm0, %v1988_v31  ;;  %v1990_v47 = vmul.f32 %v4798_v46, %v4782_v3  ;;  %v4886_v3 = vld [vmem:[%s5090_s18] sm:$0xff] }
 0x779   : > { %v1989_v30 = vmul.f32 %v4800_v20, %v4784_v5  ;;  %4617 = vmatpush3.bf16.msra.mxu0 %v4614_v41 }
 0x77a   : > { %4619 = vmatprep.subr.bf16.mxu0 %v4618_v53 }
 0x77b   : > { %v4802_v33 = vpop.eup %4801  ;;  %4388 = vmatprep.mubr.msk.f32.mxu0 %vm476_vm0, %v1989_v30 }
 0x77c   : > { %v4804_v50 = vpop.eup %4803  ;;  %4389 = vmatmul.mubr.msk.f32.gmra.mrb[52].mxu0 %vm476_vm0, %v1990_v47  ;;  %v1992_v32 = vmul.f32 %v4802_v33, %v4786_v2 }
 0x77d   : > { %v1991_v24 = vmul.f32 %v4804_v50, %v4788_v4 }
 0x77f   : > { %4391 = vmatprep.mubr.msk.f32.mxu0 %vm476_vm0, %v1991_v24  ;;  %v5800_v24 = vld [vmem:[%s6594_s7 + $0x4] ss:$0 sm:$0xff] }
 0x780   : > { %4392 = vmatmul.mubr.msk.f32.gmra.mrb[54].mxu0 %vm476_vm0, %v1992_v32 }
 0x847   : > { %v4384_v56 = vpop.f32.mrb[48].mxu0 }
 0x848   : > { %v2083_v57 = vpop.f32.mrb[49].mxu0 }
 0x849   : > { %4402 = vmatprep.mubr.msk.f32.mxu0 %vm1002_vm1, %v2083_v57  ;;  %v5809_v57 = vld [vmem:[%s6594_s7 + $0x5] ss:$0 sm:$0xff] }
 0x84a   : > { %4403 = vmatmul.mubr.msk.f32.vlgmr.msra.gmra.mrb[56].mxu0 %vm1002_vm1, %v4384_v56 }
 0x84b   : > { %4621 = vmatpush3.bf16.msra.mxu0 %v4618_v53  ;;  %v4387_v43 = vpop.f32.mrb[50].mxu0  ;;  %v4891_v53 = vld [vmem:[%s5090_s18 + $0x38] sm:$0xff] }
 0x84c   : > { %v2093_v61 = vpop.f32.mrb[51].mxu0  ;;  %4623 = vmatprep.subr.bf16.mxu0 %v4622_v59 }
 0x84d   : > { %4405 = vmatprep.mubr.msk.f32.mxu0 %vm1002_vm1, %v2093_v61 }
 0x84e   : > { %4406 = vmatmul.mubr.msk.f32.gmra.mrb[58].mxu0 %vm1002_vm1, %v4387_v43 }
 0x84f   : > { %v4390_v35 = vpop.f32.mrb[52].mxu0  ;;  %4625 = vmatpush3.bf16.msra.mxu0 %v4622_v59  ;;  %v4892_v59 = vld [vmem:[%s5090_s18 + $0x30] sm:$0xff]  ;;  %s3873_s18 = sshll.u32 %s5058_s17, 10  ;;  %s6546_s17 = scalar_lea.sflag [#allocation4], %s458_s2 }
 0x850   : > { %v2103_v52 = vpop.f32.mrb[53].mxu0  ;;  %s6537_s27 = scalar_lea.hbm %s6601_s14, %s3873_s18 }
 0x851   : > { %4408 = vmatprep.mubr.msk.f32.mxu0 %vm1002_vm1, %v2103_v52 }
 0x852   : > { %4409 = vmatmul.mubr.msk.f32.gmra.mrb[60].mxu0 %vm1002_vm1, %v4390_v35 }
 0x853   : > { %v4393_v29 = vpop.f32.mrb[54].mxu0 }
 0x854   : > { %v2113_v62 = vpop.f32.mrb[55].mxu0 }
 0x855   : > { %4411 = vmatprep.mubr.msk.f32.mxu0 %vm1002_vm1, %v2113_v62  ;;  %v5822_v62 = vld [vmem:[%s6594_s7 + $0x7] ss:$0 sm:$0xff] }
 0x856   : > { %4412 = vmatmul.mubr.msk.f32.gmra.mrb[62].mxu0 %vm1002_vm1, %v4393_v29  ;;  %v5817_v29 = vld [vmem:[%s6594_s7 + $0x6] ss:$0 sm:$0xff] }
 0x857   : > { %4422 = vmatprep.mubr.msk.f32.mxu0 %vm1002_vm1, %v5593_v54  ;;  %v3837_v54 = vld [vmem:[%s6593_s6] ss:$0 sm:$0xff] }
 0x85a   : > { %4423 = vmatmul.mubr.msk.f32.vlgmr.msra.gmra.mrb[56].mxu0 %vm1002_vm1, %v5591_v44  ;;  %v4957_v44 = vmov 0.0  }
 0x85b   : > { %4425 = vmatprep.mubr.msk.f32.mxu0 %vm1002_vm1, %v5597_v12  ;;  %2413 = vst.msk [vmem:[#allocation2 + $0x20] sm:$0xff] %vm476_vm0, %v4957_v44  ;;  %2408 = vst.msk [vmem:[#allocation2] sm:$0xff] %vm476_vm0, %v4957_v44  ;;  %2936 = vmatprep.mubr.f32.mxu1 %v4957_v44 }
 0x85c   : > { %2414 = vst.msk [vmem:[#allocation2 + $0x28] sm:$0x3] %vm2409_vm3, %v4957_v44  ;;  %2410 = vst.msk [vmem:[#allocation2 + $0x8] sm:$0x3] %vm2409_vm3, %v4957_v44 }
 0x85d   : > { %2411 = vst.msk [vmem:[#allocation2 + $0x10] sm:$0xff] %vm476_vm0, %v4957_v44  ;;  %2415 = vst.msk [vmem:[#allocation2 + $0x30] sm:$0xff] %vm476_vm0, %v4957_v44 }
 0x85e   : > { %4426 = vmatmul.mubr.msk.f32.gmra.mrb[58].mxu0 %vm1002_vm1, %v5595_v55  ;;  %2412 = vst.msk [vmem:[#allocation2 + $0x18] sm:$0x3] %vm2409_vm3, %v4957_v44  ;;  %2416 = vst.msk [vmem:[#allocation2 + $0x38] sm:$0x3] %vm2409_vm3, %v4957_v44 }
 0x85f   : > { %4428 = vmatprep.mubr.msk.f32.mxu0 %vm1002_vm1, %v5601_v0  ;;  %2417 = vst.msk [vmem:[#allocation2 + $0x40] sm:$0xff] %vm476_vm0, %v4957_v44  ;;  %2419 = vst.msk [vmem:[#allocation2 + $0x50] sm:$0xff] %vm476_vm0, %v4957_v44 }
 0x860   : > { %2418 = vst.msk [vmem:[#allocation2 + $0x48] sm:$0x3] %vm2409_vm3, %v4957_v44  ;;  %2420 = vst.msk [vmem:[#allocation2 + $0x58] sm:$0x3] %vm2409_vm3, %v4957_v44 }
 0x861   : > { %2421 = vst.msk [vmem:[#allocation2 + $0x60] sm:$0xff] %vm476_vm0, %v4957_v44  ;;  %2423 = vst.msk [vmem:[#allocation2 + $0x70] sm:$0xff] %vm476_vm0, %v4957_v44 }
 0x862   : > { %4429 = vmatmul.mubr.msk.f32.gmra.mrb[60].mxu0 %vm1002_vm1, %v5599_v38  ;;  %2422 = vst.msk [vmem:[#allocation2 + $0x68] sm:$0x3] %vm2409_vm3, %v4957_v44  ;;  %2424 = vst.msk [vmem:[#allocation2 + $0x78] sm:$0x3] %vm2409_vm3, %v4957_v44  ;;  %v2438_v12 = vld [vmem:[#allocation2] sm:$0xff] }
 0x863   : > { %4431 = vmatprep.mubr.msk.f32.mxu0 %vm1002_vm1, %v5605_v6  ;;  %2425 = vst.msk [vmem:[#allocation2 + $0x80] sm:$0xff] %vm476_vm0, %v4957_v44  ;;  %2427 = vst.msk [vmem:[#allocation2 + $0x90] sm:$0xff] %vm476_vm0, %v4957_v44  ;;  %v5764_v6 = vld [vmem:[%s6594_s7] ss:$0 sm:$0xff]  ;;  %v2458_v9 = vld [vmem:[#allocation2 + $0x2] sm:$0xff] }
 0x864   : > { %2426 = vst.msk [vmem:[#allocation2 + $0x88] sm:$0x3] %vm2409_vm3, %v4957_v44  ;;  %2428 = vst.msk [vmem:[#allocation2 + $0x98] sm:$0x3] %vm2409_vm3, %v4957_v44  ;;  %v2475_v48 = vmul.f32 %v5764_v6, %v2438_v12  ;;  %v2515_v18 = vmul.f32 %v5779_v10, %v2458_v9 }
 0x866   : > { %4432 = vmatmul.mubr.msk.f32.gmra.mrb[62].mxu0 %vm1002_vm1, %v5603_v13  ;;  %v2448_v13 = vld [vmem:[#allocation2 + $0x1] sm:$0xff] }
 0x867   : > { %v2491_v2 = vmul.f32 %v5769_v63, %v2448_v13 }
 0x869   : > { %v2499_v17 = vadd.f32 %v2491_v2, %v2475_v48 }
 0x86b   : > { %v2523_v31 = vadd.f32 %v2515_v18, %v2499_v17 }
 0x92d   : > { %v4424_v55 = vpop.f32.mrb[56].mxu0 }
 0x92e   : > { %v2393_v38 = vadd.f32 %v4424_v55, %v3837_v54  ;;  %v2346_v0 = vpop.f32.mrb[57].mxu0 }
 0x92f   : > { %v2392_v58 = vadd.f32 %v3837_v54, %v2346_v0 }
 0x930   : > { %v2401_v60 = vadd.f32 %v4885_v1, %v2393_v38  ;;  %v5831_v38 = vld [vmem:[%s6594_s7 + $0x8] ss:$0 sm:$0xff] }
 0x931   : > { %v2400_v5 = vadd.f32 %v4886_v3, %v2392_v58  ;;  %v4427_v39 = vpop.f32.mrb[58].mxu0 }
 0x932   : > { %2431 = vst.msk [vmem:[#allocation2 + $0x21] sm:$0xff] %vm476_vm0, %v2401_v60  ;;  %v2395_v4 = vadd.f32 %v4427_v39, %v3837_v54  ;;  %v2356_v7 = vpop.f32.mrb[59].mxu0 }
 0x933   : > { %2430 = vst.msk [vmem:[#allocation2 + $0x11] sm:$0xff] %vm476_vm0, %v2400_v5  ;;  %v2394_v11 = vadd.f32 %v3837_v54, %v2356_v7 }
 0x934   : > { %v2403_v49 = vadd.f32 %v4887_v8, %v2395_v4 }
 0x935   : > { %v2402_v15 = vadd.f32 %v4888_v14, %v2394_v11  ;;  %v4430_v16 = vpop.f32.mrb[60].mxu0 }
 0x936   : > { %2433 = vst.msk [vmem:[#allocation2 + $0x41] sm:$0xff] %vm476_vm0, %v2403_v49  ;;  %v2397_v19 = vadd.f32 %v4430_v16, %v3837_v54  ;;  %v2366_v22 = vpop.f32.mrb[61].mxu0 }
 0x937   : > { %2432 = vst.msk [vmem:[#allocation2 + $0x31] sm:$0xff] %vm476_vm0, %v2402_v15  ;;  %v2396_v23 = vadd.f32 %v3837_v54, %v2366_v22 }
 0x938   : > { %v2405_v27 = vadd.f32 %v4889_v26, %v2397_v19 }
 0x939   : > { %v2404_v40 = vadd.f32 %v4890_v37, %v2396_v23  ;;  %v4433_v41 = vpop.f32.mrb[62].mxu0  ;;  %v2440_v42 = vld [vmem:[#allocation2 + $0x20] sm:$0xff] }
 0x93a   : > { %v2450_v25 = vld [vmem:[#allocation2 + $0x21] sm:$0xff]  ;;  %2435 = vst.msk [vmem:[#allocation2 + $0x61] sm:$0xff] %vm476_vm0, %v2405_v27  ;;  %v2399_v46 = vadd.f32 %v4433_v41, %v3837_v54  ;;  %v2376_v20 = vpop.f32.mrb[63].mxu0  ;;  %v2439_v30 = vld [vmem:[#allocation2 + $0x10] sm:$0xff]  ;;  %v2477_v33 = vmul.f32 %v5764_v6, %v2440_v42  ;;  %v2540_v55 = vmul.f32 %v5791_v36, %v2440_v42  ;;  %v2611_v4 = vmul.f32 %v5817_v29, %v2440_v42 }
 0x93b   : > { %v2460_v45 = vld [vmem:[#allocation2 + $0x22] sm:$0xff]  ;;  %v2449_v47 = vld [vmem:[#allocation2 + $0x11] sm:$0xff]  ;;  %v2493_v50 = vmul.f32 %v5769_v63, %v2450_v25  ;;  %2434 = vst.msk [vmem:[#allocation2 + $0x51] sm:$0xff] %vm476_vm0, %v2404_v40  ;;  %v2398_v32 = vadd.f32 %v3837_v54, %v2376_v20  ;;  %v2539_v51 = vmul.f32 %v5791_v36, %v2439_v30  ;;  %v2564_v12 = vmul.f32 %v5800_v24, %v2450_v25  ;;  %v5854_v20 = vld [vmem:[%s6595_s8] ss:$0 sm:$0xff] }
 0x93c   : > { %v2459_v34 = vld [vmem:[#allocation2 + $0x12] sm:$0xff]  ;;  %v2407_v21 = vadd.f32 %v4891_v53, %v2399_v46  ;;  %v2517_v56 = vmul.f32 %v5779_v10, %v2460_v45  ;;  %v2492_v61 = vmul.f32 %v5769_v63, %v2449_v47  ;;  %v2563_v52 = vmul.f32 %v5800_v24, %v2449_v47 }
 0x93d   : > { %v2501_v28 = vadd.f32 %v2493_v50, %v2477_v33  ;;  %v2406_v43 = vadd.f32 %v4892_v59, %v2398_v32  ;;  %v2547_v35 = vadd.f32 %v2539_v51, %v2523_v31  ;;  %v2516_v54 = vmul.f32 %v5779_v10, %v2459_v34  ;;  %v2442_v39 = vld [vmem:[#allocation2 + $0x40] sm:$0xff] }
 0x93e   : > { %2437 = vst.msk [vmem:[#allocation2 + $0x81] sm:$0xff] %vm476_vm0, %v2407_v21  ;;  %v2451_v0 = vld [vmem:[#allocation2 + $0x31] sm:$0xff]  ;;  %v2587_v60 = vmul.f32 %v5809_v57, %v2459_v34  ;;  %v2476_v3 = vmul.f32 %v5764_v6, %v2439_v30  ;;  %v2452_v48 = vld [vmem:[#allocation2 + $0x41] sm:$0xff]  ;;  %v2588_v2 = vmul.f32 %v5809_v57, %v2460_v45  ;;  %v2635_v7 = vmul.f32 %v5822_v62, %v2450_v25 }
 0x93f   : > { %v2461_v13 = vld [vmem:[#allocation2 + $0x32] sm:$0xff]  ;;  %2436 = vst.msk [vmem:[#allocation2 + $0x71] sm:$0xff] %vm476_vm0, %v2406_v43  ;;  %v2525_v58 = vadd.f32 %v2517_v56, %v2501_v28  ;;  %v2571_v1 = vadd.f32 %v2563_v52, %v2547_v35  ;;  %v2494_v9 = vmul.f32 %v5769_v63, %v2451_v0  ;;  %v2659_v8 = vmul.f32 %v5831_v38, %v2460_v45  ;;  %v2462_v27 = vld [vmem:[#allocation2 + $0x42] sm:$0xff] }
 0x940   : > { %v2441_v5 = vld [vmem:[#allocation2 + $0x30] sm:$0xff]  ;;  %v2500_v49 = vadd.f32 %v2492_v61, %v2476_v3  ;;  %v2518_v14 = vmul.f32 %v5779_v10, %v2461_v13  ;;  %v2479_v17 = vmul.f32 %v5764_v6, %v2442_v39  ;;  %v2495_v18 = vmul.f32 %v5769_v63, %v2452_v48 }
 0x941   : > { %v2595_v11 = vadd.f32 %v2587_v60, %v2571_v1  ;;  %v2478_v15 = vmul.f32 %v5764_v6, %v2441_v5  ;;  %v2541_v16 = vmul.f32 %v5791_v36, %v2441_v5  ;;  %v2565_v23 = vmul.f32 %v5800_v24, %v2451_v0 }
 0x942   : > { %v2524_v22 = vadd.f32 %v2516_v54, %v2500_v49  ;;  %v2589_v26 = vmul.f32 %v5809_v57, %v2461_v13  ;;  %v2612_v37 = vmul.f32 %v5817_v29, %v2441_v5  ;;  %v2503_v41 = vadd.f32 %v2495_v18, %v2479_v17  ;;  %v2453_v32 = vld [vmem:[#allocation2 + $0x51] sm:$0xff] }
 0x943   : > { %v2619_v19 = vadd.f32 %v2611_v4, %v2595_v11  ;;  %v2502_v40 = vadd.f32 %v2494_v9, %v2478_v15  ;;  %v2549_v42 = vadd.f32 %v2541_v16, %v2525_v58  ;;  %v2636_v31 = vmul.f32 %v5822_v62, %v2451_v0  ;;  %v2443_v28 = vld [vmem:[#allocation2 + $0x50] sm:$0xff]  ;;  %v2444_v0 = vld [vmem:[#allocation2 + $0x60] sm:$0xff] }
 0x944   : > { %v2548_v45 = vadd.f32 %v2540_v55, %v2524_v22  ;;  %v2660_v46 = vmul.f32 %v5831_v38, %v2461_v13  ;;  %v2519_v47 = vmul.f32 %v5779_v10, %v2462_v27  ;;  %v2542_v33 = vmul.f32 %v5791_v36, %v2442_v39  ;;  %v2463_v1 = vld [vmem:[#allocation2 + $0x52] sm:$0xff] }
 0x945   : > { %v2643_v25 = vadd.f32 %v2635_v7, %v2619_v19  ;;  %v2526_v30 = vadd.f32 %v2518_v14, %v2502_v40  ;;  %v2573_v50 = vadd.f32 %v2565_v23, %v2549_v42  ;;  %v2566_v53 = vmul.f32 %v5800_v24, %v2452_v48  ;;  %v2464_v19 = vld [vmem:[#allocation2 + $0x62] sm:$0xff] }
 0x946   : > { %v2572_v51 = vadd.f32 %v2564_v12, %v2548_v45  ;;  %v2590_v21 = vmul.f32 %v5809_v57, %v2462_v27  ;;  %v2527_v56 = vadd.f32 %v2519_v47, %v2503_v41  ;;  %v2613_v43 = vmul.f32 %v5817_v29, %v2442_v39  ;;  %v2454_v12 = vld [vmem:[#allocation2 + $0x61] sm:$0xff]  ;;  %v2455_v45 = vld [vmem:[#allocation2 + $0x71] sm:$0xff] }
 0x947   : > { %v2667_v34 = vadd.f32 %v2659_v8, %v2643_v25  ;;  %v2597_v59 = vadd.f32 %v2589_v26, %v2573_v50  ;;  %v2550_v61 = vadd.f32 %v2542_v33, %v2526_v30  ;;  %v2637_v54 = vmul.f32 %v5822_v62, %v2452_v48 }
 0x948   : > { %v2596_v52 = vadd.f32 %v2588_v2, %v2572_v51  ;;  %v2496_v55 = vmul.f32 %v5769_v63, %v2453_v32  ;;  %v2661_v58 = vmul.f32 %v5831_v38, %v2462_v27  ;;  %v2614_v3 = vmul.f32 %v5817_v29, %v2443_v28 }
 0x949   : > { %v5862_v35 = vadd.f32 %v5854_v20, %v2667_v34  ;;  %v2621_v13 = vadd.f32 %v2613_v43, %v2597_v59  ;;  %v2574_v60 = vadd.f32 %v2566_v53, %v2550_v61  ;;  %v2480_v4 = vmul.f32 %v5764_v6, %v2443_v28  ;;  %v2445_v34 = vld [vmem:[#allocation2 + $0x70] sm:$0xff] }
 0x94a   : > { %v2620_v39 = vadd.f32 %v2612_v37, %v2596_v52  ;;  %v2543_v2 = vmul.f32 %v5791_v36, %v2443_v28  ;;  %v2481_v9 = vmul.f32 %v5764_v6, %v2444_v0  ;;  %v2497_v11 = vmul.f32 %v5769_v63, %v2454_v12  ;;  %v2465_v52 = vld [vmem:[#allocation2 + $0x72] sm:$0xff] }
 0x94b   : > { %6631 = vst [vmem:[#allocation7_spill] sm:$0xff] %v5862_v35  ;;  %v2692_v5 = vsel %vm476_vm0, %v5862_v35, 0.0  ;;  %v2645_v48 = vadd.f32 %v2637_v54, %v2621_v13  ;;  %v2598_v7 = vadd.f32 %v2590_v21, %v2574_v60  ;;  %v2520_v49 = vmul.f32 %v5779_v10, %v2463_v1  ;;  %v2446_v60 = vld [vmem:[#allocation2 + $0x80] sm:$0xff] }
 0x94c   : > { %2693 = vadd.xlane.f32.xlu0 %v2692_v5  ;;  %v2644_v8 = vadd.f32 %v2636_v31, %v2620_v39  ;;  %v2567_v14 = vmul.f32 %v5800_v24, %v2453_v32  ;;  %v2504_v15 = vadd.f32 %v2496_v55, %v2480_v4  ;;  %v2638_v18 = vmul.f32 %v5822_v62, %v2453_v32 }
 0x94d   : > { %v2669_v16 = vadd.f32 %v2661_v58, %v2645_v48  ;;  %v2622_v17 = vadd.f32 %v2614_v3, %v2598_v7  ;;  %v2551_v22 = vadd.f32 %v2543_v2, %v2527_v56  ;;  %v2591_v26 = vmul.f32 %v5809_v57, %v2463_v1 }
 0x94e   : > { %v2668_v23 = vadd.f32 %v2660_v46, %v2644_v8  ;;  %v2662_v27 = vmul.f32 %v5831_v38, %v2463_v1  ;;  %v2528_v37 = vadd.f32 %v2520_v49, %v2504_v15  ;;  %v2505_v42 = vadd.f32 %v2497_v11, %v2481_v9 }
 0x94f   : > { %v5880_v40 = vadd.f32 %v5854_v20, %v2669_v16  ;;  %v2646_v41 = vadd.f32 %v2638_v18, %v2622_v17  ;;  %v2575_v25 = vadd.f32 %v2567_v14, %v2551_v22  ;;  %v2521_v30 = vmul.f32 %v5779_v10, %v2464_v19  ;;  %v2466_v14 = vld [vmem:[#allocation2 + $0x82] sm:$0xff]  ;;  %v2447_v16 = vld [vmem:[#allocation2 + $0x90] sm:$0xff] }
 0x950   : > { %v5883_v31 = vadd.f32 %v5854_v20, %v2668_v23  ;;  %v2544_v47 = vmul.f32 %v5791_v36, %v2444_v0  ;;  %v2615_v32 = vmul.f32 %v5817_v29, %v2444_v0  ;;  %v2568_v53 = vmul.f32 %v5800_v24, %v2454_v12 }
 0x951   : > { %6632 = vst [vmem:[#allocation8_spill] sm:$0xff] %v5880_v40  ;;  %v2698_v46 = vsel %vm476_vm0, %v5880_v40, 0.0  ;;  %v2670_v33 = vadd.f32 %v2662_v27, %v2646_v41  ;;  %v2599_v50 = vadd.f32 %v2591_v26, %v2575_v25  ;;  %v2498_v21 = vmul.f32 %v5769_v63, %v2455_v45  ;;  %v2457_v27 = vld [vmem:[#allocation2 + $0x91] sm:$0xff] }
 0x952   : > { %6633 = vst [vmem:[#allocation9_spill] sm:$0xff] %v5883_v31  ;;  %v2695_v51 = vsel %vm476_vm0, %v5883_v31, 0.0  ;;  %2699 = vadd.xlane.f32.xlu0 %v2698_v46  ;;  %v2552_v28 = vadd.f32 %v2544_v47, %v2528_v37  ;;  %v2529_v59 = vadd.f32 %v2521_v30, %v2505_v42  ;;  %v2639_v61 = vmul.f32 %v5822_v62, %v2454_v12  ;;  %v2467_v47 = vld [vmem:[#allocation2 + $0x92] sm:$0xff] }
 0x953   : > { %2696 = vadd.xlane.f32.xlu1 %v2695_v51  ;;  %v5895_v56 = vadd.f32 %v5854_v20, %v2670_v33  ;;  %v2623_v43 = vadd.f32 %v2615_v32, %v2599_v50  ;;  %v2592_v54 = vmul.f32 %v5809_v57, %v2464_v19  ;;  %v2482_v0 = vmul.f32 %v5764_v6, %v2445_v34  ;;  %v2456_v6 = vld [vmem:[#allocation2 + $0x81] sm:$0xff] }
 0x954   : > { %v2576_v55 = vadd.f32 %v2568_v53, %v2552_v28  ;;  %v2663_v63 = vmul.f32 %v5831_v38, %v2464_v19  ;;  %v2545_v1 = vmul.f32 %v5791_v36, %v2445_v34  ;;  %v2522_v3 = vmul.f32 %v5779_v10, %v2465_v52 }
 0x955   : > { %6634 = vst [vmem:[#allocation10_spill] sm:$0xff] %v5895_v56  ;;  %v2701_v13 = vsel %vm476_vm0, %v5895_v56, 0.0  ;;  %v2647_v58 = vadd.f32 %v2639_v61, %v2623_v43  ;;  %v2616_v12 = vmul.f32 %v5817_v29, %v2445_v34  ;;  %v2506_v39 = vadd.f32 %v2498_v21, %v2482_v0 }
 0x956   : > { %v2600_v5 = vadd.f32 %v2592_v54, %v2576_v55  ;;  %v2569_v2 = vmul.f32 %v5800_v24, %v2455_v45  ;;  %v2553_v48 = vadd.f32 %v2545_v1, %v2529_v59  ;;  %v2640_v9 = vmul.f32 %v5822_v62, %v2455_v45 }
 0x957   : > { %2702 = vadd.xlane.f32.xlu1 %v2701_v13  ;;  %v2671_v4 = vadd.f32 %v2663_v63, %v2647_v58  ;;  %v2530_v11 = vadd.f32 %v2522_v3, %v2506_v39  ;;  %v2546_v8 = vmul.f32 %v5791_v36, %v2446_v60  ;;  %v2593_v10 = vmul.f32 %v5809_v57, %v2465_v52 }
 0x958   : > { %v2624_v7 = vadd.f32 %v2616_v12, %v2600_v5  ;;  %v2577_v15 = vadd.f32 %v2569_v2, %v2553_v48  ;;  %v2664_v18 = vmul.f32 %v5831_v38, %v2465_v52  ;;  %v2570_v19 = vmul.f32 %v5800_v24, %v2456_v6 }
 0x959   : > { %v5910_v49 = vadd.f32 %v5854_v20, %v2671_v4  ;;  %v2554_v22 = vadd.f32 %v2546_v8, %v2530_v11  ;;  %v2617_v36 = vmul.f32 %v5817_v29, %v2446_v60  ;;  %v2594_v41 = vmul.f32 %v5809_v57, %v2466_v14 }
 0x95a   : > { %v2648_v17 = vadd.f32 %v2640_v9, %v2624_v7  ;;  %v2601_v26 = vadd.f32 %v2593_v10, %v2577_v15  ;;  %v2618_v25 = vmul.f32 %v5817_v29, %v2447_v16  ;;  %v2641_v30 = vmul.f32 %v5822_v62, %v2456_v6 }
 0x95b   : > { %6635 = vst [vmem:[#allocation11_spill] sm:$0xff] %v5910_v49  ;;  %v2704_v23 = vsel %vm476_vm0, %v5910_v49, 0.0  ;;  %v2578_v42 = vadd.f32 %v2570_v19, %v2554_v22  ;;  %v2642_v33 = vmul.f32 %v5822_v62, %v2457_v27  ;;  %v2665_v32 = vmul.f32 %v5831_v38, %v2466_v14 }
 0x95c   : > { %2705 = vadd.xlane.f32.xlu0 %v2704_v23  ;;  %v2672_v37 = vadd.f32 %v2664_v18, %v2648_v17  ;;  %v2625_v45 = vadd.f32 %v2617_v36, %v2601_v26  ;;  %v2666_v51 = vmul.f32 %v5831_v38, %v2467_v47  ;;  %v2820_v47 = vld [vmem:[%s6597_s10] sm:$0xff] }
 0x95d   : > { %v2602_v46 = vadd.f32 %v2594_v41, %v2578_v42 }
 0x95e   : > { %v5922_v24 = vadd.f32 %v5854_v20, %v2672_v37  ;;  %v2649_v50 = vadd.f32 %v2641_v30, %v2625_v45  ;;  %v2821_v45 = vld [vmem:[%s6597_s10 + $0x8] sm:$0xff]  ;;  %v2823_v30 = vld [vmem:[%s6597_s10 + $0x18] sm:$0xff] }
 0x95f   : > { %v2626_v57 = vadd.f32 %v2618_v25, %v2602_v46  ;;  %v4626_v46 = vpack.c.bf16 %v2823_v30, %v2821_v45 }
 0x960   : > { %6636 = vst [vmem:[#allocation12_spill] sm:$0xff] %v5922_v24  ;;  %v2707_v34 = vsel %vm476_vm0, %v5922_v24, 0.0  ;;  %v2673_v29 = vadd.f32 %v2665_v32, %v2649_v50  ;;  %v2825_v32 = vld [vmem:[%s6597_s10 + $0x28] sm:$0xff] }
 0x961   : > { %2708 = vadd.xlane.f32.xlu1 %v2707_v34  ;;  %v2650_v53 = vadd.f32 %v2642_v33, %v2626_v57  ;;  %v2822_v33 = vld [vmem:[%s6597_s10 + $0x10] sm:$0xff]  ;;  %v2827_v34 = vld [vmem:[%s6597_s10 + $0x38] sm:$0xff]  ;;  %v2824_v57 = vld [vmem:[%s6597_s10 + $0x20] sm:$0xff]  ;;  %4627 = vmatprep.subr.bf16.mxu1 %v4626_v46 }
 0x962   : > { %v5930_v21 = vadd.f32 %v5854_v20, %v2673_v29  ;;  %v4628_v50 = vpack.c.bf16 %v2822_v33, %v2820_v47  ;;  %v2826_v29 = vld [vmem:[%s6597_s10 + $0x30] sm:$0xff] }
 0x963   : > { %v2674_v28 = vadd.f32 %v2666_v51, %v2650_v53  ;;  %v4630_v51 = vpack.c.bf16 %v2827_v34, %v2825_v32  ;;  %v4632_v53 = vpack.c.bf16 %v2826_v29, %v2824_v57 }
 0x964   : > { %6637 = vst [vmem:[#allocation13_spill] sm:$0xff] %v5930_v21  ;;  %v2710_v59 = vsel %vm476_vm0, %v5930_v21, 0.0  ;;  %4629 = vmatpush1.bf16.msra.mxu1 %v4628_v50 }
 0x965   : > { %2711 = vadd.xlane.f32.xlu0 %v2710_v59  ;;  %v5935_v62 = vadd.f32 %v5854_v20, %v2674_v28  ;;  %4631 = vmatprep.subr.bf16.mxu1 %v4630_v51  ;;  %v2829_v28 = vld [vmem:[%s6597_s10 + $0x48] sm:$0xff]  ;;  %v2831_v59 = vld [vmem:[%s6597_s10 + $0x58] sm:$0xff] }
 0x967   : > { %6638 = vst [vmem:[#allocation14_spill] sm:$0xff] %v5935_v62  ;;  %v2713_v43 = vsel %vm476_vm0, %v5935_v62, 0.0 }
 0x968   : > { %2714 = vadd.xlane.f32.xlu1 %v2713_v43  ;;  %4633 = vmatpush1.bf16.msra.mxu1 %v4632_v53  ;;  %v4634_v43 = vpack.c.bf16 %v2831_v59, %v2829_v28 }
 0x96a   : > { %4635 = vmatprep.subr.bf16.mxu1 %v4634_v43 }
 0x9d9   : > { %v2694_v61 = vpop.xlane.xlu0 %2693 }
 0x9da   : > { %v2716_v38 = vmul.f32 0.015625, %v2694_v61  ;;  %v2828_v61 = vld [vmem:[%s6597_s10 + $0x40] sm:$0xff] }
 0x9dc   : > { %v5940_v52 = vsub.f32 %v5862_v35, %v2716_v38  ;;  %v2830_v38 = vld [vmem:[%s6597_s10 + $0x50] sm:$0xff] }
 0x9de   : > { %v2732_v54 = vmul.f32 %v5940_v52, %v5940_v52 }
 0x9df   : > { %v2700_v55 = vpop.xlane.xlu0 %2699 }
 0x9e0   : > { %v2740_v0 = vsel %vm476_vm0, %v2732_v54, 0.0  ;;  %v2697_v13 = vpop.xlane.xlu1 %2696  ;;  %v2718_v58 = vmul.f32 0.015625, %v2700_v55  ;;  %v4636_v54 = vpack.c.bf16 %v2830_v38, %v2828_v61  ;;  %v2833_v55 = vld [vmem:[%s6597_s10 + $0x68] sm:$0xff] }
 0x9e1   : > { %2741 = vadd.xlane.f32.xlu0 %v2740_v0  ;;  %v2717_v20 = vmul.f32 0.015625, %v2697_v13  ;;  %v2835_v0 = vld [vmem:[%s6597_s10 + $0x78] sm:$0xff] }
 0x9e2   : > { %v5946_v63 = vsub.f32 %v5880_v40, %v2718_v58  ;;  %4637 = vmatpush1.bf16.msra.mxu1 %v4636_v54  ;;  %v4638_v13 = vpack.c.bf16 %v2835_v0, %v2833_v55  ;;  %v2832_v58 = vld [vmem:[%s6597_s10 + $0x60] sm:$0xff] }
 0x9e3   : > { %v5949_v1 = vsub.f32 %v5883_v31, %v2717_v20  ;;  %v2834_v20 = vld [vmem:[%s6597_s10 + $0x70] sm:$0xff] }
 0x9e4   : > { %v2703_v60 = vpop.xlane.xlu1 %2702  ;;  %v2734_v3 = vmul.f32 %v5946_v63, %v5946_v63  ;;  %4639 = vmatprep.subr.bf16.mxu1 %v4638_v13 }
 0x9e5   : > { %v2719_v5 = vmul.f32 0.015625, %v2703_v60  ;;  %v2733_v12 = vmul.f32 %v5949_v1, %v5949_v1  ;;  %v4640_v60 = vpack.c.bf16 %v2834_v20, %v2832_v58 }
 0x9e6   : > { %v2746_v39 = vsel %vm476_vm0, %v2734_v3, 0.0 }
 0x9e7   : > { %v5957_v4 = vsub.f32 %v5895_v56, %v2719_v5  ;;  %2747 = vadd.xlane.f32.xlu0 %v2746_v39  ;;  %v2743_v2 = vsel %vm476_vm0, %v2733_v12, 0.0  ;;  %4641 = vmatpush1.bf16.msra.mxu1 %v4640_v60 }
 0x9e8   : > { %2744 = vadd.xlane.f32.xlu1 %v2743_v2 }
 0x9e9   : > { %v2706_v6 = vpop.xlane.xlu0 %2705  ;;  %v2735_v48 = vmul.f32 %v5957_v4, %v5957_v4 }
 0x9ea   : > { %v2720_v7 = vmul.f32 0.015625, %v2706_v6 }
 0x9eb   : > { %v2749_v9 = vsel %vm476_vm0, %v2735_v48, 0.0 }
 0x9ec   : > { %v5964_v11 = vsub.f32 %v5910_v49, %v2720_v7  ;;  %2750 = vadd.xlane.f32.xlu1 %v2749_v9 }
 0x9ee   : > { %v2709_v8 = vpop.xlane.xlu1 %2708  ;;  %v2736_v10 = vmul.f32 %v5964_v11, %v5964_v11 }
 0x9ef   : > { %v2721_v14 = vmul.f32 0.015625, %v2709_v8 }
 0x9f0   : > { %v2752_v15 = vsel %vm476_vm0, %v2736_v10, 0.0 }
 0x9f1   : > { %v5970_v16 = vsub.f32 %v5922_v24, %v2721_v14  ;;  %2753 = vadd.xlane.f32.xlu0 %v2752_v15  ;;  %v3856_v15 = vld [vmem:[%s6596_s9] ss:$0 sm:$0xff] }
 0x9f2   : > { %v2712_v17 = vpop.xlane.xlu0 %2711 }
 0x9f3   : > { %v2737_v18 = vmul.f32 %v5970_v16, %v5970_v16  ;;  %v2722_v19 = vmul.f32 0.015625, %v2712_v17 }
 0x9f5   : > { %v2755_v22 = vsel %vm476_vm0, %v2737_v18, 0.0  ;;  %v5976_v23 = vsub.f32 %v5930_v21, %v2722_v19  ;;  %v2715_v26 = vpop.xlane.xlu1 %2714  ;;  %v3857_v19 = vld [vmem:[%s6596_s9 + $0x1] ss:$0 sm:$0xff] }
 0x9f6   : > { %2756 = vadd.xlane.f32.xlu1 %v2755_v22  ;;  %v2723_v36 = vmul.f32 0.015625, %v2715_v26 }
 0x9f7   : > { %v2738_v27 = vmul.f32 %v5976_v23, %v5976_v23 }
 0x9f8   : > { %v5981_v37 = vsub.f32 %v5935_v62, %v2723_v36 }
 0x9f9   : > { %v2758_v41 = vsel %vm476_vm0, %v2738_v27, 0.0 }
 0x9fa   : > { %2759 = vadd.xlane.f32.xlu0 %v2758_v41  ;;  %v2739_v42 = vmul.f32 %v5981_v37, %v5981_v37 }
 0x9fc   : > { %v2761_v25 = vsel %vm476_vm0, %v2739_v42, 0.0 }
 0x9fd   : > { %2762 = vadd.xlane.f32.xlu1 %v2761_v25 }
 0xa6e   : > { %v2742_v3 = vpop.xlane.xlu0 %2741 }
 0xa6f   : > { %v2764_v5 = vmul.f32 0.015625, %v2742_v3 }
 0xa71   : > { %v2772_v12 = vadd.f32 1e-05, %v2764_v5 }
 0xa73   : > { %4805 = vrsqrt.f32 %v2772_v12 }
 0xa74   : > { %v2748_v39 = vpop.xlane.xlu0 %2747 }
 0xa75   : > { %v2766_v2 = vmul.f32 0.015625, %v2748_v39  ;;  %v2745_v6 = vpop.xlane.xlu1 %2744 }
 0xa76   : > { %v2765_v48 = vmul.f32 0.015625, %v2745_v6  ;;  %v3434_v6 = vld [vmem:[%s6599_s12 + $0x88] sm:$0xff] }
 0xa77   : > { %v2774_v7 = vadd.f32 1e-05, %v2766_v2 }
 0xa78   : > { %v2773_v9 = vadd.f32 1e-05, %v2765_v48  ;;  %v3417_v48 = vld [vmem:[%s6599_s12] sm:$0xff] }
 0xa79   : > { %4807 = vrsqrt.f32 %v2774_v7  ;;  %v2751_v8 = vpop.xlane.xlu1 %2750 }
 0xa7a   : > { %4809 = vrsqrt.f32 %v2773_v9  ;;  %v2767_v10 = vmul.f32 0.015625, %v2751_v8  ;;  %v3435_v9 = vld [vmem:[%s6599_s12 + $0x90] sm:$0xff]  ;;  %v3436_v8 = vld [vmem:[%s6599_s12 + $0x98] sm:$0xff] }
 0xa7c   : > { %v2775_v17 = vadd.f32 1e-05, %v2767_v10  ;;  %v4646_v10 = vpack.c.bf16 %v3436_v8, %v3435_v9 }
 0xa7d   : > { %v4806_v14 = vpop.eup %4805 }
 0xa7e   : > { %v2788_v18 = vmul.f32 %v4806_v14, %v5940_v52  ;;  %v2754_v22 = vpop.xlane.xlu0 %2753  ;;  %4811 = vrsqrt.f32 %v2775_v17  ;;  %v3419_v14 = vld [vmem:[%s6599_s12 + $0x10] sm:$0xff] }
 0xa7f   : > { %v2768_v36 = vmul.f32 0.015625, %v2754_v22 }
 0xa80   : > { %v2800_v26 = vmul.f32 %v3856_v15, %v2788_v18  ;;  %v3437_v18 = vld [vmem:[%s6599_s12 + $0xa0] sm:$0xff] }
 0xa81   : > { %v2776_v41 = vadd.f32 1e-05, %v2768_v36  ;;  %v3422_v36 = vld [vmem:[%s6599_s12 + $0x28] sm:$0xff] }
 0xa82   : > { %v2812_v27 = vadd.f32 %v3857_v19, %v2800_v26  ;;  %v3421_v26 = vld [vmem:[%s6599_s12 + $0x20] sm:$0xff] }
 0xa83   : > { %v4808_v42 = vpop.eup %4807  ;;  %4813 = vrsqrt.f32 %v2776_v41  ;;  %v2757_v25 = vpop.xlane.xlu1 %2756  ;;  %v3439_v41 = vld [vmem:[%s6599_s12 + $0xb0] sm:$0xff] }
 0xa84   : > { %3858 = vmatmul.mubr.msk.f32.vlgmr.msra.gmra.mrb[24].mxu1 %vm476_vm0, %v2812_v27  ;;  %v4810_v45 = vpop.eup %4809  ;;  %v2769_v30 = vmul.f32 0.015625, %v2757_v25  ;;  %v2790_v47 = vmul.f32 %v4808_v42, %v5946_v63  ;;  %v4652_v27 = vpack.c.bf16 %v3422_v36, %v3421_v26  ;;  %v3440_v42 = vld [vmem:[%s6599_s12 + $0xb8] sm:$0xff] }
 0xa85   : > { %2942 = vmatprep.mubr.f32.mxu1 %v4957_v44  ;;  %v2789_v52 = vmul.f32 %v4810_v45, %v5949_v1  ;;  %v4654_v25 = vpack.c.bf16 %v3440_v42, %v3439_v41  ;;  %v3423_v45 = vld [vmem:[%s6599_s12 + $0x30] sm:$0xff] }
 0xa86   : > { %v2777_v46 = vadd.f32 1e-05, %v2769_v30  ;;  %v2802_v51 = vmul.f32 %v3856_v15, %v2790_v47  ;;  %v3424_v30 = vld [vmem:[%s6599_s12 + $0x38] sm:$0xff]  ;;  %v3441_v47 = vld [vmem:[%s6599_s12 + $0xc0] sm:$0xff] }
 0xa87   : > { %v2801_v33 = vmul.f32 %v3856_v15, %v2789_v52  ;;  %v2760_v32 = vpop.xlane.xlu0 %2759  ;;  %v4656_v52 = vpack.c.bf16 %v3424_v30, %v3423_v45 }
 0xa88   : > { %v4812_v50 = vpop.eup %4811  ;;  %4815 = vrsqrt.f32 %v2777_v46  ;;  %v2770_v34 = vmul.f32 0.015625, %v2760_v32  ;;  %v2814_v63 = vadd.f32 %v3857_v19, %v2802_v51  ;;  %v3442_v46 = vld [vmem:[%s6599_s12 + $0xc8] sm:$0xff]  ;;  %v3444_v51 = vld [vmem:[%s6599_s12 + $0xd8] sm:$0xff] }
 0xa89   : > { %v2813_v57 = vadd.f32 %v3857_v19, %v2801_v33  ;;  %v2791_v29 = vmul.f32 %v4812_v50, %v5957_v4  ;;  %v4658_v33 = vpack.c.bf16 %v3442_v46, %v3441_v47  ;;  %v3425_v50 = vld [vmem:[%s6599_s12 + $0x40] sm:$0xff]  ;;  %v3426_v32 = vld [vmem:[%s6599_s12 + $0x48] sm:$0xff] }
 0xa8a   : > { %v2778_v53 = vadd.f32 1e-05, %v2770_v34  ;;  %v2763_v28 = vpop.xlane.xlu1 %2762  ;;  %v4660_v34 = vpack.c.bf16 %v3426_v32, %v3425_v50  ;;  %v6605_v32 = vmov -1.0  }
 0xa8b   : > { %3859 = vmatmul.mubr.msk.f32.gmra.mrb[26].mxu1 %vm476_vm0, %v2813_v57  ;;  %v2771_v59 = vmul.f32 0.015625, %v2763_v28  ;;  %v2803_v43 = vmul.f32 %v3856_v15, %v2791_v29  ;;  %v3443_v57 = vld [vmem:[%s6599_s12 + $0xd0] sm:$0xff]  ;;  %v3428_v28 = vld [vmem:[%s6599_s12 + $0x58] sm:$0xff] }
 0xa8c   : > { %2948 = vmatprep.mubr.f32.mxu1 %v4957_v44  ;;  %4817 = vrsqrt.f32 %v2778_v53  ;;  %v4662_v29 = vpack.c.bf16 %v3444_v51, %v3443_v57  ;;  %v3427_v53 = vld [vmem:[%s6599_s12 + $0x50] sm:$0xff] }
 0xa8d   : > { %v4814_v1 = vpop.eup %4813  ;;  %v2779_v61 = vadd.f32 1e-05, %v2771_v59  ;;  %v2815_v4 = vadd.f32 %v3857_v19, %v2803_v43  ;;  %v4664_v59 = vpack.c.bf16 %v3428_v28, %v3427_v53 }
 0xa8e   : > { %v2792_v38 = vmul.f32 %v4814_v1, %v5964_v11  ;;  %v3445_v1 = vld [vmem:[%s6599_s12 + $0xe0] sm:$0xff] }
 0xa8f   : > { %3860 = vmatmul.mubr.msk.f32.gmra.mrb[28].mxu1 %vm476_vm0, %v2814_v63  ;;  %4819 = vrsqrt.f32 %v2779_v61  ;;  %v3446_v63 = vld [vmem:[%s6599_s12 + $0xe8] sm:$0xff]  ;;  %v3429_v61 = vld [vmem:[%s6599_s12 + $0x60] sm:$0xff] }
 0xa90   : > { %2954 = vmatprep.mubr.f32.mxu1 %v4957_v44  ;;  %v2804_v54 = vmul.f32 %v3856_v15, %v2792_v38  ;;  %v4666_v43 = vpack.c.bf16 %v3446_v63, %v3445_v1  ;;  %v3430_v38 = vld [vmem:[%s6599_s12 + $0x68] sm:$0xff] }
 0xa92   : > { %v4816_v55 = vpop.eup %4815  ;;  %v2816_v13 = vadd.f32 %v3857_v19, %v2804_v54  ;;  %v4668_v54 = vpack.c.bf16 %v3430_v38, %v3429_v61 }
 0xa93   : > { %3861 = vmatmul.mubr.msk.f32.gmra.mrb[30].mxu1 %vm476_vm0, %v2815_v4  ;;  %v2793_v0 = vmul.f32 %v4816_v55, %v5970_v16  ;;  %v3447_v4 = vld [vmem:[%s6599_s12 + $0xf0] sm:$0xff]  ;;  %v3448_v55 = vld [vmem:[%s6599_s12 + $0xf8] sm:$0xff] }
 0xa94   : > { %2960 = vmatprep.mubr.f32.mxu1 %v4957_v44 }
 0xa95   : > { %v2805_v58 = vmul.f32 %v3856_v15, %v2793_v0  ;;  %v3431_v0 = vld [vmem:[%s6599_s12 + $0x70] sm:$0xff] }
 0xa96   : > { %v4818_v20 = vpop.eup %4817 }
 0xa97   : > { %3862 = vmatmul.mubr.msk.f32.gmra.mrb[32].mxu1 %vm476_vm0, %v2816_v13  ;;  %v2794_v11 = vmul.f32 %v4818_v20, %v5976_v23  ;;  %v2817_v60 = vadd.f32 %v3857_v19, %v2805_v58  ;;  %v3433_v23 = vld [vmem:[%s6599_s12 + $0x80] sm:$0xff]  ;;  %v3432_v13 = vld [vmem:[%s6599_s12 + $0x78] sm:$0xff]  ;;  %v4670_v58 = vpack.c.bf16 %v3448_v55, %v3447_v4 }
 0xa98   : > { %2966 = vmatprep.mubr.f32.mxu1 %v4957_v44  ;;  %v4672_v20 = vpack.c.bf16 %v3432_v13, %v3431_v0 }
 0xa99   : > { %v4820_v3 = vpop.eup %4819  ;;  %v2806_v5 = vmul.f32 %v3856_v15, %v2794_v11  ;;  %v2838_v11 = vlaneseq }
 0xa9a   : > { %v2795_v12 = vmul.f32 %v4820_v3, %v5981_v37  ;;  %v4642_v37 = vpack.c.bf16 %v3434_v6, %v3433_v23 }
 0xa9b   : > { %3863 = vmatmul.mubr.msk.f32.gmra.mrb[34].mxu1 %vm476_vm0, %v2817_v60  ;;  %v2818_v16 = vadd.f32 %v3857_v19, %v2806_v5  ;;  %v2839_v60 = vshrl.u32 %v2838_v11, 7  ;;  %v2836_v5 = vld [vmem:[%s6598_s11] sm:$0x3] }
 0xa9c   : > { %2972 = vmatprep.mubr.f32.mxu1 %v4957_v44  ;;  %v2807_v39 = vmul.f32 %v3856_v15, %v2795_v12  ;;  %4643 = vmatprep.subr.bf16.mxu1 %v4642_v37  ;;  %v3420_v15 = vld [vmem:[%s6599_s12 + $0x18] sm:$0xff] }
 0xa9d   : > { %v4648_v17 = vpack.c.bf16 %v3420_v15, %v3419_v14  ;;  %v2840_v3 = vsub.s32 0, %v2839_v60  ;;  %v2844_v12 = vsub.s32 1, %v2839_v60 }
 0xa9e   : > { %v2819_v2 = vadd.f32 %v3857_v19, %v2807_v39  ;;  %v3438_v19 = vld [vmem:[%s6599_s12 + $0xa8] sm:$0xff] }
 0xa9f   : > { %3864 = vmatmul.mubr.msk.f32.gmra.mrb[36].mxu1 %vm476_vm0, %v2818_v16  ;;  %v4650_v22 = vpack.c.bf16 %v3438_v19, %v3437_v18  ;;  %v6163_v16 = vrot.slane %v2836_v5, %v2840_v3  ;;  %v6165_v39 = vrot.slane %v2836_v5, %v2844_v12 }
 0xaa0   : > { %2978 = vmatprep.mubr.f32.mxu1 %v4957_v44  ;;  %v3418_v44 = vld [vmem:[%s6599_s12 + $0x8] sm:$0xff] }
 0xaa1   : > { %v4644_v7 = vpack.c.bf16 %v3418_v44, %v3417_v48 }
 0xaa3   : > { %3865 = vmatmul.mubr.msk.f32.gmra.mrb[38].mxu1 %vm476_vm0, %v2819_v2 }
 0xaa4   : > { %4645 = vmatpush3.bf16.msra.mxu1 %v4644_v7 }
 0xaa5   : > { %4647 = vmatprep.subr.bf16.mxu1 %v4646_v10 }
 0xaa8   : > { %4649 = vmatpush3.bf16.msra.mxu1 %v4648_v17 }
 0xaa9   : > { %4651 = vmatprep.subr.bf16.mxu1 %v4650_v22 }
 0xaac   : > { %4653 = vmatpush3.bf16.msra.mxu1 %v4652_v27 }
 0xaad   : > { %4655 = vmatprep.subr.bf16.mxu1 %v4654_v25 }
 0xab0   : > { %4657 = vmatpush3.bf16.msra.mxu1 %v4656_v52 }
 0xab1   : > { %4659 = vmatprep.subr.bf16.mxu1 %v4658_v33 }
 0xab4   : > { %4661 = vmatpush3.bf16.msra.mxu1 %v4660_v34 }
 0xab5   : > { %4663 = vmatprep.subr.bf16.mxu1 %v4662_v29 }
 0xab8   : > { %4665 = vmatpush3.bf16.msra.mxu1 %v4664_v59 }
 0xab9   : > { %4667 = vmatprep.subr.bf16.mxu1 %v4666_v43 }
 0xabc   : > { %4669 = vmatpush3.bf16.msra.mxu1 %v4668_v54 }
 0xabd   : > { %4671 = vmatprep.subr.bf16.mxu1 %v4670_v58 }
 0xac0   : > { %4673 = vmatpush3.bf16.msra.mxu1 %v4672_v20 }
 0xb57   : > { %v2938_v2 = vpop.f32.mrb[24].mxu1 }
 0xb58   : > { %v2939_v23 = vadd.f32 %v2938_v2, %v6163_v16  ;;  %v2940_v6 = vpop.f32.mrb[25].mxu1 }
 0xb59   : > { %v2941_v37 = vadd.f32 %v2940_v6, %v6165_v39 }
 0xb5a   : > { %v3001_v48 = vmul.f32 0.70710677, %v2939_v23  ;;  %v6172_v33 = vmul.f32 0.5, %v2939_v23 }
 0xb5b   : > { %v3002_v44 = vmul.f32 0.70710677, %v2941_v37  ;;  %v6177_v57 = vmul.f32 0.5, %v2941_v37 }
 0xb5c   : > { %v3049_v7 = vand.u32 2147483647, %v3001_v48  ;;  %vm3017_vm4 = vcmp.ge.f32.partialorder %v3001_v48, 0.0 }
 0xb5d   : > { %v3050_v9 = vand.u32 2147483647, %v3002_v44  ;;  %v6175_v34 = vsel %vm3017_vm4, 1.0, %v6605_v32  ;;  %vm3018_vm5 = vcmp.ge.f32.partialorder %v3002_v44, 0.0 }
 0xb5e   : > { %v3065_v8 = vmul.f32 0.3275911, %v3049_v7  ;;  %v3273_v10 = vsub.f32 0.0, %v3049_v7  ;;  %v2944_v14 = vpop.f32.mrb[26].mxu1  ;;  %v6184_v4 = vsel %vm3018_vm5, 1.0, %v6605_v32 }
 0xb5f   : > { %v2945_v17 = vadd.f32 %v2944_v14, %v6163_v16  ;;  %v2946_v18 = vpop.f32.mrb[27].mxu1  ;;  %v3066_v19 = vmul.f32 0.3275911, %v3050_v9  ;;  %v3274_v22 = vsub.f32 0.0, %v3050_v9 }
 0xb60   : > { %v3081_v15 = vadd.f32 1.0, %v3065_v8  ;;  %v2947_v26 = vadd.f32 %v2946_v18, %v6165_v39  ;;  %v3289_v36 = vmul.f32 %v3273_v10, %v3049_v7 }
 0xb61   : > { %v3003_v27 = vmul.f32 0.70710677, %v2945_v17  ;;  %v3082_v52 = vadd.f32 1.0, %v3066_v19  ;;  %v3290_v47 = vmul.f32 %v3274_v22, %v3050_v9  ;;  %v6186_v54 = vmul.f32 0.5, %v2945_v17 }
 0xb62   : > { %4821 = vrcp.f32 %v3081_v15  ;;  %v3004_v41 = vmul.f32 0.70710677, %v2947_v26  ;;  %v2950_v42 = vpop.f32.mrb[28].mxu1  ;;  %v3305_v50 = vmul.f32 1.442695, %v3289_v36  ;;  %v6188_v55 = vmul.f32 0.5, %v2947_v26 }
 0xb63   : > { %v3051_v25 = vand.u32 2147483647, %v3003_v27  ;;  %v2951_v45 = vadd.f32 %v2950_v42, %v6163_v16  ;;  %v2952_v30 = vpop.f32.mrb[29].mxu1  ;;  %4823 = vrcp.f32 %v3082_v52  ;;  %v3307_v43 = vmul.f32 1.442695, %v3290_v47 }
 0xb64   : > { %v3052_v46 = vand.u32 2147483647, %v3004_v41  ;;  %v2953_v59 = vadd.f32 %v2952_v30, %v6165_v39  ;;  %4825 = vpow2.f32 %v3305_v50  ;;  %vm3019_vm6 = vcmp.ge.f32.partialorder %v3003_v27, 0.0 }
 0xb65   : > { %v3005_v51 = vmul.f32 0.70710677, %v2951_v45  ;;  %v3067_v53 = vmul.f32 0.3275911, %v3051_v25  ;;  %v3275_v28 = vsub.f32 0.0, %v3051_v25  ;;  %vm3020_vm7 = vcmp.ge.f32.partialorder %v3004_v41, 0.0 }
 0xb66   : > { %v2956_v29 = vpop.f32.mrb[30].mxu1  ;;  %v3276_v61 = vsub.f32 0.0, %v3052_v46  ;;  %v3068_v0 = vmul.f32 0.3275911, %v3052_v46  ;;  %v3006_v3 = vmul.f32 0.70710677, %v2953_v59  ;;  %4827 = vpow2.f32 %v3307_v43 }
 0xb67   : > { %v6181_v1 = vadd.f32 %v2956_v29, %v6163_v16  ;;  %v2958_v63 = vpop.f32.mrb[31].mxu1  ;;  %v3053_v38 = vand.u32 2147483647, %v3005_v51  ;;  %v3083_v11 = vadd.f32 1.0, %v3067_v53  ;;  %v3291_v60 = vmul.f32 %v3275_v28, %v3051_v25 }
 0xb68   : > { %v3292_v23 = vmul.f32 %v3276_v61, %v3052_v46  ;;  %vm3021_vm8 = vcmp.ge.f32.partialorder %v3005_v51, 0.0  ;;  %v6195_v6 = vsel %vm3019_vm6, 1.0, %v6605_v32  ;;  %v3054_v44 = vand.u32 2147483647, %v3006_v3 }
 0xb69   : > { %v3277_v13 = vsub.f32 0.0, %v3053_v38  ;;  %v3007_v5 = vmul.f32 0.70710677, %v6181_v1  ;;  %v3069_v37 = vmul.f32 0.3275911, %v3053_v38  ;;  %v6199_v9 = vsel %vm3020_vm7, 1.0, %v6605_v32 }
 0xb6a   : > { %v2962_v58 = vpop.f32.mrb[32].mxu1  ;;  %v3084_v8 = vadd.f32 1.0, %v3068_v0  ;;  %v6201_v10 = vmul.f32 0.5, %v2951_v45  ;;  %4829 = vrcp.f32 %v3083_v11  ;;  %v3309_v15 = vmul.f32 1.442695, %v3291_v60 }
 0xb6b   : > { %v2964_v12 = vpop.f32.mrb[33].mxu1  ;;  %v3293_v48 = vmul.f32 %v3277_v13, %v3053_v38  ;;  %v6204_v17 = vsel %vm3021_vm8, 1.0, %v6605_v32  ;;  %v3055_v18 = vand.u32 2147483647, %v3007_v5  ;;  %v3311_v22 = vmul.f32 1.442695, %v3292_v23 }
 0xb6c   : > { %v6190_v20 = vpop.eup %4821  ;;  %v6207_v26 = vmul.f32 0.5, %v2953_v59  ;;  %v2959_v36 = vadd.f32 %v2958_v63, %v6165_v39  ;;  %v3085_v41 = vadd.f32 1.0, %v3069_v37  ;;  %v3070_v25 = vmul.f32 0.3275911, %v3054_v44 }
 0xb6d   : > { %v3129_v2 = vmul.f32 1.0614054, %v6190_v20  ;;  %v3313_v42 = vmul.f32 1.442695, %v3293_v48  ;;  %v2963_v45 = vadd.f32 %v2962_v58, %v6163_v16  ;;  %v6211_v30 = vpop.eup %4823  ;;  %4831 = vrcp.f32 %v3084_v8 }
 0xb6e   : > { %v2968_v14 = vpop.f32.mrb[34].mxu1  ;;  %v3278_v47 = vsub.f32 0.0, %v3054_v44  ;;  %v3008_v46 = vmul.f32 0.70710677, %v2959_v36  ;;  %v4826_v51 = vpop.eup %4825  ;;  %4833 = vpow2.f32 %v3309_v15  ;;  %vm3022_vm9 = vcmp.ge.f32.partialorder %v3006_v3, 0.0 }
 0xb6f   : > { %v3145_v7 = vadd.f32 -1.4531521, %v3129_v2  ;;  %v2970_v27 = vpop.f32.mrb[35].mxu1  ;;  %v3071_v29 = vmul.f32 0.3275911, %v3055_v18  ;;  %4835 = vpow2.f32 %v3311_v22  ;;  %vm3023_vm10 = vcmp.ge.f32.partialorder %v3007_v5, 0.0 }
 0xb70   : > { %v3009_v53 = vmul.f32 0.70710677, %v2963_v45  ;;  %v3279_v63 = vsub.f32 0.0, %v3055_v18  ;;  %4837 = vrcp.f32 %v3085_v41  ;;  %v3086_v43 = vadd.f32 1.0, %v3070_v25  ;;  %v6221_v0 = vpop.eup %4827 }
 0xb71   : > { %v3161_v19 = vmul.f32 %v6190_v20, %v3145_v7  ;;  %v6219_v61 = vmul.f32 0.5, %v6181_v1  ;;  %v3056_v38 = vand.u32 2147483647, %v3008_v46  ;;  %v6224_v58 = vsel %vm3022_vm9, 1.0, %v6605_v32 }
 0xb72   : > { %v6213_v50 = vpop.f32.mrb[36].mxu1  ;;  %v3294_v11 = vmul.f32 %v3278_v47, %v3054_v44  ;;  %v3057_v60 = vand.u32 2147483647, %v3009_v53  ;;  %4839 = vpow2.f32 %v3313_v42  ;;  %v6229_v5 = vsel %vm3023_vm10, 1.0, %v6605_v32 }
 0xb73   : > { %v3177_v52 = vadd.f32 1.4214138, %v3161_v19  ;;  %v6215_v28 = vpop.f32.mrb[37].mxu1  ;;  %v3087_v2 = vadd.f32 1.0, %v3071_v29  ;;  %v2965_v23 = vadd.f32 %v2964_v12, %v6165_v39  ;;  %v3295_v48 = vmul.f32 %v3279_v63, %v3055_v18 }
 0xb74   : > { %v6235_v7 = vmul.f32 0.5, %v2959_v36  ;;  %v3280_v8 = vsub.f32 0.0, %v3056_v38  ;;  %v6237_v15 = vpop.eup %4829  ;;  %4841 = vrcp.f32 %v3086_v43  ;;  %v3281_v44 = vsub.f32 0.0, %v3057_v60 }
 0xb75   : > { %v3193_v59 = vmul.f32 %v6190_v20, %v3177_v52  ;;  %v3010_v19 = vmul.f32 0.70710677, %v2965_v23  ;;  %v6240_v22 = vadd.f32 %v2968_v14, %v6163_v16  ;;  %v3315_v42 = vmul.f32 1.442695, %v3294_v11 }
 0xb76   : > { %v6226_v3 = vpop.f32.mrb[38].mxu1  ;;  %v3072_v25 = vmul.f32 0.3275911, %v3056_v38  ;;  %v2971_v12 = vadd.f32 %v2970_v27, %v6165_v39  ;;  %vm3024_vm11 = vcmp.ge.f32.partialorder %v3008_v46, 0.0  ;;  %v6243_v52 = vmul.f32 0.5, %v2963_v45 }
 0xb77   : > { %v3209_v13 = vadd.f32 -0.28449672, %v3193_v59  ;;  %v6232_v1 = vpop.f32.mrb[39].mxu1  ;;  %6639 = vst [vmem:[#allocation15_spill] sm:$0xff] %v6240_v22  ;;  %v3073_v18 = vmul.f32 0.3275911, %v3057_v60  ;;  %v6245_v47 = vpop.eup %4831  ;;  %4843 = vrcp.f32 %v3087_v2  ;;  %v3296_v63 = vmul.f32 %v3280_v8, %v3056_v38 }
 0xb78   : > { %6640 = vst [vmem:[#allocation16_spill] sm:$0xff] %v6243_v52  ;;  %v3058_v36 = vand.u32 2147483647, %v3010_v19  ;;  %v3317_v59 = vmul.f32 1.442695, %v3295_v48  ;;  %v6248_v43 = vpop.eup %4833  ;;  %vm3025_vm12 = vcmp.ge.f32.partialorder %v3009_v53, 0.0  ;;  %v3297_v14 = vmul.f32 %v3281_v44, %v3057_v60 }
 0xb79   : > { %v3225_v37 = vmul.f32 %v6190_v20, %v3209_v13  ;;  %v6251_v11 = vmul.f32 0.70710677, %v6240_v22  ;;  %v6253_v27 = vpop.eup %4835  ;;  %4845 = vpow2.f32 %v3315_v42  ;;  %v6257_v45 = vsel %vm3024_vm11, 1.0, %v6605_v32 }
 0xb7a   : > { %v3282_v13 = vsub.f32 0.0, %v3058_v36  ;;  %v6261_v2 = vpop.eup %4837  ;;  %v3089_v48 = vadd.f32 1.0, %v3073_v18  ;;  %v3074_v8 = vmul.f32 0.3275911, %v3058_v36  ;;  %4847 = vpow2.f32 %v3317_v59 }
 0xb7b   : > { %v3241_v41 = vadd.f32 0.2548296, %v3225_v37  ;;  %v3088_v37 = vadd.f32 1.0, %v3072_v25  ;;  %v3059_v60 = vand.u32 2147483647, %v6251_v11  ;;  %v6271_v62 = vmul.f32 0.5, %v2965_v23 }
 0xb7c   : > { %v3319_v44 = vmul.f32 1.442695, %v3296_v63  ;;  %v6269_v42 = vpop.eup %4839  ;;  %v3321_v25 = vmul.f32 1.442695, %v3297_v14  ;;  %v3298_v21 = vmul.f32 %v3282_v13, %v3058_v36  ;;  %vm3026_vm13 = vcmp.ge.f32.partialorder %v3010_v19, 0.0 }
 0xb7d   : > { %v3257_v29 = vmul.f32 %v6190_v20, %v3241_v41  ;;  %v6259_v20 = vmul.f32 0.70710677, %v2971_v12  ;;  %v6266_v41 = vsel %vm3025_vm12, 1.0, %v6605_v32  ;;  %v3283_v24 = vsub.f32 0.0, %v3059_v60 }
 0xb7e   : > { %6641 = vst [vmem:[#allocation17_spill] sm:$0xff] %v6266_v41  ;;  %4849 = vrcp.f32 %v3088_v37  ;;  %v3090_v53 = vadd.f32 1.0, %v3074_v8  ;;  %v6277_v63 = vadd.f32 %v6213_v50, %v6163_v16  ;;  %v2977_v23 = vadd.f32 %v6215_v28, %v6165_v39 }
 0xb7f   : > { %v3337_v38 = vmul.f32 %v4826_v51, %v3257_v29  ;;  %v3060_v46 = vand.u32 2147483647, %v6259_v20  ;;  %v3075_v51 = vmul.f32 0.3275911, %v3059_v60  ;;  %v6273_v29 = vpop.eup %4841  ;;  %4851 = vrcp.f32 %v3089_v48 }
 0xb80   : > { %6642 = vst [vmem:[#allocation18_spill] sm:$0xff] %v6277_v63  ;;  %4853 = vpow2.f32 %v3319_v44  ;;  %v3299_v32 = vmul.f32 %v3283_v24, %v3059_v60  ;;  %v6643_v36 = vmov -1.0   ;;  %v3323_v13 = vmul.f32 1.442695, %v3298_v21 }
 0xb81   : > { %v3284_v18 = vsub.f32 0.0, %v3060_v46  ;;  %v3353_v59 = vsub.f32 1.0, %v3337_v38  ;;  %v3076_v14 = vmul.f32 0.3275911, %v3060_v46  ;;  %4855 = vpow2.f32 %v3321_v25  ;;  %v6287_v38 = vpop.eup %4843 }
 0xb82   : > { %v6282_v19 = vsel %vm3026_vm13, 1.0, %v6643_v36  ;;  %v6285_v37 = vmul.f32 0.70710677, %v6277_v63  ;;  %vm3027_vm14 = vcmp.ge.f32.partialorder %v6251_v11, 0.0  ;;  %v3091_v50 = vadd.f32 1.0, %v3075_v51 }
 0xb83   : > { %v6290_v48 = vmul.f32 0.5, %v2971_v12  ;;  %v3300_v24 = vmul.f32 %v3284_v18, %v3060_v46  ;;  %v3369_v8 = vmul.f32 %v3353_v59, %v6175_v34  ;;  %4857 = vrcp.f32 %v3090_v53  ;;  %v6296_v44 = vpop.eup %4845 }
 0xb84   : > { %v3061_v28 = vand.u32 2147483647, %v6285_v37  ;;  %v6294_v60 = vmul.f32 0.70710677, %v2977_v23  ;;  %v3325_v21 = vmul.f32 1.442695, %v3299_v32  ;;  %v6300_v49 = vadd.f32 %v6226_v3, %v6163_v16  ;;  %v6307_v18 = vpop.eup %4847 }
 0xb85   : > { %6644 = vst [vmem:[#allocation19_spill] sm:$0xff] %v6290_v48  ;;  %v3092_v25 = vadd.f32 1.0, %v3076_v14  ;;  %v6304_v12 = vadd.f32 %v6232_v1, %v6165_v39  ;;  %4859 = vpow2.f32 %v3323_v13  ;;  %vm3028_vm15 = vcmp.ge.f32.partialorder %v6259_v20, 0.0 }
 0xb86   : > { %6645 = vst [vmem:[#allocation20_spill] sm:$0xff] %v6300_v49  ;;  %v3077_v46 = vmul.f32 0.3275911, %v3061_v28  ;;  %v3285_v34 = vsub.f32 0.0, %v3061_v28  ;;  %v3062_v51 = vand.u32 2147483647, %v6294_v60  ;;  %4861 = vrcp.f32 %v3091_v50 }
 0xb87   : > { %6646 = vst [vmem:[#allocation21_spill] sm:$0xff] %v6304_v12  ;;  %v3327_v32 = vmul.f32 1.442695, %v3300_v24  ;;  %v6311_v59 = vmul.f32 0.70710677, %v6300_v49  ;;  %v3385_v1 = vadd.f32 1.0, %v3369_v8  ;;  %4863 = vrcp.f32 %v3092_v25 }
 0xb88   : > { %v3093_v16 = vadd.f32 1.0, %v3077_v46  ;;  %v3301_v3 = vmul.f32 %v3285_v34, %v3061_v28  ;;  %v3078_v53 = vmul.f32 0.3275911, %v3062_v51  ;;  %v3286_v14 = vsub.f32 0.0, %v3062_v51  ;;  %v6313_v39 = vpop.eup %4849 }
 0xb89   : > { %6647 = vst [vmem:[#allocation22_spill] sm:$0xff] %v6311_v59  ;;  %v3063_v13 = vand.u32 2147483647, %v6311_v59  ;;  %v6317_v56 = vmul.f32 0.70710677, %v6304_v12  ;;  %v6319_v50 = vpop.eup %4851  ;;  %v6324_v24 = vsel %vm3027_vm14, 1.0, %v6643_v36  ;;  %4865 = vpow2.f32 %v3325_v21 }
 0xb8a   : > { %6649 = vst [vmem:[#allocation24_spill] sm:$0xff] %v6324_v24  ;;  %v3329_v28 = vmul.f32 1.442695, %v3301_v3  ;;  %v3302_v46 = vmul.f32 %v3286_v14, %v3062_v51  ;;  %v6326_v34 = vpop.eup %4853  ;;  %4867 = vpow2.f32 %v3327_v32  ;;  %v3094_v8 = vadd.f32 1.0, %v3078_v53 }
 0xb8b   : > { %6648 = vst [vmem:[#allocation23_spill] sm:$0xff] %v6317_v56  ;;  %v3079_v25 = vmul.f32 0.3275911, %v3063_v13  ;;  %v3287_v40 = vsub.f32 0.0, %v3063_v13  ;;  %v6328_v31 = vpop.eup %4855  ;;  %v6333_v35 = vsel %vm3028_vm15, 1.0, %v6643_v36  ;;  %4869 = vrcp.f32 %v3093_v16 }
 0xb8c   : > { %6650 = vst [vmem:[#allocation25_spill] sm:$0xff] %v6328_v31  ;;  %6651 = vst [vmem:[#allocation26_spill] sm:$0xff] %v6333_v35  ;;  %v3331_v11 = vmul.f32 1.442695, %v3302_v46  ;;  %v3064_v49 = vand.u32 2147483647, %v6317_v56  ;;  %v6337_v21 = vmul.f32 %v3385_v1, %v6172_v33  ;;  %4871 = vpow2.f32 %v3329_v28 }
 0xb8d   : > { %v3095_v51 = vadd.f32 1.0, %v3079_v25  ;;  %v3130_v32 = vmul.f32 1.0614054, %v6211_v30  ;;  %v6340_v3 = vpop.eup %4857  ;;  %v3303_v53 = vmul.f32 %v3287_v40, %v3063_v13  ;;  %v3132_v20 = vmul.f32 1.0614054, %v6245_v47 }
 0xb8e   : > { %v3080_v14 = vmul.f32 0.3275911, %v3064_v49  ;;  %v3288_v63 = vsub.f32 0.0, %v3064_v49  ;;  %v6343_v12 = vmul.f32 0.5, %v2977_v23  ;;  %4873 = vrcp.f32 %v3094_v8 }
 0xb8f   : > { %v3146_v16 = vadd.f32 -1.4531521, %v3130_v32  ;;  %v3131_v46 = vmul.f32 1.0614054, %v6237_v15  ;;  %v6346_v22 = vpop.eup %4859  ;;  %4875 = vpow2.f32 %v3331_v11  ;;  %v3148_v1 = vadd.f32 -1.4531521, %v3132_v20 }
 0xb90   : > { %6652 = vst [vmem:[#allocation27_spill] sm:$0xff] %v6343_v12  ;;  %v3096_v33 = vadd.f32 1.0, %v3080_v14  ;;  %v3134_v28 = vmul.f32 1.0614054, %v6273_v29  ;;  %v6349_v25 = vpop.eup %4861  ;;  %4877 = vrcp.f32 %v3095_v51  ;;  %v3133_v23 = vmul.f32 1.0614054, %v6261_v2 }
 0xb91   : > { %v3162_v40 = vmul.f32 %v6211_v30, %v3146_v16  ;;  %v3147_v13 = vadd.f32 -1.4531521, %v3131_v46  ;;  %v6353_v12 = vmul.f32 1.442695, %v3303_v53  ;;  %v6355_v8 = vmul.f32 %v3288_v63, %v3064_v49  ;;  %v6358_v11 = vpop.eup %4863 }
 0xb92   : > { %v3164_v32 = vmul.f32 %v6245_v47, %v3148_v1  ;;  %v3150_v48 = vadd.f32 -1.4531521, %v3134_v28  ;;  %v3149_v52 = vadd.f32 -1.4531521, %v3133_v23  ;;  %v3136_v51 = vmul.f32 1.0614054, %v6313_v39 }
 0xb93   : > { %v3178_v14 = vadd.f32 1.4214138, %v3162_v40  ;;  %v3163_v20 = vmul.f32 %v6237_v15, %v3147_v13  ;;  %v6362_v59 = vpop.eup %4865  ;;  %4879 = vrcp.f32 %v3096_v33  ;;  %v3135_v49 = vmul.f32 1.0614054, %v6287_v38 }
 0xb94   : > { %6653 = vst [vmem:[#allocation28_spill] sm:$0xff] %v6362_v59  ;;  %v3180_v16 = vadd.f32 1.4214138, %v3164_v32  ;;  %v3166_v53 = vmul.f32 %v6273_v29, %v3150_v48  ;;  %v6366_v63 = vpop.eup %4867  ;;  %v3165_v28 = vmul.f32 %v6261_v2, %v3149_v52  ;;  %v3152_v40 = vadd.f32 -1.4531521, %v3136_v51 }
 0xb95   : > { %6654 = vst [vmem:[#allocation29_spill] sm:$0xff] %v6366_v63  ;;  %v3194_v46 = vmul.f32 %v6211_v30, %v3178_v14  ;;  %v3179_v1 = vadd.f32 1.4214138, %v3163_v20  ;;  %v6370_v13 = vpop.eup %4869  ;;  %v3151_v35 = vadd.f32 -1.4531521, %v3135_v49  ;;  %4881 = vpow2.f32 %v6353_v12 }
 0xb96   : > { %v3196_v23 = vmul.f32 %v6245_v47, %v3180_v16  ;;  %v3182_v24 = vadd.f32 1.4214138, %v3166_v53  ;;  %v3138_v33 = vmul.f32 1.0614054, %v6340_v3  ;;  %v6374_v32 = vpop.eup %4871  ;;  %v3181_v41 = vadd.f32 1.4214138, %v3165_v28 }
 0xb97   : > { %6655 = vst [vmem:[#allocation30_spill] sm:$0xff] %v6374_v32  ;;  %v3210_v48 = vadd.f32 -0.28449672, %v3194_v46  ;;  %v3195_v56 = vmul.f32 %v6237_v15, %v3179_v1  ;;  %v3168_v14 = vmul.f32 %v6313_v39, %v3152_v40  ;;  %v3167_v51 = vmul.f32 %v6287_v38, %v3151_v35 }
 0xb98   : > { %v3212_v20 = vadd.f32 -0.28449672, %v3196_v23  ;;  %v3198_v52 = vmul.f32 %v6273_v29, %v3182_v24  ;;  %v3154_v59 = vadd.f32 -1.4531521, %v3138_v33  ;;  %v6380_v63 = vpop.eup %4873  ;;  %v3197_v49 = vmul.f32 %v6261_v2, %v3181_v41 }
 0xb99   : > { %v3226_v16 = vmul.f32 %v6211_v30, %v3210_v48  ;;  %v3211_v53 = vadd.f32 -0.28449672, %v3195_v56  ;;  %v3184_v32 = vadd.f32 1.4214138, %v3168_v14  ;;  %v6384_v46 = vpop.eup %4875  ;;  %v3183_v40 = vadd.f32 1.4214138, %v3167_v51 }
 0xb9a   : > { %6656 = vst [vmem:[#allocation31_spill] sm:$0xff] %v6384_v46  ;;  %v3228_v1 = vmul.f32 %v6245_v47, %v3212_v20  ;;  %v3214_v28 = vadd.f32 -0.28449672, %v3198_v52  ;;  %v3170_v23 = vmul.f32 %v6340_v3, %v3154_v59  ;;  %v6388_v24 = vpop.eup %4877  ;;  %v3213_v36 = vadd.f32 -0.28449672, %v3197_v49 }
 0xb9b   : > { %v3242_v35 = vadd.f32 0.2548296, %v3226_v16  ;;  %v3227_v33 = vmul.f32 %v6237_v15, %v3211_v53  ;;  %v3200_v48 = vmul.f32 %v6313_v39, %v3184_v32  ;;  %v3199_v14 = vmul.f32 %v6287_v38, %v3183_v40 }
 0xb9c   : > { %v3244_v56 = vadd.f32 0.2548296, %v3228_v1  ;;  %v3230_v41 = vmul.f32 %v6273_v29, %v3214_v28  ;;  %v3186_v46 = vadd.f32 1.4214138, %v3170_v23  ;;  %v3229_v51 = vmul.f32 %v6261_v2, %v3213_v36 }
 0xb9d   : > { %v3258_v20 = vmul.f32 %v6211_v30, %v3242_v35  ;;  %v3243_v52 = vadd.f32 0.2548296, %v3227_v33  ;;  %v3216_v59 = vadd.f32 -0.28449672, %v3200_v48  ;;  %v6396_v31 = vpop.eup %4879  ;;  %v3215_v49 = vadd.f32 -0.28449672, %v3199_v14 }
 0xb9e   : > { %v3260_v16 = vmul.f32 %v6245_v47, %v3244_v56  ;;  %v3246_v53 = vadd.f32 0.2548296, %v3230_v41  ;;  %v3202_v32 = vmul.f32 %v6340_v3, %v3186_v46  ;;  %v3245_v40 = vadd.f32 0.2548296, %v3229_v51 }
 0xb9f   : > { %v3338_v1 = vmul.f32 %v6221_v0, %v3258_v20  ;;  %v3259_v28 = vmul.f32 %v6237_v15, %v3243_v52  ;;  %v3232_v23 = vmul.f32 %v6313_v39, %v3216_v59  ;;  %v3231_v35 = vmul.f32 %v6287_v38, %v3215_v49 }
 0xba0   : > { %v3340_v30 = vmul.f32 %v6253_v27, %v3260_v16  ;;  %v3262_v36 = vmul.f32 %v6273_v29, %v3246_v53  ;;  %v3218_v33 = vadd.f32 -0.28449672, %v3202_v32  ;;  %v3261_v56 = vmul.f32 %v6261_v2, %v3245_v40 }
 0xba1   : > { %v3354_v48 = vsub.f32 1.0, %v3338_v1  ;;  %v3339_v47 = vmul.f32 %v6248_v43, %v3259_v28  ;;  %v3248_v46 = vadd.f32 0.2548296, %v3232_v23  ;;  %v3247_v15 = vadd.f32 0.2548296, %v3231_v35 }
 0xba2   : > { %v3356_v41 = vsub.f32 1.0, %v3340_v30  ;;  %v3342_v0 = vmul.f32 %v6296_v44, %v3262_v36  ;;  %v3234_v14 = vmul.f32 %v6340_v3, %v3218_v33  ;;  %v3341_v29 = vmul.f32 %v6269_v42, %v3261_v56 }
 0xba3   : > { %v3370_v20 = vmul.f32 %v3354_v48, %v6184_v4  ;;  %v3355_v27 = vsub.f32 1.0, %v3339_v47  ;;  %v3264_v52 = vmul.f32 %v6313_v39, %v3248_v46  ;;  %v3263_v43 = vmul.f32 %v6287_v38, %v3247_v15 }
 0xba4   : > { %v3372_v51 = vmul.f32 %v3356_v41, %v6199_v9  ;;  %v3358_v59 = vsub.f32 1.0, %v3342_v0  ;;  %v3250_v2 = vadd.f32 0.2548296, %v3234_v14  ;;  %v3357_v44 = vsub.f32 1.0, %v3341_v29 }
 0xba5   : > { %v3386_v16 = vadd.f32 1.0, %v3370_v20  ;;  %v3371_v53 = vmul.f32 %v3355_v27, %v6195_v6  ;;  %v3344_v49 = vmul.f32 %v6326_v34, %v3264_v52  ;;  %v3343_v1 = vmul.f32 %v6307_v18, %v3263_v43 }
 0xba6   : > { %v3388_v32 = vadd.f32 1.0, %v3372_v51  ;;  %v3374_v4 = vmul.f32 %v3358_v59, %v6224_v58  ;;  %v3266_v42 = vmul.f32 %v6340_v3, %v3250_v2  ;;  %v3373_v28 = vmul.f32 %v3357_v44, %v6204_v17  ;;  %v6449_v44 = vpop.eup %4881 }
 0xba7   : > { %v3402_v39 = vmul.f32 %v3386_v16, %v6177_v57  ;;  %v3387_v9 = vadd.f32 1.0, %v3371_v53  ;;  %v3360_v38 = vsub.f32 1.0, %v3344_v49  ;;  %v3359_v6 = vsub.f32 1.0, %v3343_v1 }
 0xba8   : > { %v3404_v40 = vmul.f32 %v3388_v32, %v6188_v55  ;;  %v3390_v23 = vadd.f32 1.0, %v3374_v4  ;;  %v3346_v30 = vmul.f32 %v6346_v22, %v3266_v42  ;;  %v3389_v58 = vadd.f32 1.0, %v3373_v28 }
 0xba9   : > { %3520 = vmatprep.mubr.f32.mxu1 %v3402_v39  ;;  %v3376_v18 = vmul.f32 %v3360_v38, %v6257_v45  ;;  %v3137_v34 = vmul.f32 1.0614054, %v6319_v50  ;;  %v3335_v57 = vmul.f32 1.442695, %v6355_v8  ;;  %v3403_v17 = vmul.f32 %v3387_v9, %v6186_v54 }
 0xbaa   : > { %3521 = vmatmul.mubr.f32.vlgmr.msra.gmra.mrb[40].mxu1 %v6337_v21  ;;  %v3362_v3 = vsub.f32 1.0, %v3346_v30  ;;  %v3140_v55 = vmul.f32 1.0614054, %v6358_v11  ;;  %v3406_v22 = vmul.f32 %v3390_v23, %v6207_v26  ;;  %v3139_v35 = vmul.f32 1.0614054, %v6349_v25 }
 0xbab   : > { %3525 = vmatprep.mubr.f32.mxu1 %v3404_v40  ;;  %v3392_v36 = vadd.f32 1.0, %v3376_v18  ;;  %v3153_v12 = vadd.f32 -1.4531521, %v3137_v34  ;;  %v3375_v45 = vmul.f32 %v3359_v6, %v6229_v5  ;;  %v3142_v8 = vmul.f32 1.0614054, %v6380_v63 }
 0xbac   : > { %v3378_v33 = vmul.f32 %v3362_v3, %v6282_v19  ;;  %v3156_v48 = vadd.f32 -1.4531521, %v3140_v55  ;;  %v3405_v21 = vmul.f32 %v3389_v58, %v6201_v10  ;;  %v3155_v47 = vadd.f32 -1.4531521, %v3139_v35 }
 0xbad   : > { %v3169_v54 = vmul.f32 %v6319_v50, %v3153_v12  ;;  %v3141_v56 = vmul.f32 1.0614054, %v6370_v13  ;;  %v3408_v26 = vmul.f32 %v3392_v36, %v6235_v7  ;;  %v3158_v0 = vadd.f32 -1.4531521, %v3142_v8  ;;  %v6657_v8 = vld [vmem:[#allocation25_spill] sm:$0xff] }
 0xbae   : > { %3526 = vmatmul.mubr.f32.gmra.mrb[42].mxu1 %v3403_v17  ;;  %v3394_v46 = vadd.f32 1.0, %v3378_v33  ;;  %v3172_v41 = vmul.f32 %v6358_v11, %v3156_v48  ;;  %v3171_v19 = vmul.f32 %v6349_v25, %v3155_v47  ;;  %v3144_v14 = vmul.f32 1.0614054, %v6396_v31 }
 0xbaf   : > { %3530 = vmatprep.mubr.f32.mxu1 %v3406_v22  ;;  %v3185_v5 = vadd.f32 1.4214138, %v3169_v54  ;;  %v3157_v15 = vadd.f32 -1.4531521, %v3141_v56  ;;  %v3391_v10 = vadd.f32 1.0, %v3375_v45  ;;  %v3174_v27 = vmul.f32 %v6380_v63, %v3158_v0 }
 0xbb0   : > { %v3188_v20 = vadd.f32 1.4214138, %v3172_v41  ;;  %v3143_v29 = vmul.f32 1.0614054, %v6388_v24  ;;  %v3187_v7 = vadd.f32 1.4214138, %v3171_v19  ;;  %v3410_v43 = vmul.f32 %v3394_v46, %v6271_v62 }
 0xbb1   : > { %v3201_v52 = vmul.f32 %v6319_v50, %v3185_v5  ;;  %v3173_v51 = vmul.f32 %v6370_v13, %v3157_v15  ;;  %v3160_v59 = vadd.f32 -1.4531521, %v3144_v14  ;;  %v3190_v16 = vadd.f32 1.4214138, %v3174_v27  ;;  %v6659_v46 = vld [vmem:[#allocation29_spill] sm:$0xff]  ;;  %v6660_v19 = vld [vmem:[#allocation28_spill] sm:$0xff] }
 0xbb2   : > { %3531 = vmatmul.mubr.f32.gmra.mrb[44].mxu1 %v3405_v21  ;;  %v3204_v2 = vmul.f32 %v6358_v11, %v3188_v20  ;;  %v3159_v53 = vadd.f32 -1.4531521, %v3143_v29  ;;  %v3203_v32 = vmul.f32 %v6349_v25, %v3187_v7  ;;  %v3407_v42 = vmul.f32 %v3391_v10, %v6219_v61  ;;  %v6661_v27 = vld [vmem:[#allocation31_spill] sm:$0xff] }
 0xbb3   : > { %3535 = vmatprep.mubr.f32.mxu1 %v3408_v26  ;;  %v3217_v49 = vadd.f32 -0.28449672, %v3201_v52  ;;  %v3189_v4 = vadd.f32 1.4214138, %v3173_v51  ;;  %v3176_v1 = vmul.f32 %v6396_v31, %v3160_v59  ;;  %v3206_v9 = vmul.f32 %v6380_v63, %v3190_v16  ;;  %v6662_v52 = vld [vmem:[#allocation17_spill] sm:$0xff]  ;;  %v6664_v16 = vld [vmem:[#allocation23_spill] sm:$0xff] }
 0xbb4   : > { %v3220_v39 = vadd.f32 -0.28449672, %v3204_v2  ;;  %v3175_v62 = vmul.f32 %v6388_v24, %v3159_v53  ;;  %v3219_v38 = vadd.f32 -0.28449672, %v3203_v32  ;;  %4883 = vpow2.f32 %v3335_v57 }
 0xbb5   : > { %v3233_v28 = vmul.f32 %v6319_v50, %v3217_v49  ;;  %v3205_v40 = vmul.f32 %v6370_v13, %v3189_v4  ;;  %v3192_v23 = vadd.f32 1.4214138, %v3176_v1  ;;  %v3222_v30 = vadd.f32 -0.28449672, %v3206_v9  ;;  %v6666_v4 = vld [vmem:[#allocation24_spill] sm:$0xff]  ;;  %v6667_v9 = vld [vmem:[#allocation22_spill] sm:$0xff] }
 0xbb6   : > { %3536 = vmatmul.mubr.f32.gmra.mrb[46].mxu1 %v3407_v42  ;;  %v3236_v6 = vmul.f32 %v6358_v11, %v3220_v39  ;;  %v3191_v58 = vadd.f32 1.4214138, %v3175_v62  ;;  %v3235_v61 = vmul.f32 %v6349_v25, %v3219_v38  ;;  %vm3029_vm1 = vcmp.ge.f32.partialorder %v6285_v37, 0.0 }
 0xbb7   : > { %3540 = vmatprep.mubr.f32.mxu1 %v3410_v43  ;;  %v3249_v18 = vadd.f32 0.2548296, %v3233_v28  ;;  %v3221_v34 = vadd.f32 -0.28449672, %v3205_v40  ;;  %v3208_v17 = vmul.f32 %v6396_v31, %v3192_v23  ;;  %v3238_v55 = vmul.f32 %v6380_v63, %v3222_v30 }
 0xbb8   : > { %v3252_v3 = vadd.f32 0.2548296, %v3236_v6  ;;  %v3207_v22 = vmul.f32 %v6388_v24, %v3191_v58  ;;  %v3251_v36 = vadd.f32 0.2548296, %v3235_v61  ;;  %vm3030_vm2 = vcmp.ge.f32.partialorder %v6294_v60, 0.0  ;;  %v6669_v58 = vld [vmem:[#allocation19_spill] sm:$0xff] }
 0xbb9   : > { %v3265_v57 = vmul.f32 %v6319_v50, %v3249_v18  ;;  %v3237_v12 = vmul.f32 %v6370_v13, %v3221_v34  ;;  %v3224_v35 = vadd.f32 -0.28449672, %v3208_v17  ;;  %v3254_v33 = vadd.f32 0.2548296, %v3238_v55  ;;  %v6670_v17 = vld [vmem:[#allocation15_spill] sm:$0xff] }
 0xbba   : > { %v3268_v45 = vmul.f32 %v6358_v11, %v3252_v3  ;;  %v3223_v48 = vadd.f32 -0.28449672, %v3207_v22  ;;  %v3267_v54 = vmul.f32 %v6349_v25, %v3251_v36  ;;  %v6658_v26 = vmov -1.0  }
 0xbbb   : > { %v3345_v21 = vmul.f32 %v6657_v8, %v3265_v57  ;;  %v3253_v47 = vadd.f32 0.2548296, %v3237_v12  ;;  %v3240_v56 = vmul.f32 %v6396_v31, %v3224_v35  ;;  %v3045_v50 = vsel %vm3029_vm1, 1.0, %v6658_v26  ;;  %v6673_v8 = vld [vmem:[#allocation18_spill] sm:$0xff] }
 0xbbc   : > { %v3348_v41 = vmul.f32 %v6659_v46, %v3268_v45  ;;  %v3270_v0 = vmul.f32 %v6380_v63, %v3254_v33  ;;  %v3239_v5 = vmul.f32 %v6388_v24, %v3223_v48  ;;  %v3347_v15 = vmul.f32 %v6660_v19, %v3267_v54  ;;  %v6663_v63 = vld [vmem:[#allocation30_spill] sm:$0xff]  ;;  %v6672_v33 = vld [vmem:[#allocation21_spill] sm:$0xff] }
 0xbbd   : > { %v3361_v11 = vsub.f32 1.0, %v3345_v21  ;;  %v3269_v14 = vmul.f32 %v6370_v13, %v3253_v47  ;;  %v3256_v10 = vadd.f32 0.2548296, %v3240_v56  ;;  %v3046_v25 = vsel %vm3030_vm2, 1.0, %v6658_v26  ;;  %v6665_v13 = vld [vmem:[#allocation26_spill] sm:$0xff] }
 0xbbe   : > { %v3364_v20 = vsub.f32 1.0, %v3348_v41  ;;  %v3350_v37 = vmul.f32 %v6661_v27, %v3270_v0  ;;  %v3255_v29 = vadd.f32 0.2548296, %v3239_v5  ;;  %v3363_v51 = vsub.f32 1.0, %v3347_v15  ;;  %v4884_v2 = vpop.eup %4883  ;;  %v3866_v0 = vld [vmem:[%s6600_s13] ss:$0 sm:$0xff] }
 0xbbf   : > { %v3377_v7 = vmul.f32 %v3361_v11, %v6662_v52  ;;  %v3349_v59 = vmul.f32 %v6663_v63, %v3269_v14  ;;  %v3272_v43 = vmul.f32 %v6396_v31, %v3256_v10  ;;  %vm3032_vm3 = vcmp.ge.f32.partialorder %v6664_v16, 0.0  ;;  %v6668_v31 = vld [vmem:[#allocation16_spill] sm:$0xff]  ;;  %v6675_v10 = vld [vmem:[#allocation7_spill] sm:$0xff]  ;;  %v6676_v52 = vld [vmem:[#allocation9_spill] sm:$0xff] }
 0xbc0   : > { %v3380_v53 = vmul.f32 %v3364_v20, %v6665_v13  ;;  %v3366_v49 = vsub.f32 1.0, %v3350_v37  ;;  %v3271_v60 = vmul.f32 %v6388_v24, %v3255_v29  ;;  %v3379_v1 = vmul.f32 %v3363_v51, %v6666_v4 }
 0xbc1   : > { %v3393_v32 = vadd.f32 1.0, %v3377_v7  ;;  %v3365_v42 = vsub.f32 1.0, %v3349_v59  ;;  %v3352_v39 = vmul.f32 %v4884_v2, %v3272_v43  ;;  %vm3031_vm4 = vcmp.ge.f32.partialorder %v6667_v9, 0.0  ;;  %v6677_v2 = vld [vmem:[#allocation8_spill] sm:$0xff] }
 0xbc2   : > { %v3396_v62 = vadd.f32 1.0, %v3380_v53  ;;  %v3382_v28 = vmul.f32 %v3366_v49, %v3046_v25  ;;  %v3351_v38 = vmul.f32 %v6449_v44, %v3271_v60  ;;  %v3395_v23 = vadd.f32 1.0, %v3379_v1  ;;  %v6671_v44 = vld [vmem:[#allocation27_spill] sm:$0xff]  ;;  %v6678_v49 = vld [vmem:[#allocation10_spill] sm:$0xff] }
 0xbc3   : > { %v3409_v40 = vmul.f32 %v3393_v32, %v6668_v31  ;;  %v3381_v6 = vmul.f32 %v3365_v42, %v3045_v50  ;;  %v3368_v30 = vsub.f32 1.0, %v3352_v39  ;;  %v3048_v24 = vsel %vm3032_vm3, 1.0, %v6658_v26  ;;  %v6674_v50 = vld [vmem:[#allocation20_spill] sm:$0xff] }
 0xbc4   : > { %v3412_v18 = vmul.f32 %v3396_v62, %v6669_v58  ;;  %v3398_v61 = vadd.f32 1.0, %v3382_v28  ;;  %v3367_v34 = vsub.f32 1.0, %v3351_v38  ;;  %v2995_v3 = vmul.f32 0.5, %v6670_v17  ;;  %v6679_v62 = vld [vmem:[#allocation11_spill] sm:$0xff] }
 0xbc5   : > { %3541 = vmatmul.mubr.f32.gmra.mrb[48].mxu1 %v3409_v40  ;;  %v3384_v55 = vmul.f32 %v3368_v30, %v3048_v24  ;;  %v3047_v22 = vsel %vm3031_vm4, 1.0, %v6658_v26  ;;  %v3397_v12 = vadd.f32 1.0, %v3381_v6  ;;  %v3000_v48 = vmul.f32 0.5, %v6672_v33  ;;  %v6680_v6 = vld [vmem:[#allocation12_spill] sm:$0xff] }
 0xbc6   : > { %3545 = vmatprep.mubr.f32.mxu1 %v3412_v18  ;;  %v3414_v57 = vmul.f32 %v3398_v61, %v6671_v44  ;;  %v3411_v36 = vmul.f32 %v3395_v23, %v2995_v3  ;;  %v3383_v45 = vmul.f32 %v3367_v34, %v3047_v22  ;;  %v2997_v21 = vmul.f32 0.5, %v6673_v8  ;;  %v6681_v34 = vld [vmem:[#allocation13_spill] sm:$0xff]  ;;  %v6682_v22 = vld [vmem:[#allocation14_spill] sm:$0xff] }
 0xbc7   : > { %v3400_v35 = vadd.f32 1.0, %v3384_v55  ;;  %v2999_v26 = vmul.f32 0.5, %v6674_v50 }
 0xbc8   : > { %v3413_v47 = vmul.f32 %v3397_v12, %v2997_v21  ;;  %v3399_v56 = vadd.f32 1.0, %v3383_v45 }
 0xbc9   : > { %3546 = vmatmul.mubr.f32.gmra.mrb[50].mxu1 %v3411_v36  ;;  %v3416_v54 = vmul.f32 %v3400_v35, %v3000_v48 }
 0xbca   : > { %3550 = vmatprep.mubr.f32.mxu1 %v3414_v57  ;;  %v3415_v46 = vmul.f32 %v3399_v56, %v2999_v26 }
 0xbcd   : > { %3551 = vmatmul.mubr.f32.gmra.mrb[52].mxu1 %v3413_v47 }
 0xbce   : > { %3555 = vmatprep.mubr.f32.mxu1 %v3416_v54 }
 0xbd1   : > { %3556 = vmatmul.mubr.f32.gmra.mrb[54].mxu1 %v3415_v46 }
 0xc7d   : > { %v4090_v41 = vpop.f32.mrb[40].mxu1 }
 0xc7e   : > { %v4091_v5 = vpop.f32.mrb[41].mxu1 }
 0xc7f   : > { %v4092_v11 = vadd.f32 %v4091_v5, %v4090_v41 }
 0xc81   : > { %v3523_v19 = vadd.f32 %v4092_v11, %v3866_v0  ;;  %v4093_v15 = vpop.f32.mrb[42].mxu1 }
 0xc82   : > { %v4094_v14 = vpop.f32.mrb[43].mxu1 }
 0xc83   : > { %v3561_v25 = vadd.f32 %v3523_v19, %v6675_v10  ;;  %v4095_v20 = vadd.f32 %v4094_v14, %v4093_v15 }
 0xc85   : > { %3569 = vst.msk [vmem:[%s6510_s21] sm:$0xff] %vm476_vm0, %v3561_v25  ;;  %v3528_v27 = vadd.f32 %v4095_v20, %v3866_v0  ;;  %v4096_v37 = vpop.f32.mrb[44].mxu1 }
 0xc86   : > { %v4097_v29 = vpop.f32.mrb[45].mxu1 }
 0xc87   : > { %v3562_v7 = vadd.f32 %v3528_v27, %v6676_v52  ;;  %v4098_v51 = vadd.f32 %v4097_v29, %v4096_v37 }
 0xc89   : > { %3570 = vst.msk [vmem:[%s6510_s21 + $0x8] sm:$0xff] %vm476_vm0, %v3562_v7  ;;  %v3533_v63 = vadd.f32 %v4098_v51, %v3866_v0  ;;  %v4099_v59 = vpop.f32.mrb[46].mxu1 }
 0xc8a   : > { %v4100_v43 = vpop.f32.mrb[47].mxu1 }
 0xc8b   : > { %v3563_v16 = vadd.f32 %v3533_v63, %v6677_v2  ;;  %v4101_v13 = vadd.f32 %v4100_v43, %v4099_v59 }
 0xc8d   : > { %3571 = vst.msk [vmem:[%s6510_s21 + $0x10] sm:$0xff] %vm476_vm0, %v3563_v16  ;;  %v3538_v53 = vadd.f32 %v4101_v13, %v3866_v0 }
 0xc8f   : > { %v3564_v60 = vadd.f32 %v3538_v53, %v6678_v49 }
 0xc91   : > { %3572 = vst.msk [vmem:[%s6510_s21 + $0x18] sm:$0xff] %vm476_vm0, %v3564_v60 }
 0xc98   : > { %v4102_v32 = vpop.f32.mrb[48].mxu1 }
 0xc99   : > { %v4103_v4 = vpop.f32.mrb[49].mxu1 }
 0xc9a   : > { %v4104_v1 = vadd.f32 %v4103_v4, %v4102_v32 }
 0xc9c   : > { %v3543_v42 = vadd.f32 %v4104_v1, %v3866_v0  ;;  %v4105_v39 = vpop.f32.mrb[50].mxu1 }
 0xc9d   : > { %v4106_v9 = vpop.f32.mrb[51].mxu1 }
 0xc9e   : > { %v3565_v28 = vadd.f32 %v3543_v42, %v6679_v62  ;;  %v4107_v38 = vadd.f32 %v4106_v9, %v4105_v39 }
 0xca0   : > { %3573 = vst.msk [vmem:[%s6510_s21 + $0x20] sm:$0xff] %vm476_vm0, %v3565_v28  ;;  %v3548_v31 = vadd.f32 %v4107_v38, %v3866_v0  ;;  %v4108_v40 = vpop.f32.mrb[52].mxu1 }
 0xca1   : > { %v4109_v23 = vpop.f32.mrb[53].mxu1 }
 0xca2   : > { %v3566_v30 = vadd.f32 %v3548_v31, %v6680_v6  ;;  %v4110_v24 = vadd.f32 %v4109_v23, %v4108_v40 }
 0xca4   : > { %3574 = vst.msk [vmem:[%s6510_s21 + $0x28] sm:$0xff] %vm476_vm0, %v3566_v30  ;;  %v3553_v58 = vadd.f32 %v4110_v24, %v3866_v0  ;;  %v4111_v18 = vpop.f32.mrb[54].mxu1 }
 0xca5   : > { %v4112_v61 = vpop.f32.mrb[55].mxu1 }
 0xca6   : > { %v3567_v17 = vadd.f32 %v3553_v58, %v6681_v34  ;;  %v4113_v3 = vadd.f32 %v4112_v61, %v4111_v18 }
 0xca8   : > { %3575 = vst.msk [vmem:[%s6510_s21 + $0x30] sm:$0xff] %vm476_vm0, %v3567_v17  ;;  %v3558_v55 = vadd.f32 %v4113_v3, %v3866_v0 }
 0xcaa   : > { %v3568_v44 = vadd.f32 %v3558_v55, %v6682_v22 }
 0xcac   : > { %3576 = vst.msk [vmem:[%s6510_s21 + $0x38] sm:$0xff] %vm476_vm0, %v3568_v44 }
 0xcad   : > { %4906 = shalt.err (!%p4903_p3)
}
 0xcae   : > { %s4907_s2 = scalar_lea.hbm %s6537_s27, 1024  ;;  %s4911_s25 = scalar_lea.hbm %s6601_s14, 2048 }
 0xcaf   : > { %p4908_p4 = scmp.ne.s32.totalorder %s6537_s27, %s4907_s2  ;;  %p4912_p9 = scmp.lt.u32.totalorder %s6537_s27, %s6601_s14 }
 0xcb0   : > { %p4913_p10 = scmp.lt.u32.totalorder %s4911_s25, %s4907_s2  ;;  %p4915_p12 = scmp.lt.u32.totalorder %s4907_s2, %s6537_s27 }
 0xcb1   : > { %p4909_p7 = pnand %p4908_p4, %p5075_p5 }
 0xcb2   : > { %p4914_p11 = por %p4913_p10, %p4912_p9 }
 0xcb3   : > { %p4910_p8 = pneg %p4909_p7 }
 0xcb4   : > { %p4916_p13 = por %p4915_p12, %p4914_p11 }
 0xcb6   : > { %p4917_p0 = pnand %p4916_p13, %p4910_p8 }
 0xcb8   : > { %4920 = shalt.err (!%p4917_p0)
}
 0xcb9   : > { %s4960_s28 = smov 128   ;;  %s4961_s22 = smov 8  }
 0xcba   : > { %4682 = dma.vmem_to_hbm [thread:$0]  (%p5075_p5), %s6539_s1, 1024, %s6537_s27, %s6546_s17, %s4960_s28, %s4960_s28, %s4961_s22  }
 0xcbb PF: > { %p4688_p1 = scmp.ge.s32.totalorder %s4955_s16, 2  ;;  %s3606_s20 = sand.u32 1, %s4943_s29  }
 0xcbc   : > { %s3607_s2 = scalar_lea.sflag [#allocation4], %s3606_s20 }
 0xcbd   : > { %p4685_p2 = pnand %p4688_p1, %p5079_p6 }
 0xcbf   : > { %4938 = dma.done.wait (!%p4685_p2), %s3607_s2, 1024  }
 0xcc0   : > { %4940 = vsyncadd (!%p4685_p2), %s3607_s2, 4294966272  ;;  %s6683_s21 = sld [smem:[#allocation6_spill]]  ;;  %p24_p3 = scmp.ge.s32.totalorder %s5062_s19, 4  }
 0xcc1   : > { %s6684_s29 = smov %s4947_s30  ;;  %s6685_s30 = smov %s4951_s15 }
 0xcc2   : > { %s6687_s16 = smov %s5062_s19  ;;  %26 = sbr.rel (!%p24_p3) target bundleno = 7 (0x7), region = 132 }
 0xcc6   : > { %s6686_s15 = smov %s6683_s21 }
 0xcc9   :  { %3612 = vsyncpa [#allocation4], 1 }
 0xcca   :  { %3614 = vsyncpa [#allocation4 + $0x1], 1 }

</bundles_post_ra>
